<compile_context>
chip_gen: v5e
topology: v5e:2x2
jax: 0.10.0
libtpu: 0.0.40
codegen_flags: <defaults>
</compile_context>

<pallas_src>
import jax
import jax.numpy as jnp
from jax.experimental import pallas as pl
from jax.experimental.pallas import tpu as pltpu

INPUT_DIM = 20
HIDDEN = 16
NUM_LAYERS = 3
NUM_DIR = 2
IN_PAD = 2 * HIDDEN                        # 32 (layer-0 input zero-padded 20 -> 32)
GATES = 4 * NUM_DIR * HIDDEN               # 128 fused gate lanes
FLAT = HIDDEN * NUM_DIR * NUM_LAYERS       # 96
N_COMP, N_UTIL, N_FIX = 18, 1, 5
N_HEAD = N_COMP + N_UTIL + N_FIX           # 24


def _sigmoid(x):
    # stable, single-EUP-op sigmoid (tanh is a native EUP transcendental)
    return 0.5 * jnp.tanh(0.5 * x) + 0.5


def fix_predictor_kernel(x_ref, wih_ref, whh_ref, b_ref, wh_ref, bh_ref,
                         comp_ref, util_ref, fix_ref, seq_ref):
    # x_ref: (T, 32) f32, time-major, batch=1 squeezed, feature-padded.
    # wih_ref: (L, 32, 128) input->gates (both dirs fused, bias-free).
    # whh_ref: (L, 32, 128) block-diagonal recurrent weights ([h_fwd | h_bwd] rows).
    # b_ref:   (L, 1, 128)  fused b_ih + b_hh.
    # wh_ref:  (96, 24), bh_ref: (1, 24) fused heads [comp | util | fix].
    # seq_ref: (T, 32) VMEM scratch holding a layer's outputs [h_fwd_t | h_bwd_t].
    T = x_ref.shape[0]
    H2 = 2 * HIDDEN

    # lane c belongs to the forward direction iff (c mod 32) < 16
    fwd_mask = (jax.lax.broadcasted_iota(jnp.int32, (1, GATES), 1) % H2) < HIDDEN

    finals = []
    for layer in range(NUM_LAYERS):
        seq = x_ref[...] if layer == 0 else seq_ref[...]          # (T, 32)

        # batched input projection for both directions, bias folded in: (T, 128)
        xproj = jnp.dot(seq, wih_ref[layer],
                        preferred_element_type=jnp.float32) + b_ref[layer]
        whh = whh_ref[layer]                                      # (32, 128)

        h = jnp.zeros((1, H2), jnp.float32)                       # [h_fwd | h_bwd]
        c = jnp.zeros((1, H2), jnp.float32)
        for s in range(T):                                        # static unroll (T small)
            # fwd consumes time step s, bwd consumes time step T-1-s
            xrow = jnp.where(fwd_mask, xproj[s:s + 1, :], xproj[T - 1 - s:T - s, :])
            gates = xrow + jnp.dot(h, whh, preferred_element_type=jnp.float32)
            sig = _sigmoid(gates[:, 0:6 * HIDDEN])                # [i | f | o] both dirs
            g = jnp.tanh(gates[:, 6 * HIDDEN:GATES])              # [g_fwd | g_bwd]
            i = sig[:, 0:H2]
            f = sig[:, H2:2 * H2]
            o = sig[:, 2 * H2:3 * H2]
            c = f * c + i * g
            h = o * jnp.tanh(c)
            if layer < NUM_LAYERS - 1:
                # next-layer input row t = [h_fwd_t | h_bwd_t]
                seq_ref[s:s + 1, 0:HIDDEN] = h[:, 0:HIDDEN]
                seq_ref[T - 1 - s:T - s, HIDDEN:H2] = h[:, HIDDEN:H2]
        # fused h at the last step is exactly [h_fwd(T-1) | h_bwd(0)] = this layer's h_n
        finals.append(h)

    # h_n.view(96): [l0_fwd, l0_bwd, l1_fwd, l1_bwd, l2_fwd, l2_bwd]
    hflat = jnp.concatenate(finals, axis=1)                       # (1, 96)

    # fused heads: one (1,96)@(96,24) matmul, then slice
    out = jnp.dot(hflat, wh_ref[...], preferred_element_type=jnp.float32) + bh_ref[...]

    def softmax(z):                                               # PyTorch Softmax(dim=0) on 1-D
        z = z - jnp.max(z, axis=-1, keepdims=True)
        e = jnp.exp(z)
        return e / jnp.sum(e, axis=-1, keepdims=True)

    comp_ref[...] = softmax(out[:, 0:N_COMP])                     # (1, 18)
    util_ref[...] = out[:, N_COMP:N_COMP + N_UTIL]                # (1, 1)
    fix_ref[...] = softmax(out[:, N_COMP + N_UTIL:N_HEAD])        # (1, 5)


def init_raw_params(key):
    """Deterministic synthetic init (PyTorch-style uniform(-1/sqrt(fan), 1/sqrt(fan)))."""
    stdv = 1.0 / (HIDDEN ** 0.5)
    keys = iter(jax.random.split(key, 64))

    def unif(shape, s):
        return jax.random.uniform(next(keys), shape, jnp.float32, -s, s)

    w_ih, w_hh, b_ih, b_hh = [], [], [], []
    for l in range(NUM_LAYERS):
        in_l = INPUT_DIM if l == 0 else 2 * HIDDEN
        w_ih.append([unif((4 * HIDDEN, in_l), stdv) for _ in range(NUM_DIR)])
        w_hh.append([unif((4 * HIDDEN, HIDDEN), stdv) for _ in range(NUM_DIR)])
        b_ih.append([unif((4 * HIDDEN,), stdv) for _ in range(NUM_DIR)])
        b_hh.append([unif((4 * HIDDEN,), stdv) for _ in range(NUM_DIR)])

    klin = 1.0 / (FLAT ** 0.5)
    raw = dict(w_ih=w_ih, w_hh=w_hh, b_ih=b_ih, b_hh=b_hh,
               wc=unif((N_COMP, FLAT), klin), bc=unif((N_COMP,), klin),
               wu=unif((N_UTIL, FLAT), klin), bu=unif((N_UTIL,), klin),
               wf=unif((N_FIX, FLAT), klin), bf=unif((N_FIX,), klin))
    return raw


def pack_params(raw):
    """Repack PyTorch-layout weights into the fused kernel layout (host-side, once)."""
    wih = jnp.zeros((NUM_LAYERS, IN_PAD, GATES), jnp.float32)
    whh = jnp.zeros((NUM_LAYERS, 2 * HIDDEN, GATES), jnp.float32)
    bias = jnp.zeros((NUM_LAYERS, 1, GATES), jnp.float32)
    # PyTorch gate row blocks (i,f,g,o) -> fused column blocks [i | f | o | g],
    # each 32 lanes wide laid out as [fwd 16 | bwd 16].
    col_base = {"i": 0, "f": 2 * HIDDEN, "o": 4 * HIDDEN, "g": 6 * HIDDEN}
    pt_row = {"i": 0, "f": HIDDEN, "g": 2 * HIDDEN, "o": 3 * HIDDEN}
    for l in range(NUM_LAYERS):
        in_l = INPUT_DIM if l == 0 else 2 * HIDDEN
        for d in range(NUM_DIR):
            w_ih = raw["w_ih"][l][d]                      # (4H, in_l)
            w_hh = raw["w_hh"][l][d]                      # (4H, H)
            b = raw["b_ih"][l][d] + raw["b_hh"][l][d]     # (4H,)
            for gname in ("i", "f", "g", "o"):
                r0 = pt_row[gname]
                c0 = col_base[gname] + d * HIDDEN
                wih = wih.at[l, :in_l, c0:c0 + HIDDEN].set(w_ih[r0:r0 + HIDDEN, :].T)
                whh = whh.at[l, d * HIDDEN:(d + 1) * HIDDEN, c0:c0 + HIDDEN].set(
                    w_hh[r0:r0 + HIDDEN, :].T)
                bias = bias.at[l, 0, c0:c0 + HIDDEN].set(b[r0:r0 + HIDDEN])
    w_heads = jnp.concatenate([raw["wc"].T, raw["wu"].T, raw["wf"].T], axis=1)  # (96, 24)
    b_heads = jnp.concatenate([raw["bc"], raw["bu"], raw["bf"]])[None, :]       # (1, 24)
    return dict(wih=wih, whh=whh, bias=bias, w_heads=w_heads, b_heads=b_heads)


@jax.jit
def fix_predictor(shop_observation_vector, packed):
    # TODO(synk): explore=True branch (torch.randn sampling) not implemented; deterministic path only.
    x = shop_observation_vector[0]                      # (T, 20), batch=1
    T = x.shape[0]
    x_pad = jnp.zeros((T, IN_PAD), jnp.float32).at[:, :INPUT_DIM].set(x)

    vmem = pl.BlockSpec(memory_space=pltpu.MemorySpace.VMEM)
    out_shapes = (jax.ShapeDtypeStruct((1, N_COMP), jnp.float32),
                  jax.ShapeDtypeStruct((1, N_UTIL), jnp.float32),
                  jax.ShapeDtypeStruct((1, N_FIX), jnp.float32))
    comp, util, fix = pl.pallas_call(
        fix_predictor_kernel,
        out_shape=out_shapes,
        in_specs=[vmem] * 6,
        out_specs=(vmem, vmem, vmem),
        scratch_shapes=[pltpu.VMEM((T, IN_PAD), jnp.float32)],
    )(x_pad, packed["wih"], packed["whh"], packed["bias"],
      packed["w_heads"], packed["b_heads"])
    return comp[0], util[0], fix[0]                     # (18,), (1,), (5,)


def reference_forward(shop_observation_vector, raw):
    """Pure-JAX mirror of the PyTorch forward (PyTorch weight layout), for correctness check."""
    x = shop_observation_vector[0]
    T = x.shape[0]
    seq = x
    finals = []
    for l in range(NUM_LAYERS):
        outs_per_dir = []
        for d in range(NUM_DIR):
            wih = raw["w_ih"][l][d]
            whh = raw["w_hh"][l][d]
            b = (raw["b_ih"][l][d] + raw["b_hh"][l][d])[None, :]
            h = jnp.zeros((1, HIDDEN))
            c = jnp.zeros((1, HIDDEN))
            outs = [None] * T
            order = range(T) if d == 0 else range(T - 1, -1, -1)
            for t in order:
                g = seq[t][None, :] @ wih.T + h @ whh.T + b
                i = jax.nn.sigmoid(g[:, :HIDDEN])
                f = jax.nn.sigmoid(g[:, HIDDEN:2 * HIDDEN])
                gg = jnp.tanh(g[:, 2 * HIDDEN:3 * HIDDEN])
                o = jax.nn.sigmoid(g[:, 3 * HIDDEN:])
                c = f * c + i * gg
                h = o * jnp.tanh(c)
                outs[t] = h
            finals.append(h)
            outs_per_dir.append(outs)
        seq = jnp.concatenate(
            [jnp.concatenate([outs_per_dir[0][t], outs_per_dir[1][t]], axis=1)
             for t in range(T)], axis=0)
    hflat = jnp.concatenate(finals, axis=1)
    comp = jax.nn.softmax(hflat @ raw["wc"].T + raw["bc"][None, :], axis=-1)[0]
    util = (hflat @ raw["wu"].T + raw["bu"][None, :])[0]
    fix = jax.nn.softmax(hflat @ raw["wf"].T + raw["bf"][None, :], axis=-1)[0]
    return comp, util, fix


if __name__ == "__main__":
    key = jax.random.PRNGKey(0)
    pkey, xkey = jax.random.split(key)
    raw = init_raw_params(pkey)
    packed = pack_params(raw)

    T = 8
    shop_observation_vector = jax.random.normal(xkey, (1, T, INPUT_DIM), jnp.float32)

    comp, util, fix = fix_predictor(shop_observation_vector, packed)
    jax.block_until_ready((comp, util, fix))

    rc, ru, rf = reference_forward(shop_observation_vector, raw)
    assert comp.shape == (N_COMP,) and util.shape == (N_UTIL,) and fix.shape == (N_FIX,)
    assert jnp.allclose(comp, rc, atol=1e-3, rtol=1e-3), "component head mismatch"
    assert jnp.allclose(util, ru, atol=1e-3, rtol=1e-3), "utility head mismatch"
    assert jnp.allclose(fix, rf, atol=1e-3, rtol=1e-3), "fix head mismatch"

    print("KERNEL_OK")
</pallas_src>

<mosaic_0001>
module attributes {stable_mosaic.version = 11 : i64} {
  func.func @fix_predictor_kernel(%arg0: memref<8x32xf32, #tpu.memory_space<vmem>>, %arg1: memref<3x32x128xf32, #tpu.memory_space<vmem>>, %arg2: memref<3x32x128xf32, #tpu.memory_space<vmem>>, %arg3: memref<3x1x128xf32, #tpu.memory_space<vmem>>, %arg4: memref<96x24xf32, #tpu.memory_space<vmem>>, %arg5: memref<1x24xf32, #tpu.memory_space<vmem>>, %arg6: memref<1x18xf32, #tpu.memory_space<vmem>>, %arg7: memref<1x1xf32, #tpu.memory_space<vmem>>, %arg8: memref<1x5xf32, #tpu.memory_space<vmem>>, %arg9: memref<8x32xf32, #tpu.memory_space<vmem>>) attributes {dimension_semantics = [], scalar_prefetch = 0 : i64, scratch_operands = 1 : i64, tpu.core_type = #tpu.core_type<tc>} {
    %0 = tpu.iota {dimensions = array<i32: 1>} : vector<1x128xi32>
    %c32_i32 = arith.constant 32 : i32
    %c0_i32 = arith.constant 0 : i32
    %1 = arith.cmpi eq, %c32_i32, %c0_i32 : i32
    %c1_i32 = arith.constant 1 : i32
    %2 = arith.select %1, %c1_i32, %c32_i32 : i32
    %3 = vector.broadcast %2 : i32 to vector<1x128xi32>
    %4 = arith.remsi %0, %3 : vector<1x128xi32>
    %c0_i32_0 = arith.constant 0 : i32
    %5 = vector.broadcast %c0_i32_0 : i32 to vector<1x128xi32>
    %6 = arith.cmpi ne, %4, %5 : vector<1x128xi32>
    %c0_i32_1 = arith.constant 0 : i32
    %7 = vector.broadcast %c0_i32_1 : i32 to vector<1x128xi32>
    %8 = arith.cmpi slt, %4, %7 : vector<1x128xi32>
    %c0_i32_2 = arith.constant 0 : i32
    %9 = arith.cmpi slt, %2, %c0_i32_2 : i32
    %10 = vector.broadcast %9 : i1 to vector<1x128xi1>
    %11 = vector.broadcast %10 : vector<1x128xi1> to vector<1x128xi1>
    %12 = arith.xori %8, %11 : vector<1x128xi1>
    %13 = arith.andi %12, %6 : vector<1x128xi1>
    %14 = vector.broadcast %2 : i32 to vector<1x128xi32>
    %15 = arith.addi %4, %14 : vector<1x128xi32>
    %16 = arith.select %13, %15, %4 : vector<1x128xi1>, vector<1x128xi32>
    %c16_i32 = arith.constant 16 : i32
    %17 = vector.broadcast %c16_i32 : i32 to vector<1x128xi32>
    %18 = arith.cmpi slt, %16, %17 : vector<1x128xi32>
    %c0 = arith.constant 0 : index
    %c0_3 = arith.constant 0 : index
    %19 = vector.load %arg0[%c0, %c0_3] : memref<8x32xf32, #tpu.memory_space<vmem>>, vector<8x32xf32>
    %c0_4 = arith.constant 0 : index
    %c0_5 = arith.constant 0 : index
    %c0_6 = arith.constant 0 : index
    %20 = vector.load %arg1[%c0_4, %c0_5, %c0_6] : memref<3x32x128xf32, #tpu.memory_space<vmem>>, vector<1x32x128xf32>
    %21 = vector.shape_cast %20 : vector<1x32x128xf32> to vector<32x128xf32>
    %cst = arith.constant dense<0.000000e+00> : vector<8x128xf32>
    %22 = tpu.matmul %19, %21, %cst {dimension_numbers = #tpu.dot_dimension_numbers<[1], [0], [0], [1], [0, 0, 1, 1], [], []>} : vector<8x32xf32>, vector<32x128xf32>, vector<8x128xf32> -> vector<8x128xf32>
    %c0_7 = arith.constant 0 : index
    %c0_8 = arith.constant 0 : index
    %c0_9 = arith.constant 0 : index
    %23 = vector.load %arg3[%c0_7, %c0_8, %c0_9] : memref<3x1x128xf32, #tpu.memory_space<vmem>>, vector<1x1x128xf32>
    %24 = vector.shape_cast %23 : vector<1x1x128xf32> to vector<1x128xf32>
    %25 = vector.broadcast %24 : vector<1x128xf32> to vector<8x128xf32>
    %26 = arith.addf %22, %25 : vector<8x128xf32>
    %c0_10 = arith.constant 0 : index
    %c0_11 = arith.constant 0 : index
    %c0_12 = arith.constant 0 : index
    %27 = vector.load %arg2[%c0_10, %c0_11, %c0_12] : memref<3x32x128xf32, #tpu.memory_space<vmem>>, vector<1x32x128xf32>
    %28 = vector.shape_cast %27 : vector<1x32x128xf32> to vector<32x128xf32>
    %cst_13 = arith.constant 0.000000e+00 : f32
    %29 = vector.broadcast %cst_13 : f32 to vector<1x32xf32>
    %cst_14 = arith.constant 0.000000e+00 : f32
    %30 = vector.broadcast %cst_14 : f32 to vector<1x32xf32>
    %31 = vector.extract_strided_slice %26 {offsets = [0, 0], sizes = [1, 128], strides = [1, 1]} : vector<8x128xf32> to vector<1x128xf32>
    %32 = vector.extract_strided_slice %26 {offsets = [7, 0], sizes = [1, 128], strides = [1, 1]} : vector<8x128xf32> to vector<1x128xf32>
    %33 = arith.select %18, %31, %32 : vector<1x128xi1>, vector<1x128xf32>
    %cst_15 = arith.constant dense<0.000000e+00> : vector<1x128xf32>
    %34 = tpu.matmul %29, %28, %cst_15 {dimension_numbers = #tpu.dot_dimension_numbers<[1], [0], [0], [1], [0, 0, 1, 1], [], []>} : vector<1x32xf32>, vector<32x128xf32>, vector<1x128xf32> -> vector<1x128xf32>
    %35 = arith.addf %33, %34 : vector<1x128xf32>
    %36 = vector.extract_strided_slice %35 {offsets = [0, 0], sizes = [1, 96], strides = [1, 1]} : vector<1x128xf32> to vector<1x96xf32>
    %cst_16 = arith.constant 5.000000e-01 : f32
    %37 = vector.broadcast %cst_16 : f32 to vector<1x96xf32>
    %38 = arith.mulf %37, %36 : vector<1x96xf32>
    %39 = math.tanh %38 : vector<1x96xf32>
    %cst_17 = arith.constant 5.000000e-01 : f32
    %40 = vector.broadcast %cst_17 : f32 to vector<1x96xf32>
    %41 = arith.mulf %40, %39 : vector<1x96xf32>
    %cst_18 = arith.constant 5.000000e-01 : f32
    %42 = vector.broadcast %cst_18 : f32 to vector<1x96xf32>
    %43 = arith.addf %41, %42 : vector<1x96xf32>
    %44 = vector.extract_strided_slice %35 {offsets = [0, 96], sizes = [1, 32], strides = [1, 1]} : vector<1x128xf32> to vector<1x32xf32>
    %45 = math.tanh %44 : vector<1x32xf32>
    %46 = vector.extract_strided_slice %43 {offsets = [0, 0], sizes = [1, 32], strides = [1, 1]} : vector<1x96xf32> to vector<1x32xf32>
    %47 = vector.extract_strided_slice %43 {offsets = [0, 32], sizes = [1, 32], strides = [1, 1]} : vector<1x96xf32> to vector<1x32xf32>
    %48 = vector.extract_strided_slice %43 {offsets = [0, 64], sizes = [1, 32], strides = [1, 1]} : vector<1x96xf32> to vector<1x32xf32>
    %49 = arith.mulf %47, %30 : vector<1x32xf32>
    %50 = arith.mulf %46, %45 : vector<1x32xf32>
    %51 = arith.addf %49, %50 : vector<1x32xf32>
    %52 = math.tanh %51 : vector<1x32xf32>
    %53 = arith.mulf %48, %52 : vector<1x32xf32>
    %54 = vector.extract_strided_slice %53 {offsets = [0, 0], sizes = [1, 16], strides = [1, 1]} : vector<1x32xf32> to vector<1x16xf32>
    %c0_19 = arith.constant 0 : index
    %c0_20 = arith.constant 0 : index
    %55 = vector.load %arg9[%c0_19, %c0_20] : memref<8x32xf32, #tpu.memory_space<vmem>>, vector<1x16xf32>
    tpu.vector_store %arg9[%c0_19, %c0_20], %54 {strides = array<i32>} : memref<8x32xf32, #tpu.memory_space<vmem>>, vector<1x16xf32>,
    %56 = vector.extract_strided_slice %53 {offsets = [0, 16], sizes = [1, 16], strides = [1, 1]} : vector<1x32xf32> to vector<1x16xf32>
    %c7 = arith.constant 7 : index
    %c16 = arith.constant 16 : index
    %57 = vector.load %arg9[%c7, %c16] : memref<8x32xf32, #tpu.memory_space<vmem>>, vector<1x16xf32>
    tpu.vector_store %arg9[%c7, %c16], %56 {strides = array<i32>} : memref<8x32xf32, #tpu.memory_space<vmem>>, vector<1x16xf32>,
    %58 = vector.extract_strided_slice %26 {offsets = [1, 0], sizes = [1, 128], strides = [1, 1]} : vector<8x128xf32> to vector<1x128xf32>
    %59 = vector.extract_strided_slice %26 {offsets = [6, 0], sizes = [1, 128], strides = [1, 1]} : vector<8x128xf32> to vector<1x128xf32>
    %60 = arith.select %18, %58, %59 : vector<1x128xi1>, vector<1x128xf32>
    %cst_21 = arith.constant dense<0.000000e+00> : vector<1x128xf32>
    %61 = tpu.matmul %53, %28, %cst_21 {dimension_numbers = #tpu.dot_dimension_numbers<[1], [0], [0], [1], [0, 0, 1, 1], [], []>} : vector<1x32xf32>, vector<32x128xf32>, vector<1x128xf32> -> vector<1x128xf32>
    %62 = arith.addf %60, %61 : vector<1x128xf32>
    %63 = vector.extract_strided_slice %62 {offsets = [0, 0], sizes = [1, 96], strides = [1, 1]} : vector<1x128xf32> to vector<1x96xf32>
    %cst_22 = arith.constant 5.000000e-01 : f32
    %64 = vector.broadcast %cst_22 : f32 to vector<1x96xf32>
    %65 = arith.mulf %64, %63 : vector<1x96xf32>
    %66 = math.tanh %65 : vector<1x96xf32>
    %cst_23 = arith.constant 5.000000e-01 : f32
    %67 = vector.broadcast %cst_23 : f32 to vector<1x96xf32>
    %68 = arith.mulf %67, %66 : vector<1x96xf32>
    %cst_24 = arith.constant 5.000000e-01 : f32
    %69 = vector.broadcast %cst_24 : f32 to vector<1x96xf32>
    %70 = arith.addf %68, %69 : vector<1x96xf32>
    %71 = vector.extract_strided_slice %62 {offsets = [0, 96], sizes = [1, 32], strides = [1, 1]} : vector<1x128xf32> to vector<1x32xf32>
    %72 = math.tanh %71 : vector<1x32xf32>
    %73 = vector.extract_strided_slice %70 {offsets = [0, 0], sizes = [1, 32], strides = [1, 1]} : vector<1x96xf32> to vector<1x32xf32>
    %74 = vector.extract_strided_slice %70 {offsets = [0, 32], sizes = [1, 32], strides = [1, 1]} : vector<1x96xf32> to vector<1x32xf32>
    %75 = vector.extract_strided_slice %70 {offsets = [0, 64], sizes = [1, 32], strides = [1, 1]} : vector<1x96xf32> to vector<1x32xf32>
    %76 = arith.mulf %74, %51 : vector<1x32xf32>
    %77 = arith.mulf %73, %72 : vector<1x32xf32>
    %78 = arith.addf %76, %77 : vector<1x32xf32>
    %79 = math.tanh %78 : vector<1x32xf32>
    %80 = arith.mulf %75, %79 : vector<1x32xf32>
    %81 = vector.extract_strided_slice %80 {offsets = [0, 0], sizes = [1, 16], strides = [1, 1]} : vector<1x32xf32> to vector<1x16xf32>
    %c1 = arith.constant 1 : index
    %c0_25 = arith.constant 0 : index
    %82 = vector.load %arg9[%c1, %c0_25] : memref<8x32xf32, #tpu.memory_space<vmem>>, vector<1x16xf32>
    tpu.vector_store %arg9[%c1, %c0_25], %81 {strides = array<i32>} : memref<8x32xf32, #tpu.memory_space<vmem>>, vector<1x16xf32>,
    %83 = vector.extract_strided_slice %80 {offsets = [0, 16], sizes = [1, 16], strides = [1, 1]} : vector<1x32xf32> to vector<1x16xf32>
    %c6 = arith.constant 6 : index
    %c16_26 = arith.constant 16 : index
    %84 = vector.load %arg9[%c6, %c16_26] : memref<8x32xf32, #tpu.memory_space<vmem>>, vector<1x16xf32>
    tpu.vector_store %arg9[%c6, %c16_26], %83 {strides = array<i32>} : memref<8x32xf32, #tpu.memory_space<vmem>>, vector<1x16xf32>,
    %85 = vector.extract_strided_slice %26 {offsets = [2, 0], sizes = [1, 128], strides = [1, 1]} : vector<8x128xf32> to vector<1x128xf32>
    %86 = vector.extract_strided_slice %26 {offsets = [5, 0], sizes = [1, 128], strides = [1, 1]} : vector<8x128xf32> to vector<1x128xf32>
    %87 = arith.select %18, %85, %86 : vector<1x128xi1>, vector<1x128xf32>
    %cst_27 = arith.constant dense<0.000000e+00> : vector<1x128xf32>
    %88 = tpu.matmul %80, %28, %cst_27 {dimension_numbers = #tpu.dot_dimension_numbers<[1], [0], [0], [1], [0, 0, 1, 1], [], []>} : vector<1x32xf32>, vector<32x128xf32>, vector<1x128xf32> -> vector<1x128xf32>
    %89 = arith.addf %87, %88 : vector<1x128xf32>
    %90 = vector.extract_strided_slice %89 {offsets = [0, 0], sizes = [1, 96], strides = [1, 1]} : vector<1x128xf32> to vector<1x96xf32>
    %cst_28 = arith.constant 5.000000e-01 : f32
    %91 = vector.broadcast %cst_28 : f32 to vector<1x96xf32>
    %92 = arith.mulf %91, %90 : vector<1x96xf32>
    %93 = math.tanh %92 : vector<1x96xf32>
    %cst_29 = arith.constant 5.000000e-01 : f32
    %94 = vector.broadcast %cst_29 : f32 to vector<1x96xf32>
    %95 = arith.mulf %94, %93 : vector<1x96xf32>
    %cst_30 = arith.constant 5.000000e-01 : f32
    %96 = vector.broadcast %cst_30 : f32 to vector<1x96xf32>
    %97 = arith.addf %95, %96 : vector<1x96xf32>
    %98 = vector.extract_strided_slice %89 {offsets = [0, 96], sizes = [1, 32], strides = [1, 1]} : vector<1x128xf32> to vector<1x32xf32>
    %99 = math.tanh %98 : vector<1x32xf32>
    %100 = vector.extract_strided_slice %97 {offsets = [0, 0], sizes = [1, 32], strides = [1, 1]} : vector<1x96xf32> to vector<1x32xf32>
    %101 = vector.extract_strided_slice %97 {offsets = [0, 32], sizes = [1, 32], strides = [1, 1]} : vector<1x96xf32> to vector<1x32xf32>
    %102 = vector.extract_strided_slice %97 {offsets = [0, 64], sizes = [1, 32], strides = [1, 1]} : vector<1x96xf32> to vector<1x32xf32>
    %103 = arith.mulf %101, %78 : vector<1x32xf32>
    %104 = arith.mulf %100, %99 : vector<1x32xf32>
    %105 = arith.addf %103, %104 : vector<1x32xf32>
    %106 = math.tanh %105 : vector<1x32xf32>
    %107 = arith.mulf %102, %106 : vector<1x32xf32>
    %108 = vector.extract_strided_slice %107 {offsets = [0, 0], sizes = [1, 16], strides = [1, 1]} : vector<1x32xf32> to vector<1x16xf32>
    %c2 = arith.constant 2 : index
    %c0_31 = arith.constant 0 : index
    %109 = vector.load %arg9[%c2, %c0_31] : memref<8x32xf32, #tpu.memory_space<vmem>>, vector<1x16xf32>
    tpu.vector_store %arg9[%c2, %c0_31], %108 {strides = array<i32>} : memref<8x32xf32, #tpu.memory_space<vmem>>, vector<1x16xf32>,
    %110 = vector.extract_strided_slice %107 {offsets = [0, 16], sizes = [1, 16], strides = [1, 1]} : vector<1x32xf32> to vector<1x16xf32>
    %c5 = arith.constant 5 : index
    %c16_32 = arith.constant 16 : index
    %111 = vector.load %arg9[%c5, %c16_32] : memref<8x32xf32, #tpu.memory_space<vmem>>, vector<1x16xf32>
    tpu.vector_store %arg9[%c5, %c16_32], %110 {strides = array<i32>} : memref<8x32xf32, #tpu.memory_space<vmem>>, vector<1x16xf32>,
    %112 = vector.extract_strided_slice %26 {offsets = [3, 0], sizes = [1, 128], strides = [1, 1]} : vector<8x128xf32> to vector<1x128xf32>
    %113 = vector.extract_strided_slice %26 {offsets = [4, 0], sizes = [1, 128], strides = [1, 1]} : vector<8x128xf32> to vector<1x128xf32>
    %114 = arith.select %18, %112, %113 : vector<1x128xi1>, vector<1x128xf32>
    %cst_33 = arith.constant dense<0.000000e+00> : vector<1x128xf32>
    %115 = tpu.matmul %107, %28, %cst_33 {dimension_numbers = #tpu.dot_dimension_numbers<[1], [0], [0], [1], [0, 0, 1, 1], [], []>} : vector<1x32xf32>, vector<32x128xf32>, vector<1x128xf32> -> vector<1x128xf32>
    %116 = arith.addf %114, %115 : vector<1x128xf32>
    %117 = vector.extract_strided_slice %116 {offsets = [0, 0], sizes = [1, 96], strides = [1, 1]} : vector<1x128xf32> to vector<1x96xf32>
    %cst_34 = arith.constant 5.000000e-01 : f32
    %118 = vector.broadcast %cst_34 : f32 to vector<1x96xf32>
    %119 = arith.mulf %118, %117 : vector<1x96xf32>
    %120 = math.tanh %119 : vector<1x96xf32>
    %cst_35 = arith.constant 5.000000e-01 : f32
    %121 = vector.broadcast %cst_35 : f32 to vector<1x96xf32>
    %122 = arith.mulf %121, %120 : vector<1x96xf32>
    %cst_36 = arith.constant 5.000000e-01 : f32
    %123 = vector.broadcast %cst_36 : f32 to vector<1x96xf32>
    %124 = arith.addf %122, %123 : vector<1x96xf32>
    %125 = vector.extract_strided_slice %116 {offsets = [0, 96], sizes = [1, 32], strides = [1, 1]} : vector<1x128xf32> to vector<1x32xf32>
    %126 = math.tanh %125 : vector<1x32xf32>
    %127 = vector.extract_strided_slice %124 {offsets = [0, 0], sizes = [1, 32], strides = [1, 1]} : vector<1x96xf32> to vector<1x32xf32>
    %128 = vector.extract_strided_slice %124 {offsets = [0, 32], sizes = [1, 32], strides = [1, 1]} : vector<1x96xf32> to vector<1x32xf32>
    %129 = vector.extract_strided_slice %124 {offsets = [0, 64], sizes = [1, 32], strides = [1, 1]} : vector<1x96xf32> to vector<1x32xf32>
    %130 = arith.mulf %128, %105 : vector<1x32xf32>
    %131 = arith.mulf %127, %126 : vector<1x32xf32>
    %132 = arith.addf %130, %131 : vector<1x32xf32>
    %133 = math.tanh %132 : vector<1x32xf32>
    %134 = arith.mulf %129, %133 : vector<1x32xf32>
    %135 = vector.extract_strided_slice %134 {offsets = [0, 0], sizes = [1, 16], strides = [1, 1]} : vector<1x32xf32> to vector<1x16xf32>
    %c3 = arith.constant 3 : index
    %c0_37 = arith.constant 0 : index
    %136 = vector.load %arg9[%c3, %c0_37] : memref<8x32xf32, #tpu.memory_space<vmem>>, vector<1x16xf32>
    tpu.vector_store %arg9[%c3, %c0_37], %135 {strides = array<i32>} : memref<8x32xf32, #tpu.memory_space<vmem>>, vector<1x16xf32>,
    %137 = vector.extract_strided_slice %134 {offsets = [0, 16], sizes = [1, 16], strides = [1, 1]} : vector<1x32xf32> to vector<1x16xf32>
    %c4 = arith.constant 4 : index
    %c16_38 = arith.constant 16 : index
    %138 = vector.load %arg9[%c4, %c16_38] : memref<8x32xf32, #tpu.memory_space<vmem>>, vector<1x16xf32>
    tpu.vector_store %arg9[%c4, %c16_38], %137 {strides = array<i32>} : memref<8x32xf32, #tpu.memory_space<vmem>>, vector<1x16xf32>,
    %139 = vector.extract_strided_slice %26 {offsets = [4, 0], sizes = [1, 128], strides = [1, 1]} : vector<8x128xf32> to vector<1x128xf32>
    %140 = vector.extract_strided_slice %26 {offsets = [3, 0], sizes = [1, 128], strides = [1, 1]} : vector<8x128xf32> to vector<1x128xf32>
    %141 = arith.select %18, %139, %140 : vector<1x128xi1>, vector<1x128xf32>
    %cst_39 = arith.constant dense<0.000000e+00> : vector<1x128xf32>
    %142 = tpu.matmul %134, %28, %cst_39 {dimension_numbers = #tpu.dot_dimension_numbers<[1], [0], [0], [1], [0, 0, 1, 1], [], []>} : vector<1x32xf32>, vector<32x128xf32>, vector<1x128xf32> -> vector<1x128xf32>
    %143 = arith.addf %141, %142 : vector<1x128xf32>
    %144 = vector.extract_strided_slice %143 {offsets = [0, 0], sizes = [1, 96], strides = [1, 1]} : vector<1x128xf32> to vector<1x96xf32>
    %cst_40 = arith.constant 5.000000e-01 : f32
    %145 = vector.broadcast %cst_40 : f32 to vector<1x96xf32>
    %146 = arith.mulf %145, %144 : vector<1x96xf32>
    %147 = math.tanh %146 : vector<1x96xf32>
    %cst_41 = arith.constant 5.000000e-01 : f32
    %148 = vector.broadcast %cst_41 : f32 to vector<1x96xf32>
    %149 = arith.mulf %148, %147 : vector<1x96xf32>
    %cst_42 = arith.constant 5.000000e-01 : f32
    %150 = vector.broadcast %cst_42 : f32 to vector<1x96xf32>
    %151 = arith.addf %149, %150 : vector<1x96xf32>
    %152 = vector.extract_strided_slice %143 {offsets = [0, 96], sizes = [1, 32], strides = [1, 1]} : vector<1x128xf32> to vector<1x32xf32>
    %153 = math.tanh %152 : vector<1x32xf32>
    %154 = vector.extract_strided_slice %151 {offsets = [0, 0], sizes = [1, 32], strides = [1, 1]} : vector<1x96xf32> to vector<1x32xf32>
    %155 = vector.extract_strided_slice %151 {offsets = [0, 32], sizes = [1, 32], strides = [1, 1]} : vector<1x96xf32> to vector<1x32xf32>
    %156 = vector.extract_strided_slice %151 {offsets = [0, 64], sizes = [1, 32], strides = [1, 1]} : vector<1x96xf32> to vector<1x32xf32>
    %157 = arith.mulf %155, %132 : vector<1x32xf32>
    %158 = arith.mulf %154, %153 : vector<1x32xf32>
    %159 = arith.addf %157, %158 : vector<1x32xf32>
    %160 = math.tanh %159 : vector<1x32xf32>
    %161 = arith.mulf %156, %160 : vector<1x32xf32>
    %162 = vector.extract_strided_slice %161 {offsets = [0, 0], sizes = [1, 16], strides = [1, 1]} : vector<1x32xf32> to vector<1x16xf32>
    %c4_43 = arith.constant 4 : index
    %c0_44 = arith.constant 0 : index
    %163 = vector.load %arg9[%c4_43, %c0_44] : memref<8x32xf32, #tpu.memory_space<vmem>>, vector<1x16xf32>
    tpu.vector_store %arg9[%c4_43, %c0_44], %162 {strides = array<i32>} : memref<8x32xf32, #tpu.memory_space<vmem>>, vector<1x16xf32>,
    %164 = vector.extract_strided_slice %161 {offsets = [0, 16], sizes = [1, 16], strides = [1, 1]} : vector<1x32xf32> to vector<1x16xf32>
    %c3_45 = arith.constant 3 : index
    %c16_46 = arith.constant 16 : index
    %165 = vector.load %arg9[%c3_45, %c16_46] : memref<8x32xf32, #tpu.memory_space<vmem>>, vector<1x16xf32>
    tpu.vector_store %arg9[%c3_45, %c16_46], %164 {strides = array<i32>} : memref<8x32xf32, #tpu.memory_space<vmem>>, vector<1x16xf32>,
    %166 = vector.extract_strided_slice %26 {offsets = [5, 0], sizes = [1, 128], strides = [1, 1]} : vector<8x128xf32> to vector<1x128xf32>
    %167 = vector.extract_strided_slice %26 {offsets = [2, 0], sizes = [1, 128], strides = [1, 1]} : vector<8x128xf32> to vector<1x128xf32>
    %168 = arith.select %18, %166, %167 : vector<1x128xi1>, vector<1x128xf32>
    %cst_47 = arith.constant dense<0.000000e+00> : vector<1x128xf32>
    %169 = tpu.matmul %161, %28, %cst_47 {dimension_numbers = #tpu.dot_dimension_numbers<[1], [0], [0], [1], [0, 0, 1, 1], [], []>} : vector<1x32xf32>, vector<32x128xf32>, vector<1x128xf32> -> vector<1x128xf32>
    %170 = arith.addf %168, %169 : vector<1x128xf32>
    %171 = vector.extract_strided_slice %170 {offsets = [0, 0], sizes = [1, 96], strides = [1, 1]} : vector<1x128xf32> to vector<1x96xf32>
    %cst_48 = arith.constant 5.000000e-01 : f32
    %172 = vector.broadcast %cst_48 : f32 to vector<1x96xf32>
    %173 = arith.mulf %172, %171 : vector<1x96xf32>
    %174 = math.tanh %173 : vector<1x96xf32>
    %cst_49 = arith.constant 5.000000e-01 : f32
    %175 = vector.broadcast %cst_49 : f32 to vector<1x96xf32>
    %176 = arith.mulf %175, %174 : vector<1x96xf32>
    %cst_50 = arith.constant 5.000000e-01 : f32
    %177 = vector.broadcast %cst_50 : f32 to vector<1x96xf32>
    %178 = arith.addf %176, %177 : vector<1x96xf32>
    %179 = vector.extract_strided_slice %170 {offsets = [0, 96], sizes = [1, 32], strides = [1, 1]} : vector<1x128xf32> to vector<1x32xf32>
    %180 = math.tanh %179 : vector<1x32xf32>
    %181 = vector.extract_strided_slice %178 {offsets = [0, 0], sizes = [1, 32], strides = [1, 1]} : vector<1x96xf32> to vector<1x32xf32>
    %182 = vector.extract_strided_slice %178 {offsets = [0, 32], sizes = [1, 32], strides = [1, 1]} : vector<1x96xf32> to vector<1x32xf32>
    %183 = vector.extract_strided_slice %178 {offsets = [0, 64], sizes = [1, 32], strides = [1, 1]} : vector<1x96xf32> to vector<1x32xf32>
    %184 = arith.mulf %182, %159 : vector<1x32xf32>
    %185 = arith.mulf %181, %180 : vector<1x32xf32>
    %186 = arith.addf %184, %185 : vector<1x32xf32>
    %187 = math.tanh %186 : vector<1x32xf32>
    %188 = arith.mulf %183, %187 : vector<1x32xf32>
    %189 = vector.extract_strided_slice %188 {offsets = [0, 0], sizes = [1, 16], strides = [1, 1]} : vector<1x32xf32> to vector<1x16xf32>
    %c5_51 = arith.constant 5 : index
    %c0_52 = arith.constant 0 : index
    %190 = vector.load %arg9[%c5_51, %c0_52] : memref<8x32xf32, #tpu.memory_space<vmem>>, vector<1x16xf32>
    tpu.vector_store %arg9[%c5_51, %c0_52], %189 {strides = array<i32>} : memref<8x32xf32, #tpu.memory_space<vmem>>, vector<1x16xf32>,
    %191 = vector.extract_strided_slice %188 {offsets = [0, 16], sizes = [1, 16], strides = [1, 1]} : vector<1x32xf32> to vector<1x16xf32>
    %c2_53 = arith.constant 2 : index
    %c16_54 = arith.constant 16 : index
    %192 = vector.load %arg9[%c2_53, %c16_54] : memref<8x32xf32, #tpu.memory_space<vmem>>, vector<1x16xf32>
    tpu.vector_store %arg9[%c2_53, %c16_54], %191 {strides = array<i32>} : memref<8x32xf32, #tpu.memory_space<vmem>>, vector<1x16xf32>,
    %193 = vector.extract_strided_slice %26 {offsets = [6, 0], sizes = [1, 128], strides = [1, 1]} : vector<8x128xf32> to vector<1x128xf32>
    %194 = vector.extract_strided_slice %26 {offsets = [1, 0], sizes = [1, 128], strides = [1, 1]} : vector<8x128xf32> to vector<1x128xf32>
    %195 = arith.select %18, %193, %194 : vector<1x128xi1>, vector<1x128xf32>
    %cst_55 = arith.constant dense<0.000000e+00> : vector<1x128xf32>
    %196 = tpu.matmul %188, %28, %cst_55 {dimension_numbers = #tpu.dot_dimension_numbers<[1], [0], [0], [1], [0, 0, 1, 1], [], []>} : vector<1x32xf32>, vector<32x128xf32>, vector<1x128xf32> -> vector<1x128xf32>
    %197 = arith.addf %195, %196 : vector<1x128xf32>
    %198 = vector.extract_strided_slice %197 {offsets = [0, 0], sizes = [1, 96], strides = [1, 1]} : vector<1x128xf32> to vector<1x96xf32>
    %cst_56 = arith.constant 5.000000e-01 : f32
    %199 = vector.broadcast %cst_56 : f32 to vector<1x96xf32>
    %200 = arith.mulf %199, %198 : vector<1x96xf32>
    %201 = math.tanh %200 : vector<1x96xf32>
    %cst_57 = arith.constant 5.000000e-01 : f32
    %202 = vector.broadcast %cst_57 : f32 to vector<1x96xf32>
    %203 = arith.mulf %202, %201 : vector<1x96xf32>
    %cst_58 = arith.constant 5.000000e-01 : f32
    %204 = vector.broadcast %cst_58 : f32 to vector<1x96xf32>
    %205 = arith.addf %203, %204 : vector<1x96xf32>
    %206 = vector.extract_strided_slice %197 {offsets = [0, 96], sizes = [1, 32], strides = [1, 1]} : vector<1x128xf32> to vector<1x32xf32>
    %207 = math.tanh %206 : vector<1x32xf32>
    %208 = vector.extract_strided_slice %205 {offsets = [0, 0], sizes = [1, 32], strides = [1, 1]} : vector<1x96xf32> to vector<1x32xf32>
    %209 = vector.extract_strided_slice %205 {offsets = [0, 32], sizes = [1, 32], strides = [1, 1]} : vector<1x96xf32> to vector<1x32xf32>
    %210 = vector.extract_strided_slice %205 {offsets = [0, 64], sizes = [1, 32], strides = [1, 1]} : vector<1x96xf32> to vector<1x32xf32>
    %211 = arith.mulf %209, %186 : vector<1x32xf32>
    %212 = arith.mulf %208, %207 : vector<1x32xf32>
    %213 = arith.addf %211, %212 : vector<1x32xf32>
    %214 = math.tanh %213 : vector<1x32xf32>
    %215 = arith.mulf %210, %214 : vector<1x32xf32>
    %216 = vector.extract_strided_slice %215 {offsets = [0, 0], sizes = [1, 16], strides = [1, 1]} : vector<1x32xf32> to vector<1x16xf32>
    %c6_59 = arith.constant 6 : index
    %c0_60 = arith.constant 0 : index
    %217 = vector.load %arg9[%c6_59, %c0_60] : memref<8x32xf32, #tpu.memory_space<vmem>>, vector<1x16xf32>
    tpu.vector_store %arg9[%c6_59, %c0_60], %216 {strides = array<i32>} : memref<8x32xf32, #tpu.memory_space<vmem>>, vector<1x16xf32>,
    %218 = vector.extract_strided_slice %215 {offsets = [0, 16], sizes = [1, 16], strides = [1, 1]} : vector<1x32xf32> to vector<1x16xf32>
    %c1_61 = arith.constant 1 : index
    %c16_62 = arith.constant 16 : index
    %219 = vector.load %arg9[%c1_61, %c16_62] : memref<8x32xf32, #tpu.memory_space<vmem>>, vector<1x16xf32>
    tpu.vector_store %arg9[%c1_61, %c16_62], %218 {strides = array<i32>} : memref<8x32xf32, #tpu.memory_space<vmem>>, vector<1x16xf32>,
    %220 = vector.extract_strided_slice %26 {offsets = [7, 0], sizes = [1, 128], strides = [1, 1]} : vector<8x128xf32> to vector<1x128xf32>
    %221 = vector.extract_strided_slice %26 {offsets = [0, 0], sizes = [1, 128], strides = [1, 1]} : vector<8x128xf32> to vector<1x128xf32>
    %222 = arith.select %18, %220, %221 : vector<1x128xi1>, vector<1x128xf32>
    %cst_63 = arith.constant dense<0.000000e+00> : vector<1x128xf32>
    %223 = tpu.matmul %215, %28, %cst_63 {dimension_numbers = #tpu.dot_dimension_numbers<[1], [0], [0], [1], [0, 0, 1, 1], [], []>} : vector<1x32xf32>, vector<32x128xf32>, vector<1x128xf32> -> vector<1x128xf32>
    %224 = arith.addf %222, %223 : vector<1x128xf32>
    %225 = vector.extract_strided_slice %224 {offsets = [0, 0], sizes = [1, 96], strides = [1, 1]} : vector<1x128xf32> to vector<1x96xf32>
    %cst_64 = arith.constant 5.000000e-01 : f32
    %226 = vector.broadcast %cst_64 : f32 to vector<1x96xf32>
    %227 = arith.mulf %226, %225 : vector<1x96xf32>
    %228 = math.tanh %227 : vector<1x96xf32>
    %cst_65 = arith.constant 5.000000e-01 : f32
    %229 = vector.broadcast %cst_65 : f32 to vector<1x96xf32>
    %230 = arith.mulf %229, %228 : vector<1x96xf32>
    %cst_66 = arith.constant 5.000000e-01 : f32
    %231 = vector.broadcast %cst_66 : f32 to vector<1x96xf32>
    %232 = arith.addf %230, %231 : vector<1x96xf32>
    %233 = vector.extract_strided_slice %224 {offsets = [0, 96], sizes = [1, 32], strides = [1, 1]} : vector<1x128xf32> to vector<1x32xf32>
    %234 = math.tanh %233 : vector<1x32xf32>
    %235 = vector.extract_strided_slice %232 {offsets = [0, 0], sizes = [1, 32], strides = [1, 1]} : vector<1x96xf32> to vector<1x32xf32>
    %236 = vector.extract_strided_slice %232 {offsets = [0, 32], sizes = [1, 32], strides = [1, 1]} : vector<1x96xf32> to vector<1x32xf32>
    %237 = vector.extract_strided_slice %232 {offsets = [0, 64], sizes = [1, 32], strides = [1, 1]} : vector<1x96xf32> to vector<1x32xf32>
    %238 = arith.mulf %236, %213 : vector<1x32xf32>
    %239 = arith.mulf %235, %234 : vector<1x32xf32>
    %240 = arith.addf %238, %239 : vector<1x32xf32>
    %241 = math.tanh %240 : vector<1x32xf32>
    %242 = arith.mulf %237, %241 : vector<1x32xf32>
    %243 = vector.extract_strided_slice %242 {offsets = [0, 0], sizes = [1, 16], strides = [1, 1]} : vector<1x32xf32> to vector<1x16xf32>
    %c7_67 = arith.constant 7 : index
    %c0_68 = arith.constant 0 : index
    %244 = vector.load %arg9[%c7_67, %c0_68] : memref<8x32xf32, #tpu.memory_space<vmem>>, vector<1x16xf32>
    tpu.vector_store %arg9[%c7_67, %c0_68], %243 {strides = array<i32>} : memref<8x32xf32, #tpu.memory_space<vmem>>, vector<1x16xf32>,
    %245 = vector.extract_strided_slice %242 {offsets = [0, 16], sizes = [1, 16], strides = [1, 1]} : vector<1x32xf32> to vector<1x16xf32>
    %c0_69 = arith.constant 0 : index
    %c16_70 = arith.constant 16 : index
    %246 = vector.load %arg9[%c0_69, %c16_70] : memref<8x32xf32, #tpu.memory_space<vmem>>, vector<1x16xf32>
    tpu.vector_store %arg9[%c0_69, %c16_70], %245 {strides = array<i32>} : memref<8x32xf32, #tpu.memory_space<vmem>>, vector<1x16xf32>,
    %c0_71 = arith.constant 0 : index
    %c0_72 = arith.constant 0 : index
    %247 = vector.load %arg9[%c0_71, %c0_72] : memref<8x32xf32, #tpu.memory_space<vmem>>, vector<8x32xf32>
    %c1_73 = arith.constant 1 : index
    %c0_74 = arith.constant 0 : index
    %c0_75 = arith.constant 0 : index
    %248 = vector.load %arg1[%c1_73, %c0_74, %c0_75] : memref<3x32x128xf32, #tpu.memory_space<vmem>>, vector<1x32x128xf32>
    %249 = vector.shape_cast %248 : vector<1x32x128xf32> to vector<32x128xf32>
    %cst_76 = arith.constant dense<0.000000e+00> : vector<8x128xf32>
    %250 = tpu.matmul %247, %249, %cst_76 {dimension_numbers = #tpu.dot_dimension_numbers<[1], [0], [0], [1], [0, 0, 1, 1], [], []>} : vector<8x32xf32>, vector<32x128xf32>, vector<8x128xf32> -> vector<8x128xf32>
    %c1_77 = arith.constant 1 : index
    %c0_78 = arith.constant 0 : index
    %c0_79 = arith.constant 0 : index
    %251 = vector.load %arg3[%c1_77, %c0_78, %c0_79] : memref<3x1x128xf32, #tpu.memory_space<vmem>>, vector<1x1x128xf32>
    %252 = vector.shape_cast %251 : vector<1x1x128xf32> to vector<1x128xf32>
    %253 = vector.broadcast %252 : vector<1x128xf32> to vector<8x128xf32>
    %254 = arith.addf %250, %253 : vector<8x128xf32>
    %c1_80 = arith.constant 1 : index
    %c0_81 = arith.constant 0 : index
    %c0_82 = arith.constant 0 : index
    %255 = vector.load %arg2[%c1_80, %c0_81, %c0_82] : memref<3x32x128xf32, #tpu.memory_space<vmem>>, vector<1x32x128xf32>
    %256 = vector.shape_cast %255 : vector<1x32x128xf32> to vector<32x128xf32>
    %cst_83 = arith.constant 0.000000e+00 : f32
    %257 = vector.broadcast %cst_83 : f32 to vector<1x32xf32>
    %cst_84 = arith.constant 0.000000e+00 : f32
    %258 = vector.broadcast %cst_84 : f32 to vector<1x32xf32>
    %259 = vector.extract_strided_slice %254 {offsets = [0, 0], sizes = [1, 128], strides = [1, 1]} : vector<8x128xf32> to vector<1x128xf32>
    %260 = vector.extract_strided_slice %254 {offsets = [7, 0], sizes = [1, 128], strides = [1, 1]} : vector<8x128xf32> to vector<1x128xf32>
    %261 = arith.select %18, %259, %260 : vector<1x128xi1>, vector<1x128xf32>
    %cst_85 = arith.constant dense<0.000000e+00> : vector<1x128xf32>
    %262 = tpu.matmul %257, %256, %cst_85 {dimension_numbers = #tpu.dot_dimension_numbers<[1], [0], [0], [1], [0, 0, 1, 1], [], []>} : vector<1x32xf32>, vector<32x128xf32>, vector<1x128xf32> -> vector<1x128xf32>
    %263 = arith.addf %261, %262 : vector<1x128xf32>
    %264 = vector.extract_strided_slice %263 {offsets = [0, 0], sizes = [1, 96], strides = [1, 1]} : vector<1x128xf32> to vector<1x96xf32>
    %cst_86 = arith.constant 5.000000e-01 : f32
    %265 = vector.broadcast %cst_86 : f32 to vector<1x96xf32>
    %266 = arith.mulf %265, %264 : vector<1x96xf32>
    %267 = math.tanh %266 : vector<1x96xf32>
    %cst_87 = arith.constant 5.000000e-01 : f32
    %268 = vector.broadcast %cst_87 : f32 to vector<1x96xf32>
    %269 = arith.mulf %268, %267 : vector<1x96xf32>
    %cst_88 = arith.constant 5.000000e-01 : f32
    %270 = vector.broadcast %cst_88 : f32 to vector<1x96xf32>
    %271 = arith.addf %269, %270 : vector<1x96xf32>
    %272 = vector.extract_strided_slice %263 {offsets = [0, 96], sizes = [1, 32], strides = [1, 1]} : vector<1x128xf32> to vector<1x32xf32>
    %273 = math.tanh %272 : vector<1x32xf32>
    %274 = vector.extract_strided_slice %271 {offsets = [0, 0], sizes = [1, 32], strides = [1, 1]} : vector<1x96xf32> to vector<1x32xf32>
    %275 = vector.extract_strided_slice %271 {offsets = [0, 32], sizes = [1, 32], strides = [1, 1]} : vector<1x96xf32> to vector<1x32xf32>
    %276 = vector.extract_strided_slice %271 {offsets = [0, 64], sizes = [1, 32], strides = [1, 1]} : vector<1x96xf32> to vector<1x32xf32>
    %277 = arith.mulf %275, %258 : vector<1x32xf32>
    %278 = arith.mulf %274, %273 : vector<1x32xf32>
    %279 = arith.addf %277, %278 : vector<1x32xf32>
    %280 = math.tanh %279 : vector<1x32xf32>
    %281 = arith.mulf %276, %280 : vector<1x32xf32>
    %282 = vector.extract_strided_slice %281 {offsets = [0, 0], sizes = [1, 16], strides = [1, 1]} : vector<1x32xf32> to vector<1x16xf32>
    %c0_89 = arith.constant 0 : index
    %c0_90 = arith.constant 0 : index
    %283 = vector.load %arg9[%c0_89, %c0_90] : memref<8x32xf32, #tpu.memory_space<vmem>>, vector<1x16xf32>
    tpu.vector_store %arg9[%c0_89, %c0_90], %282 {strides = array<i32>} : memref<8x32xf32, #tpu.memory_space<vmem>>, vector<1x16xf32>,
    %284 = vector.extract_strided_slice %281 {offsets = [0, 16], sizes = [1, 16], strides = [1, 1]} : vector<1x32xf32> to vector<1x16xf32>
    %c7_91 = arith.constant 7 : index
    %c16_92 = arith.constant 16 : index
    %285 = vector.load %arg9[%c7_91, %c16_92] : memref<8x32xf32, #tpu.memory_space<vmem>>, vector<1x16xf32>
    tpu.vector_store %arg9[%c7_91, %c16_92], %284 {strides = array<i32>} : memref<8x32xf32, #tpu.memory_space<vmem>>, vector<1x16xf32>,
    %286 = vector.extract_strided_slice %254 {offsets = [1, 0], sizes = [1, 128], strides = [1, 1]} : vector<8x128xf32> to vector<1x128xf32>
    %287 = vector.extract_strided_slice %254 {offsets = [6, 0], sizes = [1, 128], strides = [1, 1]} : vector<8x128xf32> to vector<1x128xf32>
    %288 = arith.select %18, %286, %287 : vector<1x128xi1>, vector<1x128xf32>
    %cst_93 = arith.constant dense<0.000000e+00> : vector<1x128xf32>
    %289 = tpu.matmul %281, %256, %cst_93 {dimension_numbers = #tpu.dot_dimension_numbers<[1], [0], [0], [1], [0, 0, 1, 1], [], []>} : vector<1x32xf32>, vector<32x128xf32>, vector<1x128xf32> -> vector<1x128xf32>
    %290 = arith.addf %288, %289 : vector<1x128xf32>
    %291 = vector.extract_strided_slice %290 {offsets = [0, 0], sizes = [1, 96], strides = [1, 1]} : vector<1x128xf32> to vector<1x96xf32>
    %cst_94 = arith.constant 5.000000e-01 : f32
    %292 = vector.broadcast %cst_94 : f32 to vector<1x96xf32>
    %293 = arith.mulf %292, %291 : vector<1x96xf32>
    %294 = math.tanh %293 : vector<1x96xf32>
    %cst_95 = arith.constant 5.000000e-01 : f32
    %295 = vector.broadcast %cst_95 : f32 to vector<1x96xf32>
    %296 = arith.mulf %295, %294 : vector<1x96xf32>
    %cst_96 = arith.constant 5.000000e-01 : f32
    %297 = vector.broadcast %cst_96 : f32 to vector<1x96xf32>
    %298 = arith.addf %296, %297 : vector<1x96xf32>
    %299 = vector.extract_strided_slice %290 {offsets = [0, 96], sizes = [1, 32], strides = [1, 1]} : vector<1x128xf32> to vector<1x32xf32>
    %300 = math.tanh %299 : vector<1x32xf32>
    %301 = vector.extract_strided_slice %298 {offsets = [0, 0], sizes = [1, 32], strides = [1, 1]} : vector<1x96xf32> to vector<1x32xf32>
    %302 = vector.extract_strided_slice %298 {offsets = [0, 32], sizes = [1, 32], strides = [1, 1]} : vector<1x96xf32> to vector<1x32xf32>
    %303 = vector.extract_strided_slice %298 {offsets = [0, 64], sizes = [1, 32], strides = [1, 1]} : vector<1x96xf32> to vector<1x32xf32>
    %304 = arith.mulf %302, %279 : vector<1x32xf32>
    %305 = arith.mulf %301, %300 : vector<1x32xf32>
    %306 = arith.addf %304, %305 : vector<1x32xf32>
    %307 = math.tanh %306 : vector<1x32xf32>
    %308 = arith.mulf %303, %307 : vector<1x32xf32>
    %309 = vector.extract_strided_slice %308 {offsets = [0, 0], sizes = [1, 16], strides = [1, 1]} : vector<1x32xf32> to vector<1x16xf32>
    %c1_97 = arith.constant 1 : index
    %c0_98 = arith.constant 0 : index
    %310 = vector.load %arg9[%c1_97, %c0_98] : memref<8x32xf32, #tpu.memory_space<vmem>>, vector<1x16xf32>
    tpu.vector_store %arg9[%c1_97, %c0_98], %309 {strides = array<i32>} : memref<8x32xf32, #tpu.memory_space<vmem>>, vector<1x16xf32>,
    %311 = vector.extract_strided_slice %308 {offsets = [0, 16], sizes = [1, 16], strides = [1, 1]} : vector<1x32xf32> to vector<1x16xf32>
    %c6_99 = arith.constant 6 : index
    %c16_100 = arith.constant 16 : index
    %312 = vector.load %arg9[%c6_99, %c16_100] : memref<8x32xf32, #tpu.memory_space<vmem>>, vector<1x16xf32>
    tpu.vector_store %arg9[%c6_99, %c16_100], %311 {strides = array<i32>} : memref<8x32xf32, #tpu.memory_space<vmem>>, vector<1x16xf32>,
    %313 = vector.extract_strided_slice %254 {offsets = [2, 0], sizes = [1, 128], strides = [1, 1]} : vector<8x128xf32> to vector<1x128xf32>
    %314 = vector.extract_strided_slice %254 {offsets = [5, 0], sizes = [1, 128], strides = [1, 1]} : vector<8x128xf32> to vector<1x128xf32>
    %315 = arith.select %18, %313, %314 : vector<1x128xi1>, vector<1x128xf32>
    %cst_101 = arith.constant dense<0.000000e+00> : vector<1x128xf32>
    %316 = tpu.matmul %308, %256, %cst_101 {dimension_numbers = #tpu.dot_dimension_numbers<[1], [0], [0], [1], [0, 0, 1, 1], [], []>} : vector<1x32xf32>, vector<32x128xf32>, vector<1x128xf32> -> vector<1x128xf32>
    %317 = arith.addf %315, %316 : vector<1x128xf32>
    %318 = vector.extract_strided_slice %317 {offsets = [0, 0], sizes = [1, 96], strides = [1, 1]} : vector<1x128xf32> to vector<1x96xf32>
    %cst_102 = arith.constant 5.000000e-01 : f32
    %319 = vector.broadcast %cst_102 : f32 to vector<1x96xf32>
    %320 = arith.mulf %319, %318 : vector<1x96xf32>
    %321 = math.tanh %320 : vector<1x96xf32>
    %cst_103 = arith.constant 5.000000e-01 : f32
    %322 = vector.broadcast %cst_103 : f32 to vector<1x96xf32>
    %323 = arith.mulf %322, %321 : vector<1x96xf32>
    %cst_104 = arith.constant 5.000000e-01 : f32
    %324 = vector.broadcast %cst_104 : f32 to vector<1x96xf32>
    %325 = arith.addf %323, %324 : vector<1x96xf32>
    %326 = vector.extract_strided_slice %317 {offsets = [0, 96], sizes = [1, 32], strides = [1, 1]} : vector<1x128xf32> to vector<1x32xf32>
    %327 = math.tanh %326 : vector<1x32xf32>
    %328 = vector.extract_strided_slice %325 {offsets = [0, 0], sizes = [1, 32], strides = [1, 1]} : vector<1x96xf32> to vector<1x32xf32>
    %329 = vector.extract_strided_slice %325 {offsets = [0, 32], sizes = [1, 32], strides = [1, 1]} : vector<1x96xf32> to vector<1x32xf32>
    %330 = vector.extract_strided_slice %325 {offsets = [0, 64], sizes = [1, 32], strides = [1, 1]} : vector<1x96xf32> to vector<1x32xf32>
    %331 = arith.mulf %329, %306 : vector<1x32xf32>
    %332 = arith.mulf %328, %327 : vector<1x32xf32>
    %333 = arith.addf %331, %332 : vector<1x32xf32>
    %334 = math.tanh %333 : vector<1x32xf32>
    %335 = arith.mulf %330, %334 : vector<1x32xf32>
    %336 = vector.extract_strided_slice %335 {offsets = [0, 0], sizes = [1, 16], strides = [1, 1]} : vector<1x32xf32> to vector<1x16xf32>
    %c2_105 = arith.constant 2 : index
    %c0_106 = arith.constant 0 : index
    %337 = vector.load %arg9[%c2_105, %c0_106] : memref<8x32xf32, #tpu.memory_space<vmem>>, vector<1x16xf32>
    tpu.vector_store %arg9[%c2_105, %c0_106], %336 {strides = array<i32>} : memref<8x32xf32, #tpu.memory_space<vmem>>, vector<1x16xf32>,
    %338 = vector.extract_strided_slice %335 {offsets = [0, 16], sizes = [1, 16], strides = [1, 1]} : vector<1x32xf32> to vector<1x16xf32>
    %c5_107 = arith.constant 5 : index
    %c16_108 = arith.constant 16 : index
    %339 = vector.load %arg9[%c5_107, %c16_108] : memref<8x32xf32, #tpu.memory_space<vmem>>, vector<1x16xf32>
    tpu.vector_store %arg9[%c5_107, %c16_108], %338 {strides = array<i32>} : memref<8x32xf32, #tpu.memory_space<vmem>>, vector<1x16xf32>,
    %340 = vector.extract_strided_slice %254 {offsets = [3, 0], sizes = [1, 128], strides = [1, 1]} : vector<8x128xf32> to vector<1x128xf32>
    %341 = vector.extract_strided_slice %254 {offsets = [4, 0], sizes = [1, 128], strides = [1, 1]} : vector<8x128xf32> to vector<1x128xf32>
    %342 = arith.select %18, %340, %341 : vector<1x128xi1>, vector<1x128xf32>
    %cst_109 = arith.constant dense<0.000000e+00> : vector<1x128xf32>
    %343 = tpu.matmul %335, %256, %cst_109 {dimension_numbers = #tpu.dot_dimension_numbers<[1], [0], [0], [1], [0, 0, 1, 1], [], []>} : vector<1x32xf32>, vector<32x128xf32>, vector<1x128xf32> -> vector<1x128xf32>
    %344 = arith.addf %342, %343 : vector<1x128xf32>
    %345 = vector.extract_strided_slice %344 {offsets = [0, 0], sizes = [1, 96], strides = [1, 1]} : vector<1x128xf32> to vector<1x96xf32>
    %cst_110 = arith.constant 5.000000e-01 : f32
    %346 = vector.broadcast %cst_110 : f32 to vector<1x96xf32>
    %347 = arith.mulf %346, %345 : vector<1x96xf32>
    %348 = math.tanh %347 : vector<1x96xf32>
    %cst_111 = arith.constant 5.000000e-01 : f32
    %349 = vector.broadcast %cst_111 : f32 to vector<1x96xf32>
    %350 = arith.mulf %349, %348 : vector<1x96xf32>
    %cst_112 = arith.constant 5.000000e-01 : f32
    %351 = vector.broadcast %cst_112 : f32 to vector<1x96xf32>
    %352 = arith.addf %350, %351 : vector<1x96xf32>
    %353 = vector.extract_strided_slice %344 {offsets = [0, 96], sizes = [1, 32], strides = [1, 1]} : vector<1x128xf32> to vector<1x32xf32>
    %354 = math.tanh %353 : vector<1x32xf32>
    %355 = vector.extract_strided_slice %352 {offsets = [0, 0], sizes = [1, 32], strides = [1, 1]} : vector<1x96xf32> to vector<1x32xf32>
    %356 = vector.extract_strided_slice %352 {offsets = [0, 32], sizes = [1, 32], strides = [1, 1]} : vector<1x96xf32> to vector<1x32xf32>
    %357 = vector.extract_strided_slice %352 {offsets = [0, 64], sizes = [1, 32], strides = [1, 1]} : vector<1x96xf32> to vector<1x32xf32>
    %358 = arith.mulf %356, %333 : vector<1x32xf32>
    %359 = arith.mulf %355, %354 : vector<1x32xf32>
    %360 = arith.addf %358, %359 : vector<1x32xf32>
    %361 = math.tanh %360 : vector<1x32xf32>
    %362 = arith.mulf %357, %361 : vector<1x32xf32>
    %363 = vector.extract_strided_slice %362 {offsets = [0, 0], sizes = [1, 16], strides = [1, 1]} : vector<1x32xf32> to vector<1x16xf32>
    %c3_113 = arith.constant 3 : index
    %c0_114 = arith.constant 0 : index
    %364 = vector.load %arg9[%c3_113, %c0_114] : memref<8x32xf32, #tpu.memory_space<vmem>>, vector<1x16xf32>
    tpu.vector_store %arg9[%c3_113, %c0_114], %363 {strides = array<i32>} : memref<8x32xf32, #tpu.memory_space<vmem>>, vector<1x16xf32>,
    %365 = vector.extract_strided_slice %362 {offsets = [0, 16], sizes = [1, 16], strides = [1, 1]} : vector<1x32xf32> to vector<1x16xf32>
    %c4_115 = arith.constant 4 : index
    %c16_116 = arith.constant 16 : index
    %366 = vector.load %arg9[%c4_115, %c16_116] : memref<8x32xf32, #tpu.memory_space<vmem>>, vector<1x16xf32>
    tpu.vector_store %arg9[%c4_115, %c16_116], %365 {strides = array<i32>} : memref<8x32xf32, #tpu.memory_space<vmem>>, vector<1x16xf32>,
    %367 = vector.extract_strided_slice %254 {offsets = [4, 0], sizes = [1, 128], strides = [1, 1]} : vector<8x128xf32> to vector<1x128xf32>
    %368 = vector.extract_strided_slice %254 {offsets = [3, 0], sizes = [1, 128], strides = [1, 1]} : vector<8x128xf32> to vector<1x128xf32>
    %369 = arith.select %18, %367, %368 : vector<1x128xi1>, vector<1x128xf32>
    %cst_117 = arith.constant dense<0.000000e+00> : vector<1x128xf32>
    %370 = tpu.matmul %362, %256, %cst_117 {dimension_numbers = #tpu.dot_dimension_numbers<[1], [0], [0], [1], [0, 0, 1, 1], [], []>} : vector<1x32xf32>, vector<32x128xf32>, vector<1x128xf32> -> vector<1x128xf32>
    %371 = arith.addf %369, %370 : vector<1x128xf32>
    %372 = vector.extract_strided_slice %371 {offsets = [0, 0], sizes = [1, 96], strides = [1, 1]} : vector<1x128xf32> to vector<1x96xf32>
    %cst_118 = arith.constant 5.000000e-01 : f32
    %373 = vector.broadcast %cst_118 : f32 to vector<1x96xf32>
    %374 = arith.mulf %373, %372 : vector<1x96xf32>
    %375 = math.tanh %374 : vector<1x96xf32>
    %cst_119 = arith.constant 5.000000e-01 : f32
    %376 = vector.broadcast %cst_119 : f32 to vector<1x96xf32>
    %377 = arith.mulf %376, %375 : vector<1x96xf32>
    %cst_120 = arith.constant 5.000000e-01 : f32
    %378 = vector.broadcast %cst_120 : f32 to vector<1x96xf32>
    %379 = arith.addf %377, %378 : vector<1x96xf32>
    %380 = vector.extract_strided_slice %371 {offsets = [0, 96], sizes = [1, 32], strides = [1, 1]} : vector<1x128xf32> to vector<1x32xf32>
    %381 = math.tanh %380 : vector<1x32xf32>
    %382 = vector.extract_strided_slice %379 {offsets = [0, 0], sizes = [1, 32], strides = [1, 1]} : vector<1x96xf32> to vector<1x32xf32>
    %383 = vector.extract_strided_slice %379 {offsets = [0, 32], sizes = [1, 32], strides = [1, 1]} : vector<1x96xf32> to vector<1x32xf32>
    %384 = vector.extract_strided_slice %379 {offsets = [0, 64], sizes = [1, 32], strides = [1, 1]} : vector<1x96xf32> to vector<1x32xf32>
    %385 = arith.mulf %383, %360 : vector<1x32xf32>
    %386 = arith.mulf %382, %381 : vector<1x32xf32>
    %387 = arith.addf %385, %386 : vector<1x32xf32>
    %388 = math.tanh %387 : vector<1x32xf32>
    %389 = arith.mulf %384, %388 : vector<1x32xf32>
    %390 = vector.extract_strided_slice %389 {offsets = [0, 0], sizes = [1, 16], strides = [1, 1]} : vector<1x32xf32> to vector<1x16xf32>
    %c4_121 = arith.constant 4 : index
    %c0_122 = arith.constant 0 : index
    %391 = vector.load %arg9[%c4_121, %c0_122] : memref<8x32xf32, #tpu.memory_space<vmem>>, vector<1x16xf32>
    tpu.vector_store %arg9[%c4_121, %c0_122], %390 {strides = array<i32>} : memref<8x32xf32, #tpu.memory_space<vmem>>, vector<1x16xf32>,
    %392 = vector.extract_strided_slice %389 {offsets = [0, 16], sizes = [1, 16], strides = [1, 1]} : vector<1x32xf32> to vector<1x16xf32>
    %c3_123 = arith.constant 3 : index
    %c16_124 = arith.constant 16 : index
    %393 = vector.load %arg9[%c3_123, %c16_124] : memref<8x32xf32, #tpu.memory_space<vmem>>, vector<1x16xf32>
    tpu.vector_store %arg9[%c3_123, %c16_124], %392 {strides = array<i32>} : memref<8x32xf32, #tpu.memory_space<vmem>>, vector<1x16xf32>,
    %394 = vector.extract_strided_slice %254 {offsets = [5, 0], sizes = [1, 128], strides = [1, 1]} : vector<8x128xf32> to vector<1x128xf32>
    %395 = vector.extract_strided_slice %254 {offsets = [2, 0], sizes = [1, 128], strides = [1, 1]} : vector<8x128xf32> to vector<1x128xf32>
    %396 = arith.select %18, %394, %395 : vector<1x128xi1>, vector<1x128xf32>
    %cst_125 = arith.constant dense<0.000000e+00> : vector<1x128xf32>
    %397 = tpu.matmul %389, %256, %cst_125 {dimension_numbers = #tpu.dot_dimension_numbers<[1], [0], [0], [1], [0, 0, 1, 1], [], []>} : vector<1x32xf32>, vector<32x128xf32>, vector<1x128xf32> -> vector<1x128xf32>
    %398 = arith.addf %396, %397 : vector<1x128xf32>
    %399 = vector.extract_strided_slice %398 {offsets = [0, 0], sizes = [1, 96], strides = [1, 1]} : vector<1x128xf32> to vector<1x96xf32>
    %cst_126 = arith.constant 5.000000e-01 : f32
    %400 = vector.broadcast %cst_126 : f32 to vector<1x96xf32>
    %401 = arith.mulf %400, %399 : vector<1x96xf32>
    %402 = math.tanh %401 : vector<1x96xf32>
    %cst_127 = arith.constant 5.000000e-01 : f32
    %403 = vector.broadcast %cst_127 : f32 to vector<1x96xf32>
    %404 = arith.mulf %403, %402 : vector<1x96xf32>
    %cst_128 = arith.constant 5.000000e-01 : f32
    %405 = vector.broadcast %cst_128 : f32 to vector<1x96xf32>
    %406 = arith.addf %404, %405 : vector<1x96xf32>
    %407 = vector.extract_strided_slice %398 {offsets = [0, 96], sizes = [1, 32], strides = [1, 1]} : vector<1x128xf32> to vector<1x32xf32>
    %408 = math.tanh %407 : vector<1x32xf32>
    %409 = vector.extract_strided_slice %406 {offsets = [0, 0], sizes = [1, 32], strides = [1, 1]} : vector<1x96xf32> to vector<1x32xf32>
    %410 = vector.extract_strided_slice %406 {offsets = [0, 32], sizes = [1, 32], strides = [1, 1]} : vector<1x96xf32> to vector<1x32xf32>
    %411 = vector.extract_strided_slice %406 {offsets = [0, 64], sizes = [1, 32], strides = [1, 1]} : vector<1x96xf32> to vector<1x32xf32>
    %412 = arith.mulf %410, %387 : vector<1x32xf32>
    %413 = arith.mulf %409, %408 : vector<1x32xf32>
    %414 = arith.addf %412, %413 : vector<1x32xf32>
    %415 = math.tanh %414 : vector<1x32xf32>
    %416 = arith.mulf %411, %415 : vector<1x32xf32>
    %417 = vector.extract_strided_slice %416 {offsets = [0, 0], sizes = [1, 16], strides = [1, 1]} : vector<1x32xf32> to vector<1x16xf32>
    %c5_129 = arith.constant 5 : index
    %c0_130 = arith.constant 0 : index
    %418 = vector.load %arg9[%c5_129, %c0_130] : memref<8x32xf32, #tpu.memory_space<vmem>>, vector<1x16xf32>
    tpu.vector_store %arg9[%c5_129, %c0_130], %417 {strides = array<i32>} : memref<8x32xf32, #tpu.memory_space<vmem>>, vector<1x16xf32>,
    %419 = vector.extract_strided_slice %416 {offsets = [0, 16], sizes = [1, 16], strides = [1, 1]} : vector<1x32xf32> to vector<1x16xf32>
    %c2_131 = arith.constant 2 : index
    %c16_132 = arith.constant 16 : index
    %420 = vector.load %arg9[%c2_131, %c16_132] : memref<8x32xf32, #tpu.memory_space<vmem>>, vector<1x16xf32>
    tpu.vector_store %arg9[%c2_131, %c16_132], %419 {strides = array<i32>} : memref<8x32xf32, #tpu.memory_space<vmem>>, vector<1x16xf32>,
    %421 = vector.extract_strided_slice %254 {offsets = [6, 0], sizes = [1, 128], strides = [1, 1]} : vector<8x128xf32> to vector<1x128xf32>
    %422 = vector.extract_strided_slice %254 {offsets = [1, 0], sizes = [1, 128], strides = [1, 1]} : vector<8x128xf32> to vector<1x128xf32>
    %423 = arith.select %18, %421, %422 : vector<1x128xi1>, vector<1x128xf32>
    %cst_133 = arith.constant dense<0.000000e+00> : vector<1x128xf32>
    %424 = tpu.matmul %416, %256, %cst_133 {dimension_numbers = #tpu.dot_dimension_numbers<[1], [0], [0], [1], [0, 0, 1, 1], [], []>} : vector<1x32xf32>, vector<32x128xf32>, vector<1x128xf32> -> vector<1x128xf32>
    %425 = arith.addf %423, %424 : vector<1x128xf32>
    %426 = vector.extract_strided_slice %425 {offsets = [0, 0], sizes = [1, 96], strides = [1, 1]} : vector<1x128xf32> to vector<1x96xf32>
    %cst_134 = arith.constant 5.000000e-01 : f32
    %427 = vector.broadcast %cst_134 : f32 to vector<1x96xf32>
    %428 = arith.mulf %427, %426 : vector<1x96xf32>
    %429 = math.tanh %428 : vector<1x96xf32>
    %cst_135 = arith.constant 5.000000e-01 : f32
    %430 = vector.broadcast %cst_135 : f32 to vector<1x96xf32>
    %431 = arith.mulf %430, %429 : vector<1x96xf32>
    %cst_136 = arith.constant 5.000000e-01 : f32
    %432 = vector.broadcast %cst_136 : f32 to vector<1x96xf32>
    %433 = arith.addf %431, %432 : vector<1x96xf32>
    %434 = vector.extract_strided_slice %425 {offsets = [0, 96], sizes = [1, 32], strides = [1, 1]} : vector<1x128xf32> to vector<1x32xf32>
    %435 = math.tanh %434 : vector<1x32xf32>
    %436 = vector.extract_strided_slice %433 {offsets = [0, 0], sizes = [1, 32], strides = [1, 1]} : vector<1x96xf32> to vector<1x32xf32>
    %437 = vector.extract_strided_slice %433 {offsets = [0, 32], sizes = [1, 32], strides = [1, 1]} : vector<1x96xf32> to vector<1x32xf32>
    %438 = vector.extract_strided_slice %433 {offsets = [0, 64], sizes = [1, 32], strides = [1, 1]} : vector<1x96xf32> to vector<1x32xf32>
    %439 = arith.mulf %437, %414 : vector<1x32xf32>
    %440 = arith.mulf %436, %435 : vector<1x32xf32>
    %441 = arith.addf %439, %440 : vector<1x32xf32>
    %442 = math.tanh %441 : vector<1x32xf32>
    %443 = arith.mulf %438, %442 : vector<1x32xf32>
    %444 = vector.extract_strided_slice %443 {offsets = [0, 0], sizes = [1, 16], strides = [1, 1]} : vector<1x32xf32> to vector<1x16xf32>
    %c6_137 = arith.constant 6 : index
    %c0_138 = arith.constant 0 : index
    %445 = vector.load %arg9[%c6_137, %c0_138] : memref<8x32xf32, #tpu.memory_space<vmem>>, vector<1x16xf32>
    tpu.vector_store %arg9[%c6_137, %c0_138], %444 {strides = array<i32>} : memref<8x32xf32, #tpu.memory_space<vmem>>, vector<1x16xf32>,
    %446 = vector.extract_strided_slice %443 {offsets = [0, 16], sizes = [1, 16], strides = [1, 1]} : vector<1x32xf32> to vector<1x16xf32>
    %c1_139 = arith.constant 1 : index
    %c16_140 = arith.constant 16 : index
    %447 = vector.load %arg9[%c1_139, %c16_140] : memref<8x32xf32, #tpu.memory_space<vmem>>, vector<1x16xf32>
    tpu.vector_store %arg9[%c1_139, %c16_140], %446 {strides = array<i32>} : memref<8x32xf32, #tpu.memory_space<vmem>>, vector<1x16xf32>,
    %448 = vector.extract_strided_slice %254 {offsets = [7, 0], sizes = [1, 128], strides = [1, 1]} : vector<8x128xf32> to vector<1x128xf32>
    %449 = vector.extract_strided_slice %254 {offsets = [0, 0], sizes = [1, 128], strides = [1, 1]} : vector<8x128xf32> to vector<1x128xf32>
    %450 = arith.select %18, %448, %449 : vector<1x128xi1>, vector<1x128xf32>
    %cst_141 = arith.constant dense<0.000000e+00> : vector<1x128xf32>
    %451 = tpu.matmul %443, %256, %cst_141 {dimension_numbers = #tpu.dot_dimension_numbers<[1], [0], [0], [1], [0, 0, 1, 1], [], []>} : vector<1x32xf32>, vector<32x128xf32>, vector<1x128xf32> -> vector<1x128xf32>
    %452 = arith.addf %450, %451 : vector<1x128xf32>
    %453 = vector.extract_strided_slice %452 {offsets = [0, 0], sizes = [1, 96], strides = [1, 1]} : vector<1x128xf32> to vector<1x96xf32>
    %cst_142 = arith.constant 5.000000e-01 : f32
    %454 = vector.broadcast %cst_142 : f32 to vector<1x96xf32>
    %455 = arith.mulf %454, %453 : vector<1x96xf32>
    %456 = math.tanh %455 : vector<1x96xf32>
    %cst_143 = arith.constant 5.000000e-01 : f32
    %457 = vector.broadcast %cst_143 : f32 to vector<1x96xf32>
    %458 = arith.mulf %457, %456 : vector<1x96xf32>
    %cst_144 = arith.constant 5.000000e-01 : f32
    %459 = vector.broadcast %cst_144 : f32 to vector<1x96xf32>
    %460 = arith.addf %458, %459 : vector<1x96xf32>
    %461 = vector.extract_strided_slice %452 {offsets = [0, 96], sizes = [1, 32], strides = [1, 1]} : vector<1x128xf32> to vector<1x32xf32>
    %462 = math.tanh %461 : vector<1x32xf32>
    %463 = vector.extract_strided_slice %460 {offsets = [0, 0], sizes = [1, 32], strides = [1, 1]} : vector<1x96xf32> to vector<1x32xf32>
    %464 = vector.extract_strided_slice %460 {offsets = [0, 32], sizes = [1, 32], strides = [1, 1]} : vector<1x96xf32> to vector<1x32xf32>
    %465 = vector.extract_strided_slice %460 {offsets = [0, 64], sizes = [1, 32], strides = [1, 1]} : vector<1x96xf32> to vector<1x32xf32>
    %466 = arith.mulf %464, %441 : vector<1x32xf32>
    %467 = arith.mulf %463, %462 : vector<1x32xf32>
    %468 = arith.addf %466, %467 : vector<1x32xf32>
    %469 = math.tanh %468 : vector<1x32xf32>
    %470 = arith.mulf %465, %469 : vector<1x32xf32>
    %471 = vector.extract_strided_slice %470 {offsets = [0, 0], sizes = [1, 16], strides = [1, 1]} : vector<1x32xf32> to vector<1x16xf32>
    %c7_145 = arith.constant 7 : index
    %c0_146 = arith.constant 0 : index
    %472 = vector.load %arg9[%c7_145, %c0_146] : memref<8x32xf32, #tpu.memory_space<vmem>>, vector<1x16xf32>
    tpu.vector_store %arg9[%c7_145, %c0_146], %471 {strides = array<i32>} : memref<8x32xf32, #tpu.memory_space<vmem>>, vector<1x16xf32>,
    %473 = vector.extract_strided_slice %470 {offsets = [0, 16], sizes = [1, 16], strides = [1, 1]} : vector<1x32xf32> to vector<1x16xf32>
    %c0_147 = arith.constant 0 : index
    %c16_148 = arith.constant 16 : index
    %474 = vector.load %arg9[%c0_147, %c16_148] : memref<8x32xf32, #tpu.memory_space<vmem>>, vector<1x16xf32>
    tpu.vector_store %arg9[%c0_147, %c16_148], %473 {strides = array<i32>} : memref<8x32xf32, #tpu.memory_space<vmem>>, vector<1x16xf32>,
    %c0_149 = arith.constant 0 : index
    %c0_150 = arith.constant 0 : index
    %475 = vector.load %arg9[%c0_149, %c0_150] : memref<8x32xf32, #tpu.memory_space<vmem>>, vector<8x32xf32>
    %c2_151 = arith.constant 2 : index
    %c0_152 = arith.constant 0 : index
    %c0_153 = arith.constant 0 : index
    %476 = vector.load %arg1[%c2_151, %c0_152, %c0_153] : memref<3x32x128xf32, #tpu.memory_space<vmem>>, vector<1x32x128xf32>
    %477 = vector.shape_cast %476 : vector<1x32x128xf32> to vector<32x128xf32>
    %cst_154 = arith.constant dense<0.000000e+00> : vector<8x128xf32>
    %478 = tpu.matmul %475, %477, %cst_154 {dimension_numbers = #tpu.dot_dimension_numbers<[1], [0], [0], [1], [0, 0, 1, 1], [], []>} : vector<8x32xf32>, vector<32x128xf32>, vector<8x128xf32> -> vector<8x128xf32>
    %c2_155 = arith.constant 2 : index
    %c0_156 = arith.constant 0 : index
    %c0_157 = arith.constant 0 : index
    %479 = vector.load %arg3[%c2_155, %c0_156, %c0_157] : memref<3x1x128xf32, #tpu.memory_space<vmem>>, vector<1x1x128xf32>
    %480 = vector.shape_cast %479 : vector<1x1x128xf32> to vector<1x128xf32>
    %481 = vector.broadcast %480 : vector<1x128xf32> to vector<8x128xf32>
    %482 = arith.addf %478, %481 : vector<8x128xf32>
    %c2_158 = arith.constant 2 : index
    %c0_159 = arith.constant 0 : index
    %c0_160 = arith.constant 0 : index
    %483 = vector.load %arg2[%c2_158, %c0_159, %c0_160] : memref<3x32x128xf32, #tpu.memory_space<vmem>>, vector<1x32x128xf32>
    %484 = vector.shape_cast %483 : vector<1x32x128xf32> to vector<32x128xf32>
    %cst_161 = arith.constant 0.000000e+00 : f32
    %485 = vector.broadcast %cst_161 : f32 to vector<1x32xf32>
    %cst_162 = arith.constant 0.000000e+00 : f32
    %486 = vector.broadcast %cst_162 : f32 to vector<1x32xf32>
    %487 = vector.extract_strided_slice %482 {offsets = [0, 0], sizes = [1, 128], strides = [1, 1]} : vector<8x128xf32> to vector<1x128xf32>
    %488 = vector.extract_strided_slice %482 {offsets = [7, 0], sizes = [1, 128], strides = [1, 1]} : vector<8x128xf32> to vector<1x128xf32>
    %489 = arith.select %18, %487, %488 : vector<1x128xi1>, vector<1x128xf32>
    %cst_163 = arith.constant dense<0.000000e+00> : vector<1x128xf32>
    %490 = tpu.matmul %485, %484, %cst_163 {dimension_numbers = #tpu.dot_dimension_numbers<[1], [0], [0], [1], [0, 0, 1, 1], [], []>} : vector<1x32xf32>, vector<32x128xf32>, vector<1x128xf32> -> vector<1x128xf32>
    %491 = arith.addf %489, %490 : vector<1x128xf32>
    %492 = vector.extract_strided_slice %491 {offsets = [0, 0], sizes = [1, 96], strides = [1, 1]} : vector<1x128xf32> to vector<1x96xf32>
    %cst_164 = arith.constant 5.000000e-01 : f32
    %493 = vector.broadcast %cst_164 : f32 to vector<1x96xf32>
    %494 = arith.mulf %493, %492 : vector<1x96xf32>
    %495 = math.tanh %494 : vector<1x96xf32>
    %cst_165 = arith.constant 5.000000e-01 : f32
    %496 = vector.broadcast %cst_165 : f32 to vector<1x96xf32>
    %497 = arith.mulf %496, %495 : vector<1x96xf32>
    %cst_166 = arith.constant 5.000000e-01 : f32
    %498 = vector.broadcast %cst_166 : f32 to vector<1x96xf32>
    %499 = arith.addf %497, %498 : vector<1x96xf32>
    %500 = vector.extract_strided_slice %491 {offsets = [0, 96], sizes = [1, 32], strides = [1, 1]} : vector<1x128xf32> to vector<1x32xf32>
    %501 = math.tanh %500 : vector<1x32xf32>
    %502 = vector.extract_strided_slice %499 {offsets = [0, 0], sizes = [1, 32], strides = [1, 1]} : vector<1x96xf32> to vector<1x32xf32>
    %503 = vector.extract_strided_slice %499 {offsets = [0, 32], sizes = [1, 32], strides = [1, 1]} : vector<1x96xf32> to vector<1x32xf32>
    %504 = vector.extract_strided_slice %499 {offsets = [0, 64], sizes = [1, 32], strides = [1, 1]} : vector<1x96xf32> to vector<1x32xf32>
    %505 = arith.mulf %503, %486 : vector<1x32xf32>
    %506 = arith.mulf %502, %501 : vector<1x32xf32>
    %507 = arith.addf %505, %506 : vector<1x32xf32>
    %508 = math.tanh %507 : vector<1x32xf32>
    %509 = arith.mulf %504, %508 : vector<1x32xf32>
    %510 = vector.extract_strided_slice %482 {offsets = [1, 0], sizes = [1, 128], strides = [1, 1]} : vector<8x128xf32> to vector<1x128xf32>
    %511 = vector.extract_strided_slice %482 {offsets = [6, 0], sizes = [1, 128], strides = [1, 1]} : vector<8x128xf32> to vector<1x128xf32>
    %512 = arith.select %18, %510, %511 : vector<1x128xi1>, vector<1x128xf32>
    %cst_167 = arith.constant dense<0.000000e+00> : vector<1x128xf32>
    %513 = tpu.matmul %509, %484, %cst_167 {dimension_numbers = #tpu.dot_dimension_numbers<[1], [0], [0], [1], [0, 0, 1, 1], [], []>} : vector<1x32xf32>, vector<32x128xf32>, vector<1x128xf32> -> vector<1x128xf32>
    %514 = arith.addf %512, %513 : vector<1x128xf32>
    %515 = vector.extract_strided_slice %514 {offsets = [0, 0], sizes = [1, 96], strides = [1, 1]} : vector<1x128xf32> to vector<1x96xf32>
    %cst_168 = arith.constant 5.000000e-01 : f32
    %516 = vector.broadcast %cst_168 : f32 to vector<1x96xf32>
    %517 = arith.mulf %516, %515 : vector<1x96xf32>
    %518 = math.tanh %517 : vector<1x96xf32>
    %cst_169 = arith.constant 5.000000e-01 : f32
    %519 = vector.broadcast %cst_169 : f32 to vector<1x96xf32>
    %520 = arith.mulf %519, %518 : vector<1x96xf32>
    %cst_170 = arith.constant 5.000000e-01 : f32
    %521 = vector.broadcast %cst_170 : f32 to vector<1x96xf32>
    %522 = arith.addf %520, %521 : vector<1x96xf32>
    %523 = vector.extract_strided_slice %514 {offsets = [0, 96], sizes = [1, 32], strides = [1, 1]} : vector<1x128xf32> to vector<1x32xf32>
    %524 = math.tanh %523 : vector<1x32xf32>
    %525 = vector.extract_strided_slice %522 {offsets = [0, 0], sizes = [1, 32], strides = [1, 1]} : vector<1x96xf32> to vector<1x32xf32>
    %526 = vector.extract_strided_slice %522 {offsets = [0, 32], sizes = [1, 32], strides = [1, 1]} : vector<1x96xf32> to vector<1x32xf32>
    %527 = vector.extract_strided_slice %522 {offsets = [0, 64], sizes = [1, 32], strides = [1, 1]} : vector<1x96xf32> to vector<1x32xf32>
    %528 = arith.mulf %526, %507 : vector<1x32xf32>
    %529 = arith.mulf %525, %524 : vector<1x32xf32>
    %530 = arith.addf %528, %529 : vector<1x32xf32>
    %531 = math.tanh %530 : vector<1x32xf32>
    %532 = arith.mulf %527, %531 : vector<1x32xf32>
    %533 = vector.extract_strided_slice %482 {offsets = [2, 0], sizes = [1, 128], strides = [1, 1]} : vector<8x128xf32> to vector<1x128xf32>
    %534 = vector.extract_strided_slice %482 {offsets = [5, 0], sizes = [1, 128], strides = [1, 1]} : vector<8x128xf32> to vector<1x128xf32>
    %535 = arith.select %18, %533, %534 : vector<1x128xi1>, vector<1x128xf32>
    %cst_171 = arith.constant dense<0.000000e+00> : vector<1x128xf32>
    %536 = tpu.matmul %532, %484, %cst_171 {dimension_numbers = #tpu.dot_dimension_numbers<[1], [0], [0], [1], [0, 0, 1, 1], [], []>} : vector<1x32xf32>, vector<32x128xf32>, vector<1x128xf32> -> vector<1x128xf32>
    %537 = arith.addf %535, %536 : vector<1x128xf32>
    %538 = vector.extract_strided_slice %537 {offsets = [0, 0], sizes = [1, 96], strides = [1, 1]} : vector<1x128xf32> to vector<1x96xf32>
    %cst_172 = arith.constant 5.000000e-01 : f32
    %539 = vector.broadcast %cst_172 : f32 to vector<1x96xf32>
    %540 = arith.mulf %539, %538 : vector<1x96xf32>
    %541 = math.tanh %540 : vector<1x96xf32>
    %cst_173 = arith.constant 5.000000e-01 : f32
    %542 = vector.broadcast %cst_173 : f32 to vector<1x96xf32>
    %543 = arith.mulf %542, %541 : vector<1x96xf32>
    %cst_174 = arith.constant 5.000000e-01 : f32
    %544 = vector.broadcast %cst_174 : f32 to vector<1x96xf32>
    %545 = arith.addf %543, %544 : vector<1x96xf32>
    %546 = vector.extract_strided_slice %537 {offsets = [0, 96], sizes = [1, 32], strides = [1, 1]} : vector<1x128xf32> to vector<1x32xf32>
    %547 = math.tanh %546 : vector<1x32xf32>
    %548 = vector.extract_strided_slice %545 {offsets = [0, 0], sizes = [1, 32], strides = [1, 1]} : vector<1x96xf32> to vector<1x32xf32>
    %549 = vector.extract_strided_slice %545 {offsets = [0, 32], sizes = [1, 32], strides = [1, 1]} : vector<1x96xf32> to vector<1x32xf32>
    %550 = vector.extract_strided_slice %545 {offsets = [0, 64], sizes = [1, 32], strides = [1, 1]} : vector<1x96xf32> to vector<1x32xf32>
    %551 = arith.mulf %549, %530 : vector<1x32xf32>
    %552 = arith.mulf %548, %547 : vector<1x32xf32>
    %553 = arith.addf %551, %552 : vector<1x32xf32>
    %554 = math.tanh %553 : vector<1x32xf32>
    %555 = arith.mulf %550, %554 : vector<1x32xf32>
    %556 = vector.extract_strided_slice %482 {offsets = [3, 0], sizes = [1, 128], strides = [1, 1]} : vector<8x128xf32> to vector<1x128xf32>
    %557 = vector.extract_strided_slice %482 {offsets = [4, 0], sizes = [1, 128], strides = [1, 1]} : vector<8x128xf32> to vector<1x128xf32>
    %558 = arith.select %18, %556, %557 : vector<1x128xi1>, vector<1x128xf32>
    %cst_175 = arith.constant dense<0.000000e+00> : vector<1x128xf32>
    %559 = tpu.matmul %555, %484, %cst_175 {dimension_numbers = #tpu.dot_dimension_numbers<[1], [0], [0], [1], [0, 0, 1, 1], [], []>} : vector<1x32xf32>, vector<32x128xf32>, vector<1x128xf32> -> vector<1x128xf32>
    %560 = arith.addf %558, %559 : vector<1x128xf32>
    %561 = vector.extract_strided_slice %560 {offsets = [0, 0], sizes = [1, 96], strides = [1, 1]} : vector<1x128xf32> to vector<1x96xf32>
    %cst_176 = arith.constant 5.000000e-01 : f32
    %562 = vector.broadcast %cst_176 : f32 to vector<1x96xf32>
    %563 = arith.mulf %562, %561 : vector<1x96xf32>
    %564 = math.tanh %563 : vector<1x96xf32>
    %cst_177 = arith.constant 5.000000e-01 : f32
    %565 = vector.broadcast %cst_177 : f32 to vector<1x96xf32>
    %566 = arith.mulf %565, %564 : vector<1x96xf32>
    %cst_178 = arith.constant 5.000000e-01 : f32
    %567 = vector.broadcast %cst_178 : f32 to vector<1x96xf32>
    %568 = arith.addf %566, %567 : vector<1x96xf32>
    %569 = vector.extract_strided_slice %560 {offsets = [0, 96], sizes = [1, 32], strides = [1, 1]} : vector<1x128xf32> to vector<1x32xf32>
    %570 = math.tanh %569 : vector<1x32xf32>
    %571 = vector.extract_strided_slice %568 {offsets = [0, 0], sizes = [1, 32], strides = [1, 1]} : vector<1x96xf32> to vector<1x32xf32>
    %572 = vector.extract_strided_slice %568 {offsets = [0, 32], sizes = [1, 32], strides = [1, 1]} : vector<1x96xf32> to vector<1x32xf32>
    %573 = vector.extract_strided_slice %568 {offsets = [0, 64], sizes = [1, 32], strides = [1, 1]} : vector<1x96xf32> to vector<1x32xf32>
    %574 = arith.mulf %572, %553 : vector<1x32xf32>
    %575 = arith.mulf %571, %570 : vector<1x32xf32>
    %576 = arith.addf %574, %575 : vector<1x32xf32>
    %577 = math.tanh %576 : vector<1x32xf32>
    %578 = arith.mulf %573, %577 : vector<1x32xf32>
    %579 = vector.extract_strided_slice %482 {offsets = [4, 0], sizes = [1, 128], strides = [1, 1]} : vector<8x128xf32> to vector<1x128xf32>
    %580 = vector.extract_strided_slice %482 {offsets = [3, 0], sizes = [1, 128], strides = [1, 1]} : vector<8x128xf32> to vector<1x128xf32>
    %581 = arith.select %18, %579, %580 : vector<1x128xi1>, vector<1x128xf32>
    %cst_179 = arith.constant dense<0.000000e+00> : vector<1x128xf32>
    %582 = tpu.matmul %578, %484, %cst_179 {dimension_numbers = #tpu.dot_dimension_numbers<[1], [0], [0], [1], [0, 0, 1, 1], [], []>} : vector<1x32xf32>, vector<32x128xf32>, vector<1x128xf32> -> vector<1x128xf32>
    %583 = arith.addf %581, %582 : vector<1x128xf32>
    %584 = vector.extract_strided_slice %583 {offsets = [0, 0], sizes = [1, 96], strides = [1, 1]} : vector<1x128xf32> to vector<1x96xf32>
    %cst_180 = arith.constant 5.000000e-01 : f32
    %585 = vector.broadcast %cst_180 : f32 to vector<1x96xf32>
    %586 = arith.mulf %585, %584 : vector<1x96xf32>
    %587 = math.tanh %586 : vector<1x96xf32>
    %cst_181 = arith.constant 5.000000e-01 : f32
    %588 = vector.broadcast %cst_181 : f32 to vector<1x96xf32>
    %589 = arith.mulf %588, %587 : vector<1x96xf32>
    %cst_182 = arith.constant 5.000000e-01 : f32
    %590 = vector.broadcast %cst_182 : f32 to vector<1x96xf32>
    %591 = arith.addf %589, %590 : vector<1x96xf32>
    %592 = vector.extract_strided_slice %583 {offsets = [0, 96], sizes = [1, 32], strides = [1, 1]} : vector<1x128xf32> to vector<1x32xf32>
    %593 = math.tanh %592 : vector<1x32xf32>
    %594 = vector.extract_strided_slice %591 {offsets = [0, 0], sizes = [1, 32], strides = [1, 1]} : vector<1x96xf32> to vector<1x32xf32>
    %595 = vector.extract_strided_slice %591 {offsets = [0, 32], sizes = [1, 32], strides = [1, 1]} : vector<1x96xf32> to vector<1x32xf32>
    %596 = vector.extract_strided_slice %591 {offsets = [0, 64], sizes = [1, 32], strides = [1, 1]} : vector<1x96xf32> to vector<1x32xf32>
    %597 = arith.mulf %595, %576 : vector<1x32xf32>
    %598 = arith.mulf %594, %593 : vector<1x32xf32>
    %599 = arith.addf %597, %598 : vector<1x32xf32>
    %600 = math.tanh %599 : vector<1x32xf32>
    %601 = arith.mulf %596, %600 : vector<1x32xf32>
    %602 = vector.extract_strided_slice %482 {offsets = [5, 0], sizes = [1, 128], strides = [1, 1]} : vector<8x128xf32> to vector<1x128xf32>
    %603 = vector.extract_strided_slice %482 {offsets = [2, 0], sizes = [1, 128], strides = [1, 1]} : vector<8x128xf32> to vector<1x128xf32>
    %604 = arith.select %18, %602, %603 : vector<1x128xi1>, vector<1x128xf32>
    %cst_183 = arith.constant dense<0.000000e+00> : vector<1x128xf32>
    %605 = tpu.matmul %601, %484, %cst_183 {dimension_numbers = #tpu.dot_dimension_numbers<[1], [0], [0], [1], [0, 0, 1, 1], [], []>} : vector<1x32xf32>, vector<32x128xf32>, vector<1x128xf32> -> vector<1x128xf32>
    %606 = arith.addf %604, %605 : vector<1x128xf32>
    %607 = vector.extract_strided_slice %606 {offsets = [0, 0], sizes = [1, 96], strides = [1, 1]} : vector<1x128xf32> to vector<1x96xf32>
    %cst_184 = arith.constant 5.000000e-01 : f32
    %608 = vector.broadcast %cst_184 : f32 to vector<1x96xf32>
    %609 = arith.mulf %608, %607 : vector<1x96xf32>
    %610 = math.tanh %609 : vector<1x96xf32>
    %cst_185 = arith.constant 5.000000e-01 : f32
    %611 = vector.broadcast %cst_185 : f32 to vector<1x96xf32>
    %612 = arith.mulf %611, %610 : vector<1x96xf32>
    %cst_186 = arith.constant 5.000000e-01 : f32
    %613 = vector.broadcast %cst_186 : f32 to vector<1x96xf32>
    %614 = arith.addf %612, %613 : vector<1x96xf32>
    %615 = vector.extract_strided_slice %606 {offsets = [0, 96], sizes = [1, 32], strides = [1, 1]} : vector<1x128xf32> to vector<1x32xf32>
    %616 = math.tanh %615 : vector<1x32xf32>
    %617 = vector.extract_strided_slice %614 {offsets = [0, 0], sizes = [1, 32], strides = [1, 1]} : vector<1x96xf32> to vector<1x32xf32>
    %618 = vector.extract_strided_slice %614 {offsets = [0, 32], sizes = [1, 32], strides = [1, 1]} : vector<1x96xf32> to vector<1x32xf32>
    %619 = vector.extract_strided_slice %614 {offsets = [0, 64], sizes = [1, 32], strides = [1, 1]} : vector<1x96xf32> to vector<1x32xf32>
    %620 = arith.mulf %618, %599 : vector<1x32xf32>
    %621 = arith.mulf %617, %616 : vector<1x32xf32>
    %622 = arith.addf %620, %621 : vector<1x32xf32>
    %623 = math.tanh %622 : vector<1x32xf32>
    %624 = arith.mulf %619, %623 : vector<1x32xf32>
    %625 = vector.extract_strided_slice %482 {offsets = [6, 0], sizes = [1, 128], strides = [1, 1]} : vector<8x128xf32> to vector<1x128xf32>
    %626 = vector.extract_strided_slice %482 {offsets = [1, 0], sizes = [1, 128], strides = [1, 1]} : vector<8x128xf32> to vector<1x128xf32>
    %627 = arith.select %18, %625, %626 : vector<1x128xi1>, vector<1x128xf32>
    %cst_187 = arith.constant dense<0.000000e+00> : vector<1x128xf32>
    %628 = tpu.matmul %624, %484, %cst_187 {dimension_numbers = #tpu.dot_dimension_numbers<[1], [0], [0], [1], [0, 0, 1, 1], [], []>} : vector<1x32xf32>, vector<32x128xf32>, vector<1x128xf32> -> vector<1x128xf32>
    %629 = arith.addf %627, %628 : vector<1x128xf32>
    %630 = vector.extract_strided_slice %629 {offsets = [0, 0], sizes = [1, 96], strides = [1, 1]} : vector<1x128xf32> to vector<1x96xf32>
    %cst_188 = arith.constant 5.000000e-01 : f32
    %631 = vector.broadcast %cst_188 : f32 to vector<1x96xf32>
    %632 = arith.mulf %631, %630 : vector<1x96xf32>
    %633 = math.tanh %632 : vector<1x96xf32>
    %cst_189 = arith.constant 5.000000e-01 : f32
    %634 = vector.broadcast %cst_189 : f32 to vector<1x96xf32>
    %635 = arith.mulf %634, %633 : vector<1x96xf32>
    %cst_190 = arith.constant 5.000000e-01 : f32
    %636 = vector.broadcast %cst_190 : f32 to vector<1x96xf32>
    %637 = arith.addf %635, %636 : vector<1x96xf32>
    %638 = vector.extract_strided_slice %629 {offsets = [0, 96], sizes = [1, 32], strides = [1, 1]} : vector<1x128xf32> to vector<1x32xf32>
    %639 = math.tanh %638 : vector<1x32xf32>
    %640 = vector.extract_strided_slice %637 {offsets = [0, 0], sizes = [1, 32], strides = [1, 1]} : vector<1x96xf32> to vector<1x32xf32>
    %641 = vector.extract_strided_slice %637 {offsets = [0, 32], sizes = [1, 32], strides = [1, 1]} : vector<1x96xf32> to vector<1x32xf32>
    %642 = vector.extract_strided_slice %637 {offsets = [0, 64], sizes = [1, 32], strides = [1, 1]} : vector<1x96xf32> to vector<1x32xf32>
    %643 = arith.mulf %641, %622 : vector<1x32xf32>
    %644 = arith.mulf %640, %639 : vector<1x32xf32>
    %645 = arith.addf %643, %644 : vector<1x32xf32>
    %646 = math.tanh %645 : vector<1x32xf32>
    %647 = arith.mulf %642, %646 : vector<1x32xf32>
    %648 = vector.extract_strided_slice %482 {offsets = [7, 0], sizes = [1, 128], strides = [1, 1]} : vector<8x128xf32> to vector<1x128xf32>
    %649 = vector.extract_strided_slice %482 {offsets = [0, 0], sizes = [1, 128], strides = [1, 1]} : vector<8x128xf32> to vector<1x128xf32>
    %650 = arith.select %18, %648, %649 : vector<1x128xi1>, vector<1x128xf32>
    %cst_191 = arith.constant dense<0.000000e+00> : vector<1x128xf32>
    %651 = tpu.matmul %647, %484, %cst_191 {dimension_numbers = #tpu.dot_dimension_numbers<[1], [0], [0], [1], [0, 0, 1, 1], [], []>} : vector<1x32xf32>, vector<32x128xf32>, vector<1x128xf32> -> vector<1x128xf32>
    %652 = arith.addf %650, %651 : vector<1x128xf32>
    %653 = vector.extract_strided_slice %652 {offsets = [0, 0], sizes = [1, 96], strides = [1, 1]} : vector<1x128xf32> to vector<1x96xf32>
    %cst_192 = arith.constant 5.000000e-01 : f32
    %654 = vector.broadcast %cst_192 : f32 to vector<1x96xf32>
    %655 = arith.mulf %654, %653 : vector<1x96xf32>
    %656 = math.tanh %655 : vector<1x96xf32>
    %cst_193 = arith.constant 5.000000e-01 : f32
    %657 = vector.broadcast %cst_193 : f32 to vector<1x96xf32>
    %658 = arith.mulf %657, %656 : vector<1x96xf32>
    %cst_194 = arith.constant 5.000000e-01 : f32
    %659 = vector.broadcast %cst_194 : f32 to vector<1x96xf32>
    %660 = arith.addf %658, %659 : vector<1x96xf32>
    %661 = vector.extract_strided_slice %652 {offsets = [0, 96], sizes = [1, 32], strides = [1, 1]} : vector<1x128xf32> to vector<1x32xf32>
    %662 = math.tanh %661 : vector<1x32xf32>
    %663 = vector.extract_strided_slice %660 {offsets = [0, 0], sizes = [1, 32], strides = [1, 1]} : vector<1x96xf32> to vector<1x32xf32>
    %664 = vector.extract_strided_slice %660 {offsets = [0, 32], sizes = [1, 32], strides = [1, 1]} : vector<1x96xf32> to vector<1x32xf32>
    %665 = vector.extract_strided_slice %660 {offsets = [0, 64], sizes = [1, 32], strides = [1, 1]} : vector<1x96xf32> to vector<1x32xf32>
    %666 = arith.mulf %664, %645 : vector<1x32xf32>
    %667 = arith.mulf %663, %662 : vector<1x32xf32>
    %668 = arith.addf %666, %667 : vector<1x32xf32>
    %669 = math.tanh %668 : vector<1x32xf32>
    %670 = arith.mulf %665, %669 : vector<1x32xf32>
    %671 = tpu.concatenate %242, %470, %670 in 1 : vector<1x32xf32>, vector<1x32xf32>, vector<1x32xf32> -> vector<1x96xf32>
    %c0_195 = arith.constant 0 : index
    %c0_196 = arith.constant 0 : index
    %672 = vector.load %arg4[%c0_195, %c0_196] : memref<96x24xf32, #tpu.memory_space<vmem>>, vector<96x24xf32>
    %cst_197 = arith.constant dense<0.000000e+00> : vector<1x24xf32>
    %673 = tpu.matmul %671, %672, %cst_197 {dimension_numbers = #tpu.dot_dimension_numbers<[1], [0], [0], [1], [0, 0, 1, 1], [], []>} : vector<1x96xf32>, vector<96x24xf32>, vector<1x24xf32> -> vector<1x24xf32>
    %c0_198 = arith.constant 0 : index
    %c0_199 = arith.constant 0 : index
    %674 = vector.load %arg5[%c0_198, %c0_199] : memref<1x24xf32, #tpu.memory_space<vmem>>, vector<1x24xf32>
    %675 = arith.addf %673, %674 : vector<1x24xf32>
    %676 = vector.extract_strided_slice %675 {offsets = [0, 0], sizes = [1, 18], strides = [1, 1]} : vector<1x24xf32> to vector<1x18xf32>
    %cst_200 = arith.constant dense<0xFF800000> : vector<1xf32>
    %677 = vector.multi_reduction <maximumf>, %676, %cst_200 [1] : vector<1x18xf32> to vector<1xf32>
    %678 = vector.shape_cast %677 : vector<1xf32> to vector<1x1xf32>
    %679 = vector.broadcast %678 : vector<1x1xf32> to vector<1x18xf32>
    %680 = arith.subf %676, %679 : vector<1x18xf32>
    %681 = math.exp %680 : vector<1x18xf32>
    %cst_201 = arith.constant dense<0.000000e+00> : vector<1xf32>
    %682 = vector.multi_reduction <add>, %681, %cst_201 [1] : vector<1x18xf32> to vector<1xf32>
    %683 = vector.shape_cast %682 : vector<1xf32> to vector<1x1xf32>
    %684 = vector.broadcast %683 : vector<1x1xf32> to vector<1x18xf32>
    %685 = arith.divf %681, %684 : vector<1x18xf32>
    %c0_202 = arith.constant 0 : index
    %c0_203 = arith.constant 0 : index
    %686 = vector.load %arg6[%c0_202, %c0_203] : memref<1x18xf32, #tpu.memory_space<vmem>>, vector<1x18xf32>
    tpu.vector_store %arg6[%c0_202, %c0_203], %685 {strides = array<i32>} : memref<1x18xf32, #tpu.memory_space<vmem>>, vector<1x18xf32>,
    %687 = vector.extract_strided_slice %675 {offsets = [0, 18], sizes = [1, 1], strides = [1, 1]} : vector<1x24xf32> to vector<1x1xf32>
    %c0_204 = arith.constant 0 : index
    %c0_205 = arith.constant 0 : index
    %688 = vector.load %arg7[%c0_204, %c0_205] : memref<1x1xf32, #tpu.memory_space<vmem>>, vector<1x1xf32>
    tpu.vector_store %arg7[%c0_204, %c0_205], %687 {strides = array<i32>} : memref<1x1xf32, #tpu.memory_space<vmem>>, vector<1x1xf32>,
    %689 = vector.extract_strided_slice %675 {offsets = [0, 19], sizes = [1, 5], strides = [1, 1]} : vector<1x24xf32> to vector<1x5xf32>
    %cst_206 = arith.constant dense<0xFF800000> : vector<1xf32>
    %690 = vector.multi_reduction <maximumf>, %689, %cst_206 [1] : vector<1x5xf32> to vector<1xf32>
    %691 = vector.shape_cast %690 : vector<1xf32> to vector<1x1xf32>
    %692 = vector.broadcast %691 : vector<1x1xf32> to vector<1x5xf32>
    %693 = arith.subf %689, %692 : vector<1x5xf32>
    %694 = math.exp %693 : vector<1x5xf32>
    %cst_207 = arith.constant dense<0.000000e+00> : vector<1xf32>
    %695 = vector.multi_reduction <add>, %694, %cst_207 [1] : vector<1x5xf32> to vector<1xf32>
    %696 = vector.shape_cast %695 : vector<1xf32> to vector<1x1xf32>
    %697 = vector.broadcast %696 : vector<1x1xf32> to vector<1x5xf32>
    %698 = arith.divf %694, %697 : vector<1x5xf32>
    %c0_208 = arith.constant 0 : index
    %c0_209 = arith.constant 0 : index
    %699 = vector.load %arg8[%c0_208, %c0_209] : memref<1x5xf32, #tpu.memory_space<vmem>>, vector<1x5xf32>
    tpu.vector_store %arg8[%c0_208, %c0_209], %698 {strides = array<i32>} : memref<1x5xf32, #tpu.memory_space<vmem>>, vector<1x5xf32>,
    return
  }
}

</mosaic_0001>

<bundles_post_ra>
// kernel: fix_predictor.1
= control target key start
LH: loop header
LB: loop body
LE: loop exit
PB: predicated region body
PF: predicated region fallthrough
CT: control target
= control target key end

     0   :  { %14 = vsyncpa [#allocation4], 0  ;;  %s2581_s0 = inlined_call_operand.vmem [shape: f32[8,32], index: 0, kind: input, shape index: {}]   ;;  %s2582_s1 = inlined_call_operand.vmem [shape: f32[3,32,128], index: 1, kind: input, shape index: {}]   ;;  %s2583_s2 = inlined_call_operand.hbm [shape: f32[3,32,128], index: 2, kind: input, shape index: {}]   ;;  %s2584_s3 = inlined_call_operand.vmem [shape: f32[3,1,128], index: 3, kind: input, shape index: {}]   ;;  %s2585_s4 = inlined_call_operand.vmem [shape: f32[96,24], index: 4, kind: input, shape index: {}]   ;;  %s2586_s5 = inlined_call_operand.vmem [shape: f32[1,24], index: 5, kind: input, shape index: {}]   ;;  %s2587_s6 = inlined_call_operand.hbm [shape: f32[1,18], index: 6, kind: output, shape index: {0}]   ;;  %s2588_s7 = inlined_call_operand.hbm [shape: f32[1,1], index: 7, kind: output, shape index: {1}]   ;;  %s2589_s8 = inlined_call_operand.hbm [shape: f32[1,5], index: 8, kind: output, shape index: {2}]  }
   0x1   :  { %15 = vsyncpa [#allocation5], 0 }
   0x2   :  { %16 = vsyncpa [#allocation8], 0  ;;  %s25_s29 = sshll.u32 %s2583_s2, 4  ;;  %s2054_s30 = smov [#allocation3]   ;;  %s26_s29 = int_to_ptr.hbm [resolvable:$true] %s25_s29 }
   0x3   :  { %s27_s9 = sshll.u32 %s2054_s30, 4  ;;  %s2055_s10 = smov 128   ;;  %s28_s9 = int_to_ptr.vmem [resolvable:$true] %s27_s9 }
   0x4   :  { %s2056_s11 = smov 8  }
   0x5   :  { %33 = dma.hbm_to_vmem [thread:$0]  %s26_s29, 1536, %s28_s9, [#allocation4], %s2055_s10, %s2055_s10, %s2056_s11  }
   0x6   :  { %2048 = dma.done.wait [#allocation4], 1536  }
   0x7   :  { %2049 = vsyncadd [#allocation4], 4294965760  ;;  %v63_v0 = vld [vmem:[%s2582_s1 + $0x18] sm:$0xff]  ;;  %v62_v1 = vld [vmem:[%s2582_s1 + $0x10] sm:$0xff]  ;;  %vm68_vm0 = vcmask 261120   ;;  %v2057_v9 = vmov 0.0   ;;  %v44_v10 = vlaneseq }
   0x8   :  { %84 = vmatpush.msra.mxu0 %v63_v0  ;;  %v2120_v2 = vld [vmem:[#allocation3 + $0x18] sm:$0xff]  ;;  %v61_v3 = vld [vmem:[%s2582_s1 + $0x8] sm:$0xff]  ;;  %v2126_v4 = vld [vmem:[#allocation3 + $0x10] sm:$0xff]  ;;  %s2058_s22 = smov 32   ;;  %s2059_s23 = smov 64   ;;  %vm150_vm2 = vcmask 122880  }
   0x9   :  { %115 = vmatpush.msra.mxu1 %v2120_v2  ;;  %171 = vmatpush.msra.mxu2 %v2120_v2  ;;  %v2129_v5 = vld [vmem:[#allocation3 + $0x8] sm:$0xff]  ;;  %v60_v6 = vld [vmem:[%s2582_s1] sm:$0xff]  ;;  %v2140_v8 = vld [vmem:[#allocation3] sm:$0xff]  ;;  %v45_v11 = vand.u32 127, %v44_v10  ;;  %vm152_vm3 = vcmask 254080   ;;  %vm212_vm4 = vcmask 123905  }
   0xa   :  { %85 = vmatpush.msra.mxu0 %v62_v1  ;;  %487 = vmatpush.msra.mxu3 %v2120_v2  ;;  %v59_v7 = vld [vmem:[%s2581_s0] sm:$0xff]  ;;  %vm214_vm5 = vcmask 255105   ;;  %vm277_vm6 = vcmask 124930   ;;  %vm279_vm7 = vcmask 256130   ;;  %vm466_vm8 = vcmask 128005   ;;  %s2063_s20 = smov [#allocation7]  }
   0xb   :  { %116 = vmatpush.msra.mxu1 %v2126_v4  ;;  %172 = vmatpush.msra.mxu2 %v2126_v4  ;;  %v1797_v12 = vld [vmem:[%s2584_s3] ss:$0 sm:$0xff]  ;;  %v50_v13 = vand.u32 31, %v45_v11  ;;  %vm468_vm9 = vcmask 259205   ;;  %vm342_vm10 = vcmask 125955   ;;  %vm344_vm11 = vcmask 257155  }
   0xc   :  { %86 = vmatpush.msra.mxu0 %v61_v3  ;;  %488 = vmatpush.msra.mxu3 %v2126_v4  ;;  %vm404_vm12 = vcmask 126980   ;;  %vm406_vm13 = vcmask 258180   ;;  %vm2591_vm14 = vcmask 129030   ;;  %vm2590_vm15 = vcmask 260230   ;;  %s1718_s0 = sshll.u32 %s2063_s20, 4  ;;  %s1720_s24 = sshll.u32 %s2588_s7, 4  ;;  %s1719_s0 = int_to_ptr.vmem [resolvable:$true] %s1718_s0  ;;  %s1721_s24 = int_to_ptr.hbm [resolvable:$true] %s1720_s24 }
   0xd   :  { %117 = vmatpush.msra.mxu1 %v2129_v5  ;;  %173 = vmatpush.msra.mxu2 %v2129_v5  ;;  %vm2172_vm1 = vcmp.lt.s32.totalorder %v50_v13, 16  ;;  %s1709_s27 = sshll.u32 %s2587_s6, 4  ;;  %s2064_s28 = smov [#allocation6]   ;;  %s1710_s27 = int_to_ptr.hbm [resolvable:$true] %s1709_s27 }
   0xe   :  { %87 = vmatpush.msra.mxu0 %v60_v6  ;;  %489 = vmatpush.msra.mxu3 %v2129_v5  ;;  %s1707_s29 = sshll.u32 %s2064_s28, 4  ;;  %s2065_s6 = smov [#allocation9]   ;;  %s1708_s29 = int_to_ptr.vmem [resolvable:$true] %s1707_s29 }
   0xf   :  { %1750 = vmatmul.msk.f32.vlgmr.msra.gmra.mxu0 %vm68_vm0, %v59_v7  ;;  %118 = vmatpush.msra.mxu1 %v2140_v8  ;;  %s1729_s7 = sshll.u32 %s2065_s6, 4  ;;  %s1731_s10 = sshll.u32 %s2589_s8, 4  ;;  %s1730_s7 = int_to_ptr.vmem [resolvable:$true] %s1729_s7  ;;  %s1732_s10 = int_to_ptr.hbm [resolvable:$true] %s1731_s10 }
  0x10   :  { %119 = vmatmul.f32.vlgmr.msra.gmra.mxu1 %v2057_v9  ;;  %174 = vmatpush.msra.mxu2 %v2140_v8 }
  0x11   :  { %236 = vmatpush.msrb.mxu0 %v2120_v2  ;;  %363 = vmatpush.msrb.mxu1 %v2120_v2 }
  0x12   :  { %425 = vmatpush.msrb.mxu2 %v2120_v2  ;;  %490 = vmatpush.msra.mxu3 %v2140_v8 }
  0x13   :  { %237 = vmatpush.msrb.mxu0 %v2126_v4  ;;  %364 = vmatpush.msrb.mxu1 %v2126_v4 }
  0x14   :  { %426 = vmatpush.msrb.mxu2 %v2126_v4 }
  0x15   :  { %238 = vmatpush.msrb.mxu0 %v2129_v5  ;;  %365 = vmatpush.msrb.mxu1 %v2129_v5 }
  0x16   :  { %427 = vmatpush.msrb.mxu2 %v2129_v5 }
  0x17   :  { %239 = vmatpush.msrb.mxu0 %v2140_v8  ;;  %366 = vmatpush.msrb.mxu1 %v2140_v8 }
  0x18   :  { %428 = vmatpush.msrb.mxu2 %v2140_v8 }
  0x19   :  { %301 = vmatpush.msra.mxu0 %v2120_v2 }
  0x1b   :  { %302 = vmatpush.msra.mxu0 %v2126_v4 }
  0x1d   :  { %303 = vmatpush.msra.mxu0 %v2129_v5 }
  0x1f   :  { %304 = vmatpush.msra.mxu0 %v2140_v8 }
  0x8c   :  { %v89_v14 = vpop.f32.mrf.mxu0 }
  0x8d   :  { %v2170_v15 = vadd.f32 %v1797_v12, %v89_v14  ;;  %v120_v18 = vpop.f32.mrf.mxu1 }
  0x8f   :  { %v97_v17 = vrot.slane %v2170_v15, 7  ;;  %v154_v35 = vrot.slane %v2170_v15, 5  ;;  %v216_v56 = vrot.slane %v2170_v15, 3  ;;  %v281_v14 = vrot.slane %v2170_v15, 1 }
  0x91   :  { %v2180_v19 = vsel %vm2172_vm1, %v2170_v15, %v97_v17  ;;  %v2194_v38 = vsel %vm2172_vm1, %v2170_v15, %v154_v35  ;;  %v2213_v59 = vsel %vm2172_vm1, %v2170_v15, %v216_v56 }
  0x92   :  { %v123_v20 = vadd.f32 %v120_v18, %v2180_v19 }
  0x94   :  { %1800 = vtanh.f32 %v123_v20  ;;  %v124_v22 = vmul.f32 0.5, %v123_v20  ;;  %v2228_v20 = vsel %vm2172_vm1, %v2170_v15, %v281_v14 }
  0x96   :  { %1802 = vtanh.f32 %v124_v22 }
  0x9a   :  { %v1801_v21 = vpop.eup %1800 }
  0x9b   :  { %131 = vrot.lane.b32.xlu0 %v1801_v21, %s2058_s22 }
  0x9c   :  { %v1803_v23 = vpop.eup %1802 }
  0x9d   :  { %v126_v24 = vmul.f32 0.5, %v1803_v23 }
  0x9f   :  { %v127_v25 = vadd.f32 0.5, %v126_v24 }
  0xa1   :  { %v129_v28 = vmul.f32 0.0, %v127_v25 }
 0x10d   :  { %v132_v26 = vpop.permute.xlu0 %131 }
 0x10e   :  { %v134_v27 = vmul.f32 %v132_v26, %v127_v25 }
 0x110   :  { %136 = vrot.lane.b32.xlu0 %v134_v27, %s2058_s22 }
 0x182   :  { %v137_v29 = vpop.permute.xlu0 %136 }
 0x183   :  { %v139_v30 = vadd.f32 %v137_v29, %v129_v28 }
 0x185   :  { %1804 = vtanh.f32 %v139_v30  ;;  %v189_v47 = vrot.slane %v139_v30, 7 }
 0x18b   :  { %v1805_v31 = vpop.eup %1804 }
 0x18c   :  { %142 = vrot.lane.b32.xlu1 %v1805_v31, %s2058_s22 }
 0x1fe   :  { %v143_v32 = vpop.permute.xlu1 %142 }
 0x1ff   :  { %v145_v33 = vmul.f32 %v143_v32, %v127_v25 }
 0x201   :  { %147 = vrot.lane.b32.xlu1 %v145_v33, %s2059_s23 }
 0x273   :  { %v148_v34 = vpop.permute.xlu1 %147 }
 0x274   :  { %151 = vst.msk [vmem:[#allocation2] sm:$0x1] %vm150_vm2, %v148_v34  ;;  %1751 = vmatmul.msk.f32.vlgmr.msra.gmra.mxu2 %vm68_vm0, %v148_v34 }
 0x275   :  { %153 = vst.msk [vmem:[#allocation2 + $0x7] sm:$0x1] %vm152_vm3, %v148_v34 }
 0x2f7   :  { %v176_v36 = vpop.f32.mrf.mxu2 }
 0x2f8   :  { %v180_v37 = vrot.slane %v176_v36, 7 }
 0x2fa   :  { %v182_v39 = vadd.f32 %v180_v37, %v2194_v38 }
 0x2fc   :  { %1806 = vtanh.f32 %v182_v39  ;;  %v183_v41 = vmul.f32 0.5, %v182_v39 }
 0x2fe   :  { %1808 = vtanh.f32 %v183_v41 }
 0x302   :  { %v1807_v40 = vpop.eup %1806 }
 0x303   :  { %193 = vrot.lane.b32.xlu2 %v1807_v40, %s2058_s22 }
 0x304   :  { %v1809_v42 = vpop.eup %1808 }
 0x305   :  { %v185_v43 = vmul.f32 0.5, %v1809_v42 }
 0x307   :  { %v186_v44 = vadd.f32 0.5, %v185_v43 }
 0x309   :  { %v191_v48 = vmul.f32 %v189_v47, %v186_v44 }
 0x35d   :  { %v194_v45 = vpop.permute.xlu2 %193 }
 0x35e   :  { %v196_v46 = vmul.f32 %v194_v45, %v186_v44 }
 0x360   :  { %198 = vrot.lane.b32.xlu2 %v196_v46, %s2058_s22 }
 0x3ba   :  { %v199_v49 = vpop.permute.xlu2 %198 }
 0x3bb   :  { %v201_v50 = vadd.f32 %v199_v49, %v191_v48 }
 0x3bd   :  { %1810 = vtanh.f32 %v201_v50 }
 0x3c3   :  { %v1811_v51 = vpop.eup %1810 }
 0x3c4   :  { %204 = vrot.lane.b32.xlu0 %v1811_v51, %s2058_s22 }
 0x436   :  { %v205_v52 = vpop.permute.xlu0 %204 }
 0x437   :  { %v2200_v53 = vmul.f32 %v205_v52, %v186_v44 }
 0x439   :  { %v219_v54 = vrot.slane %v2200_v53, 1 }
 0x43b   :  { %220 = vrot.lane.b32.xlu1 %v219_v54, %s2059_s23 }
 0x4ad   :  { %v221_v55 = vpop.permute.xlu1 %220 }
 0x4ae   :  { %1752 = vmatmul.msk.f32.vlgmr.msrb.gmra.mxu0 %vm68_vm0, %v221_v55 }
 0x4af   :  { %549 = vmatpush.msrb.mxu0 %v2120_v2 }
 0x4b1   :  { %550 = vmatpush.msrb.mxu0 %v2126_v4  ;;  %v254_v4 = vrot.slane %v201_v50, 7 }
 0x4b3   :  { %551 = vmatpush.msrb.mxu0 %v2129_v5 }
 0x4b5   :  { %552 = vmatpush.msrb.mxu0 %v2140_v8 }
 0x52b   :  { %v241_v57 = vpop.f32.mrf.mxu0 }
 0x52c   :  { %v245_v58 = vrot.slane %v241_v57, 6 }
 0x52e   :  { %v247_v60 = vadd.f32 %v245_v58, %v2213_v59 }
 0x530   :  { %1812 = vtanh.f32 %v247_v60  ;;  %v248_v62 = vmul.f32 0.5, %v247_v60 }
 0x532   :  { %1814 = vtanh.f32 %v248_v62 }
 0x536   :  { %v1813_v61 = vpop.eup %1812 }
 0x537   :  { %258 = vrot.lane.b32.xlu2 %v1813_v61, %s2058_s22 }
 0x538   :  { %v1815_v63 = vpop.eup %1814 }
 0x539   :  { %v250_v0 = vmul.f32 0.5, %v1815_v63 }
 0x53b   :  { %v251_v1 = vadd.f32 0.5, %v250_v0 }
 0x53d   :  { %v256_v5 = vmul.f32 %v254_v4, %v251_v1 }
 0x591   :  { %v259_v2 = vpop.permute.xlu2 %258 }
 0x592   :  { %v261_v3 = vmul.f32 %v259_v2, %v251_v1 }
 0x594   :  { %263 = vrot.lane.b32.xlu0 %v261_v3, %s2058_s22 }
 0x606   :  { %v264_v6 = vpop.permute.xlu0 %263 }
 0x607   :  { %v266_v7 = vadd.f32 %v264_v6, %v256_v5 }
 0x609   :  { %1816 = vtanh.f32 %v266_v7  ;;  %v319_v29 = vrot.slane %v266_v7, 7 }
 0x60f   :  { %v1817_v8 = vpop.eup %1816 }
 0x610   :  { %269 = vrot.lane.b32.xlu1 %v1817_v8, %s2058_s22 }
 0x682   :  { %v270_v10 = vpop.permute.xlu1 %269 }
 0x683   :  { %v2219_v11 = vmul.f32 %v270_v10, %v251_v1 }
 0x685   :  { %v284_v12 = vrot.slane %v2219_v11, 2 }
 0x687   :  { %285 = vrot.lane.b32.xlu2 %v284_v12, %s2059_s23 }
 0x6e1   :  { %v286_v13 = vpop.permute.xlu2 %285 }
 0x6e2   :  { %1753 = vmatmul.msk.f32.vlgmr.msra.gmra.mxu0 %vm68_vm0, %v286_v13 }
 0x75f   :  { %v306_v17 = vpop.f32.mrf.mxu0 }
 0x760   :  { %v310_v18 = vrot.slane %v306_v17, 5 }
 0x762   :  { %v312_v21 = vadd.f32 %v310_v18, %v2228_v20 }
 0x764   :  { %1818 = vtanh.f32 %v312_v21  ;;  %v313_v23 = vmul.f32 0.5, %v312_v21 }
 0x766   :  { %1820 = vtanh.f32 %v313_v23 }
 0x76a   :  { %v1819_v22 = vpop.eup %1818 }
 0x76b   :  { %323 = vrot.lane.b32.xlu0 %v1819_v22, %s2058_s22 }
 0x76c   :  { %v1821_v24 = vpop.eup %1820 }
 0x76d   :  { %v315_v25 = vmul.f32 0.5, %v1821_v24 }
 0x76f   :  { %v316_v26 = vadd.f32 0.5, %v315_v25 }
 0x771   :  { %v321_v30 = vmul.f32 %v319_v29, %v316_v26 }
 0x7dd   :  { %v324_v27 = vpop.permute.xlu0 %323 }
 0x7de   :  { %v326_v28 = vmul.f32 %v324_v27, %v316_v26 }
 0x7e0   :  { %328 = vrot.lane.b32.xlu1 %v326_v28, %s2058_s22 }
 0x852   :  { %v329_v31 = vpop.permute.xlu1 %328 }
 0x853   :  { %v331_v15 = vadd.f32 %v329_v31, %v321_v30 }
 0x855   :  { %1822 = vtanh.f32 %v331_v15  ;;  %v381_v48 = vrot.slane %v331_v15, 7 }
 0x85b   :  { %v1823_v32 = vpop.eup %1822 }
 0x85c   :  { %334 = vrot.lane.b32.xlu2 %v1823_v32, %s2058_s22 }
 0x8b6   :  { %v335_v33 = vpop.permute.xlu2 %334 }
 0x8b7   :  { %v2234_v34 = vmul.f32 %v335_v33, %v316_v26 }
 0x8b9   :  { %v346_v35 = vrot.slane %v2234_v34, 3 }
 0x8bb   :  { %347 = vrot.lane.b32.xlu0 %v346_v35, %s2059_s23 }
 0x92d   :  { %v348_v36 = vpop.permute.xlu0 %347 }
 0x92e   :  { %1754 = vmatmul.msk.f32.vlgmr.msrb.gmra.mxu1 %vm68_vm0, %v348_v36 }
 0x9ab   :  { %v368_v37 = vpop.f32.mrf.mxu1 }
 0x9ac   :  { %v372_v39 = vrot.slane %v368_v37, 4 }
 0x9ae   :  { %v374_v40 = vadd.f32 %v372_v39, %v2180_v19 }
 0x9b0   :  { %1824 = vtanh.f32 %v374_v40  ;;  %v375_v42 = vmul.f32 0.5, %v374_v40 }
 0x9b2   :  { %1826 = vtanh.f32 %v375_v42 }
 0x9b6   :  { %v1825_v41 = vpop.eup %1824 }
 0x9b7   :  { %385 = vrot.lane.b32.xlu1 %v1825_v41, %s2058_s22 }
 0x9b8   :  { %v1827_v43 = vpop.eup %1826 }
 0x9b9   :  { %v377_v44 = vmul.f32 0.5, %v1827_v43 }
 0x9bb   :  { %v378_v45 = vadd.f32 0.5, %v377_v44 }
 0x9bd   :  { %v383_v49 = vmul.f32 %v381_v48, %v378_v45 }
 0xa29   :  { %v386_v46 = vpop.permute.xlu1 %385 }
 0xa2a   :  { %v388_v47 = vmul.f32 %v386_v46, %v378_v45 }
 0xa2c   :  { %390 = vrot.lane.b32.xlu2 %v388_v47, %s2058_s22 }
 0xa86   :  { %v391_v50 = vpop.permute.xlu2 %390 }
 0xa87   :  { %v393_v51 = vadd.f32 %v391_v50, %v383_v49 }
 0xa89   :  { %1828 = vtanh.f32 %v393_v51  ;;  %v443_v4 = vrot.slane %v393_v51, 7 }
 0xa8f   :  { %v1829_v52 = vpop.eup %1828 }
 0xa90   :  { %396 = vrot.lane.b32.xlu0 %v1829_v52, %s2058_s22  ;;  %v2280_v52 = vld [vmem:[#allocation3 + $0x38] sm:$0xff] }
 0xa91   :  { %649 = vmatpush.msra.mxu2 %v2280_v52  ;;  %703 = vmatpush.msrb.mxu3 %v2280_v52 }
 0xa92   :  { %766 = vmatpush.msra.mxu0 %v2280_v52 }
 0xb02   :  { %v397_v19 = vpop.permute.xlu0 %396 }
 0xb03   :  { %v2243_v54 = vmul.f32 %v397_v19, %v378_v45 }
 0xb05   :  { %v408_v55 = vrot.slane %v2243_v54, 4 }
 0xb07   :  { %409 = vrot.lane.b32.xlu1 %v408_v55, %s2059_s23 }
 0xb79   :  { %v410_v56 = vpop.permute.xlu1 %409 }
 0xb7a   :  { %1755 = vmatmul.msk.f32.vlgmr.msrb.gmra.mxu2 %vm68_vm0, %v410_v56 }
 0xbfd   :  { %v430_v57 = vpop.f32.mrf.mxu2 }
 0xbfe   :  { %v434_v58 = vrot.slane %v430_v57, 3  ;;  %v1761_v57 = vld [vmem:[%s2582_s1 + $0x38] sm:$0xff] }
 0xbff   :  { %620 = vmatpush.msra.mxu1 %v1761_v57 }
 0xc00   :  { %v436_v60 = vadd.f32 %v434_v58, %v2194_v38  ;;  %v631_v58 = vld [vmem:[#allocation3 + $0x30] sm:$0xff] }
 0xc01   :  { %650 = vmatpush.msra.mxu2 %v631_v58  ;;  %704 = vmatpush.msrb.mxu3 %v631_v58 }
 0xc02   :  { %1830 = vtanh.f32 %v436_v60  ;;  %v437_v62 = vmul.f32 0.5, %v436_v60  ;;  %v1760_v60 = vld [vmem:[%s2582_s1 + $0x30] sm:$0xff]  ;;  %767 = vmatpush.msra.mxu0 %v631_v58 }
 0xc03   :  { %621 = vmatpush.msra.mxu1 %v1760_v60 }
 0xc04   :  { %1832 = vtanh.f32 %v437_v62  ;;  %v1759_v62 = vld [vmem:[%s2582_s1 + $0x28] sm:$0xff] }
 0xc05   :  { %622 = vmatpush.msra.mxu1 %v1759_v62 }
 0xc08   :  { %v1831_v61 = vpop.eup %1830 }
 0xc09   :  { %447 = vrot.lane.b32.xlu2 %v1831_v61, %s2058_s22  ;;  %v630_v61 = vld [vmem:[#allocation3 + $0x28] sm:$0xff] }
 0xc0a   :  { %v1833_v63 = vpop.eup %1832  ;;  %651 = vmatpush.msra.mxu2 %v630_v61  ;;  %705 = vmatpush.msrb.mxu3 %v630_v61 }
 0xc0b   :  { %v439_v0 = vmul.f32 0.5, %v1833_v63  ;;  %v629_v63 = vld [vmem:[#allocation3 + $0x20] sm:$0xff]  ;;  %768 = vmatpush.msra.mxu0 %v630_v61 }
 0xc0c   :  { %652 = vmatpush.msra.mxu2 %v629_v63  ;;  %706 = vmatpush.msrb.mxu3 %v629_v63 }
 0xc0d   :  { %v440_v1 = vadd.f32 0.5, %v439_v0  ;;  %v1758_v0 = vld [vmem:[%s2582_s1 + $0x20] sm:$0xff]  ;;  %653 = vmatmul.f32.vlgmr.msra.gmra.mxu2 %v2057_v9  ;;  %769 = vmatpush.msra.mxu0 %v629_v63 }
 0xc0e   :  { %623 = vmatpush.msra.mxu1 %v1758_v0  ;;  %889 = vmatpush.msrb.mxu2 %v2280_v52 }
 0xc0f   :  { %v445_v5 = vmul.f32 %v443_v4, %v440_v1 }
 0xc10   :  { %829 = vmatpush.msrb.mxu1 %v2280_v52  ;;  %890 = vmatpush.msrb.mxu2 %v631_v58 }
 0xc12   :  { %830 = vmatpush.msrb.mxu1 %v631_v58  ;;  %891 = vmatpush.msrb.mxu2 %v630_v61 }
 0xc14   :  { %831 = vmatpush.msrb.mxu1 %v630_v61  ;;  %892 = vmatpush.msrb.mxu2 %v629_v63 }
 0xc16   :  { %832 = vmatpush.msrb.mxu1 %v629_v63 }
 0xc63   :  { %v448_v2 = vpop.permute.xlu2 %447 }
 0xc64   :  { %v450_v3 = vmul.f32 %v448_v2, %v440_v1 }
 0xc66   :  { %452 = vrot.lane.b32.xlu0 %v450_v3, %s2058_s22  ;;  %v1798_v3 = vld [vmem:[%s2584_s3 + $0x1] ss:$0 sm:$0xff] }
 0xcd8   :  { %v453_v6 = vpop.permute.xlu0 %452 }
 0xcd9   :  { %v455_v7 = vadd.f32 %v453_v6, %v445_v5 }
 0xcdb   :  { %1834 = vtanh.f32 %v455_v7  ;;  %v505_v28 = vrot.slane %v455_v7, 7  ;;  %v654_v7 = vpop.f32.mrf.mxu2 }
 0xce1   :  { %v1835_v8 = vpop.eup %1834 }
 0xce2   :  { %458 = vrot.lane.b32.xlu1 %v1835_v8, %s2058_s22 }
 0xd54   :  { %v459_v38 = vpop.permute.xlu1 %458 }
 0xd55   :  { %v461_v10 = vmul.f32 %v459_v38, %v440_v1 }
 0xd57   :  { %v470_v12 = vrot.slane %v461_v10, 5 }
 0xd59   :  { %471 = vrot.lane.b32.xlu2 %v470_v12, %s2059_s23 }
 0xdb3   :  { %v472_v13 = vpop.permute.xlu2 %471 }
 0xdb4   :  { %1756 = vmatmul.msk.f32.vlgmr.msra.gmra.mxu3 %vm68_vm0, %v472_v13 }
 0xdb5   :  { %949 = vmatpush.msra.mxu3 %v2280_v52 }
 0xdb7   :  { %950 = vmatpush.msra.mxu3 %v631_v58 }
 0xdb9   :  { %951 = vmatpush.msra.mxu3 %v630_v61 }
 0xdbb   :  { %952 = vmatpush.msra.mxu3 %v629_v63 }
 0xe37   :  { %v492_v14 = vpop.f32.mrf.mxu3 }
 0xe38   :  { %v496_v17 = vrot.slane %v492_v14, 2 }
 0xe3a   :  { %v498_v18 = vadd.f32 %v496_v17, %v2213_v59 }
 0xe3c   :  { %1836 = vtanh.f32 %v498_v18  ;;  %v499_v22 = vmul.f32 0.5, %v498_v18 }
 0xe3e   :  { %1838 = vtanh.f32 %v499_v22 }
 0xe42   :  { %v1837_v21 = vpop.eup %1836 }
 0xe43   :  { %509 = vrot.lane.b32.xlu0 %v1837_v21, %s2058_s22 }
 0xe44   :  { %v1839_v23 = vpop.eup %1838 }
 0xe45   :  { %v501_v24 = vmul.f32 0.5, %v1839_v23 }
 0xe47   :  { %v502_v25 = vadd.f32 0.5, %v501_v24 }
 0xe49   :  { %v507_v29 = vmul.f32 %v505_v28, %v502_v25 }
 0xeb5   :  { %v510_v26 = vpop.permute.xlu0 %509 }
 0xeb6   :  { %v512_v27 = vmul.f32 %v510_v26, %v502_v25 }
 0xeb8   :  { %514 = vrot.lane.b32.xlu1 %v512_v27, %s2058_s22 }
 0xf2a   :  { %v515_v30 = vpop.permute.xlu1 %514 }
 0xf2b   :  { %v517_v31 = vadd.f32 %v515_v30, %v507_v29 }
 0xf2d   :  { %1840 = vtanh.f32 %v517_v31 }
 0xf33   :  { %v1841_v15 = vpop.eup %1840 }
 0xf34   :  { %520 = vrot.lane.b32.xlu2 %v1841_v15, %s2058_s22 }
 0xf8e   :  { %v521_v59 = vpop.permute.xlu2 %520 }
 0xf8f   :  { %v523_v32 = vmul.f32 %v521_v59, %v502_v25 }
 0xf91   :  { %v532_v33 = vrot.slane %v523_v32, 6 }
 0xf93   :  { %533 = vrot.lane.b32.xlu0 %v532_v33, %s2059_s23 }
0x1005   :  { %v534_v35 = vpop.permute.xlu0 %533 }
0x1006   :  { %1757 = vmatmul.msk.f32.vlgmr.msrb.gmra.mxu0 %vm68_vm0, %v534_v35 }
0x1007   :  { %1009 = vmatpush.msrb.mxu0 %v2280_v52 }
0x1009   :  { %1010 = vmatpush.msrb.mxu0 %v631_v58 }
0x100b   :  { %1011 = vmatpush.msrb.mxu0 %v630_v61 }
0x100d   :  { %1012 = vmatpush.msrb.mxu0 %v629_v63 }
0x1083   :  { %v554_v36 = vpop.f32.mrf.mxu0 }
0x1084   :  { %v558_v37 = vrot.slane %v554_v36, 1 }
0x1086   :  { %v560_v39 = vadd.f32 %v558_v37, %v2228_v20 }
0x1088   :  { %1842 = vtanh.f32 %v560_v39  ;;  %v561_v41 = vmul.f32 0.5, %v560_v39 }
0x108a   :  { %1844 = vtanh.f32 %v561_v41 }
0x108e   :  { %v1843_v40 = vpop.eup %1842 }
0x108f   :  { %571 = vrot.lane.b32.xlu1 %v1843_v40, %s2058_s22 }
0x1090   :  { %v1845_v42 = vpop.eup %1844 }
0x1091   :  { %v563_v43 = vmul.f32 0.5, %v1845_v42 }
0x1093   :  { %v564_v44 = vadd.f32 0.5, %v563_v43 }
0x1097   :  { %209 = vrot.lane.b32.xlu1 %v2200_v53, %s2059_s23  ;;  %v567_v53 = vrot.slane %v517_v31, 7 }
0x1099   :  { %v569_v47 = vmul.f32 %v567_v53, %v564_v44 }
0x109f   :  { %401 = vrot.lane.b32.xlu1 %v2243_v54, %s2059_s23 }
0x1101   :  { %v572_v45 = vpop.permute.xlu1 %571 }
0x1102   :  { %v574_v46 = vmul.f32 %v572_v45, %v564_v44 }
0x1104   :  { %576 = vrot.lane.b32.xlu2 %v574_v46, %s2058_s22 }
0x1109   :  { %v210_v20 = vpop.permute.xlu1 %209 }
0x110a   :  { %213 = vst.msk [vmem:[#allocation2] sm:$0x2] %vm212_vm4, %v210_v20 }
0x110b   :  { %215 = vst.msk [vmem:[#allocation2 + $0x5] sm:$0x2] %vm214_vm5, %v210_v20 }
0x110c   :  { %274 = vrot.lane.b32.xlu2 %v2219_v11, %s2059_s23 }
0x1114   :  { %463 = vrot.lane.b32.xlu2 %v461_v10, %s2059_s23 }
0x115e   :  { %v577_v48 = vpop.permute.xlu2 %576 }
0x115f   :  { %v579_v49 = vadd.f32 %v577_v48, %v569_v47 }
0x1161   :  { %1846 = vtanh.f32 %v579_v49 }
0x1166   :  { %v275_v50 = vpop.permute.xlu2 %274 }
0x1167   :  { %v1847_v51 = vpop.eup %1846  ;;  %278 = vst.msk [vmem:[#allocation2] sm:$0x4] %vm277_vm6, %v275_v50 }
0x1168   :  { %280 = vst.msk [vmem:[#allocation2 + $0x3] sm:$0x4] %vm279_vm7, %v275_v50  ;;  %582 = vrot.lane.b32.xlu0 %v1847_v51, %s2058_s22 }
0x116e   :  { %v464_v11 = vpop.permute.xlu2 %463 }
0x116f   :  { %467 = vst.msk [vmem:[#allocation2] sm:$0x20] %vm466_vm8, %v464_v11 }
0x1170   :  { %469 = vst.msk [vmem:[#allocation2 - $0x3] sm:$0x20] %vm468_vm9, %v464_v11  ;;  %339 = vrot.lane.b32.xlu0 %v2234_v34, %s2059_s23  ;;  %v402_v34 = vpop.permute.xlu1 %401 }
0x1178   :  { %525 = vrot.lane.b32.xlu0 %v523_v32, %s2059_s23 }
0x11da   :  { %v583_v19 = vpop.permute.xlu0 %582 }
0x11db   :  { %v585_v54 = vmul.f32 %v583_v19, %v564_v44 }
0x11dd   :  { %587 = vrot.lane.b32.xlu1 %v585_v54, %s2059_s23 }
0x11e2   :  { %v340_v55 = vpop.permute.xlu0 %339 }
0x11e3   :  { %343 = vst.msk [vmem:[#allocation2] sm:$0x8] %vm342_vm10, %v340_v55 }
0x11e4   :  { %345 = vst.msk [vmem:[#allocation2 + $0x1] sm:$0x8] %vm344_vm11, %v340_v55 }
0x11e5   :  { %405 = vst.msk [vmem:[#allocation2] sm:$0x10] %vm404_vm12, %v402_v34 }
0x11e6   :  { %407 = vst.msk [vmem:[#allocation2 - $0x1] sm:$0x10] %vm406_vm13, %v402_v34 }
0x11ea   :  { %v526_v56 = vpop.permute.xlu0 %525 }
0x11eb   :  { %529 = vst.msk [vmem:[#allocation2] sm:$0x40] %vm2591_vm14, %v526_v56  ;;  %vm592_vm14 = vcmask 261255  }
0x11ec   :  { %531 = vst.msk [vmem:[#allocation2 - $0x5] sm:$0x40] %vm2590_vm15, %v526_v56  ;;  %vm590_vm15 = vcmask 130055  }
0x124f   :  { %v2309_v1 = vpop.permute.xlu1 %587 }
0x1250   :  { %591 = vst.msk [vmem:[#allocation2] sm:$0x80] %vm590_vm15, %v2309_v1 }
0x1251   :  { %593 = vst.msk [vmem:[#allocation2 - $0x7] sm:$0x80] %vm592_vm14, %v2309_v1 }
0x1258   :  { %v594_v2 = vld [vmem:[#allocation2] sm:$0xff] }
0x1259   :  { %1763 = vmatmul.msk.f32.vlgmr.msra.gmra.mxu1 %vm68_vm0, %v594_v2 }
0x125a   :  { %1069 = vmatpush.msra.mxu1 %v2280_v52 }
0x125c   :  { %1070 = vmatpush.msra.mxu1 %v631_v58 }
0x125e   :  { %1071 = vmatpush.msra.mxu1 %v630_v61 }
0x1260   :  { %1072 = vmatpush.msra.mxu1 %v629_v63 }
0x12d6   :  { %v625_v4 = vpop.f32.mrf.mxu1 }
0x12d7   :  { %v2320_v5 = vadd.f32 %v1798_v3, %v625_v4 }
0x12d9   :  { %v634_v6 = vrot.slane %v2320_v5, 7  ;;  %v686_v29 = vrot.slane %v2320_v5, 5  ;;  %v746_v48 = vrot.slane %v2320_v5, 3 }
0x12db   :  { %v2326_v8 = vsel %vm2172_vm1, %v2320_v5, %v634_v6  ;;  %v2340_v15 = vsel %vm2172_vm1, %v2320_v5, %v686_v29  ;;  %v2355_v51 = vsel %vm2172_vm1, %v2320_v5, %v746_v48  ;;  %v809_v6 = vrot.slane %v2320_v5, 1 }
0x12dc   :  { %v657_v38 = vadd.f32 %v654_v7, %v2326_v8 }
0x12de   :  { %1848 = vtanh.f32 %v657_v38  ;;  %v658_v12 = vmul.f32 0.5, %v657_v38 }
0x12e0   :  { %1850 = vtanh.f32 %v658_v12 }
0x12e4   :  { %v1849_v10 = vpop.eup %1848 }
0x12e5   :  { %665 = vrot.lane.b32.xlu2 %v1849_v10, %s2058_s22  ;;  %v2370_v10 = vsel %vm2172_vm1, %v2320_v5, %v809_v6 }
0x12e6   :  { %v1851_v13 = vpop.eup %1850 }
0x12e7   :  { %v660_v14 = vmul.f32 0.5, %v1851_v13 }
0x12e9   :  { %v661_v17 = vadd.f32 0.5, %v660_v14 }
0x12eb   :  { %v663_v22 = vmul.f32 0.0, %v661_v17 }
0x133f   :  { %v666_v18 = vpop.permute.xlu2 %665 }
0x1340   :  { %v668_v21 = vmul.f32 %v666_v18, %v661_v17 }
0x1342   :  { %670 = vrot.lane.b32.xlu0 %v668_v21, %s2058_s22 }
0x13b4   :  { %v671_v23 = vpop.permute.xlu0 %670 }
0x13b5   :  { %v673_v24 = vadd.f32 %v671_v23, %v663_v22 }
0x13b7   :  { %1852 = vtanh.f32 %v673_v24  ;;  %v721_v41 = vrot.slane %v673_v24, 7 }
0x13bd   :  { %v1853_v25 = vpop.eup %1852 }
0x13be   :  { %676 = vrot.lane.b32.xlu1 %v1853_v25, %s2058_s22 }
0x1430   :  { %v677_v26 = vpop.permute.xlu1 %676 }
0x1431   :  { %v679_v27 = vmul.f32 %v677_v26, %v661_v17 }
0x1433   :  { %681 = vrot.lane.b32.xlu2 %v679_v27, %s2059_s23 }
0x148d   :  { %v682_v28 = vpop.permute.xlu2 %681 }
0x148e   :  { %684 = vst.msk [vmem:[#allocation2] sm:$0x1] %vm150_vm2, %v682_v28  ;;  %1764 = vmatmul.msk.f32.vlgmr.msrb.gmra.mxu3 %vm68_vm0, %v682_v28  ;;  %vm2594_vm2 = vcmask 129030  }
0x148f   :  { %685 = vst.msk [vmem:[#allocation2 + $0x7] sm:$0x1] %vm152_vm3, %v682_v28  ;;  %vm2595_vm3 = vcmask 260230  }
0x1511   :  { %v708_v30 = vpop.f32.mrf.mxu3 }
0x1512   :  { %v712_v31 = vrot.slane %v708_v30, 7 }
0x1514   :  { %v714_v59 = vadd.f32 %v712_v31, %v2340_v15 }
0x1516   :  { %1854 = vtanh.f32 %v714_v59  ;;  %v715_v33 = vmul.f32 0.5, %v714_v59 }
0x1518   :  { %1856 = vtanh.f32 %v715_v33 }
0x151c   :  { %v1855_v32 = vpop.eup %1854 }
0x151d   :  { %725 = vrot.lane.b32.xlu0 %v1855_v32, %s2058_s22 }
0x151e   :  { %v1857_v35 = vpop.eup %1856 }
0x151f   :  { %v717_v36 = vmul.f32 0.5, %v1857_v35 }
0x1521   :  { %v718_v37 = vadd.f32 0.5, %v717_v36 }
0x1523   :  { %v723_v42 = vmul.f32 %v721_v41, %v718_v37 }
0x158f   :  { %v726_v39 = vpop.permute.xlu0 %725 }
0x1590   :  { %v728_v40 = vmul.f32 %v726_v39, %v718_v37 }
0x1592   :  { %730 = vrot.lane.b32.xlu1 %v728_v40, %s2058_s22 }
0x1604   :  { %v731_v43 = vpop.permute.xlu1 %730 }
0x1605   :  { %v733_v44 = vadd.f32 %v731_v43, %v723_v42 }
0x1607   :  { %1858 = vtanh.f32 %v733_v44  ;;  %v784_v58 = vrot.slane %v733_v44, 7 }
0x160d   :  { %v1859_v45 = vpop.eup %1858 }
0x160e   :  { %736 = vrot.lane.b32.xlu2 %v1859_v45, %s2058_s22 }
0x1668   :  { %v737_v46 = vpop.permute.xlu2 %736 }
0x1669   :  { %v2346_v20 = vmul.f32 %v737_v46, %v718_v37 }
0x166b   :  { %v749_v53 = vrot.slane %v2346_v20, 1 }
0x166d   :  { %750 = vrot.lane.b32.xlu0 %v749_v53, %s2059_s23 }
0x16df   :  { %v751_v47 = vpop.permute.xlu0 %750 }
0x16e0   :  { %1765 = vmatmul.msk.f32.vlgmr.msra.gmra.mxu0 %vm68_vm0, %v751_v47 }
0x175d   :  { %v771_v49 = vpop.f32.mrf.mxu0 }
0x175e   :  { %v775_v50 = vrot.slane %v771_v49, 6 }
0x1760   :  { %v777_v11 = vadd.f32 %v775_v50, %v2355_v51 }
0x1762   :  { %1860 = vtanh.f32 %v777_v11  ;;  %v778_v19 = vmul.f32 0.5, %v777_v11 }
0x1764   :  { %1862 = vtanh.f32 %v778_v19 }
0x1768   :  { %v1861_v52 = vpop.eup %1860 }
0x1769   :  { %788 = vrot.lane.b32.xlu1 %v1861_v52, %s2058_s22 }
0x176a   :  { %v1863_v54 = vpop.eup %1862 }
0x176b   :  { %v780_v55 = vmul.f32 0.5, %v1863_v54 }
0x176d   :  { %v781_v34 = vadd.f32 0.5, %v780_v55 }
0x176f   :  { %v786_v60 = vmul.f32 %v784_v58, %v781_v34 }
0x17db   :  { %v789_v56 = vpop.permute.xlu1 %788 }
0x17dc   :  { %v791_v57 = vmul.f32 %v789_v56, %v781_v34 }
0x17de   :  { %793 = vrot.lane.b32.xlu2 %v791_v57, %s2058_s22 }
0x1838   :  { %v794_v61 = vpop.permute.xlu2 %793 }
0x1839   :  { %v796_v62 = vadd.f32 %v794_v61, %v786_v60 }
0x183b   :  { %1864 = vtanh.f32 %v796_v62  ;;  %v847_v24 = vrot.slane %v796_v62, 7 }
0x1841   :  { %v1865_v63 = vpop.eup %1864 }
0x1842   :  { %799 = vrot.lane.b32.xlu0 %v1865_v63, %s2058_s22 }
0x18b4   :  { %v800_v0 = vpop.permute.xlu0 %799 }
0x18b5   :  { %v2361_v2 = vmul.f32 %v800_v0, %v781_v34 }
0x18b7   :  { %v812_v3 = vrot.slane %v2361_v2, 2 }
0x18b9   :  { %813 = vrot.lane.b32.xlu1 %v812_v3, %s2059_s23 }
0x192b   :  { %v814_v4 = vpop.permute.xlu1 %813 }
0x192c   :  { %1766 = vmatmul.msk.f32.vlgmr.msrb.gmra.mxu1 %vm68_vm0, %v814_v4 }
0x19a9   :  { %v834_v7 = vpop.f32.mrf.mxu1 }
0x19aa   :  { %v838_v38 = vrot.slane %v834_v7, 5 }
0x19ac   :  { %v840_v12 = vadd.f32 %v838_v38, %v2370_v10 }
0x19ae   :  { %1866 = vtanh.f32 %v840_v12  ;;  %v841_v14 = vmul.f32 0.5, %v840_v12 }
0x19b0   :  { %1868 = vtanh.f32 %v841_v14 }
0x19b4   :  { %v1867_v13 = vpop.eup %1866 }
0x19b5   :  { %851 = vrot.lane.b32.xlu2 %v1867_v13, %s2058_s22 }
0x19b6   :  { %v1869_v17 = vpop.eup %1868 }
0x19b7   :  { %v843_v18 = vmul.f32 0.5, %v1869_v17 }
0x19b9   :  { %v844_v21 = vadd.f32 0.5, %v843_v18 }
0x19bb   :  { %v849_v25 = vmul.f32 %v847_v24, %v844_v21 }
0x1a0f   :  { %v852_v22 = vpop.permute.xlu2 %851 }
0x1a10   :  { %v854_v23 = vmul.f32 %v852_v22, %v844_v21 }
0x1a12   :  { %856 = vrot.lane.b32.xlu0 %v854_v23, %s2058_s22 }
0x1a84   :  { %v857_v26 = vpop.permute.xlu0 %856 }
0x1a85   :  { %v859_v5 = vadd.f32 %v857_v26, %v849_v25 }
0x1a87   :  { %1870 = vtanh.f32 %v859_v5  ;;  %v907_v43 = vrot.slane %v859_v5, 7 }
0x1a8d   :  { %v1871_v27 = vpop.eup %1870 }
0x1a8e   :  { %862 = vrot.lane.b32.xlu1 %v1871_v27, %s2058_s22 }
0x1b00   :  { %v863_v28 = vpop.permute.xlu1 %862 }
0x1b01   :  { %v2376_v29 = vmul.f32 %v863_v28, %v844_v21 }
0x1b03   :  { %v872_v30 = vrot.slane %v2376_v29, 3 }
0x1b05   :  { %873 = vrot.lane.b32.xlu2 %v872_v30, %s2059_s23 }
0x1b5f   :  { %v874_v31 = vpop.permute.xlu2 %873 }
0x1b60   :  { %1767 = vmatmul.msk.f32.vlgmr.msrb.gmra.mxu2 %vm68_vm0, %v874_v31 }
0x1be3   :  { %v894_v59 = vpop.f32.mrf.mxu2 }
0x1be4   :  { %v898_v32 = vrot.slane %v894_v59, 4 }
0x1be6   :  { %v900_v33 = vadd.f32 %v898_v32, %v2326_v8 }
0x1be8   :  { %1872 = vtanh.f32 %v900_v33  ;;  %v901_v36 = vmul.f32 0.5, %v900_v33 }
0x1bea   :  { %1874 = vtanh.f32 %v901_v36 }
0x1bee   :  { %v1873_v35 = vpop.eup %1872 }
0x1bef   :  { %911 = vrot.lane.b32.xlu0 %v1873_v35, %s2058_s22 }
0x1bf0   :  { %v1875_v37 = vpop.eup %1874 }
0x1bf1   :  { %v903_v39 = vmul.f32 0.5, %v1875_v37 }
0x1bf3   :  { %v904_v40 = vadd.f32 0.5, %v903_v39 }
0x1bf5   :  { %v909_v44 = vmul.f32 %v907_v43, %v904_v40 }
0x1c61   :  { %v912_v41 = vpop.permute.xlu0 %911 }
0x1c62   :  { %v914_v42 = vmul.f32 %v912_v41, %v904_v40 }
0x1c64   :  { %916 = vrot.lane.b32.xlu1 %v914_v42, %s2058_s22 }
0x1cd6   :  { %v917_v45 = vpop.permute.xlu1 %916 }
0x1cd7   :  { %v919_v46 = vadd.f32 %v917_v45, %v909_v44 }
0x1cd9   :  { %1876 = vtanh.f32 %v919_v46  ;;  %v967_v60 = vrot.slane %v919_v46, 7 }
0x1cdf   :  { %v1877_v53 = vpop.eup %1876 }
0x1ce0   :  { %922 = vrot.lane.b32.xlu2 %v1877_v53, %s2058_s22 }
0x1d3a   :  { %v923_v8 = vpop.permute.xlu2 %922 }
0x1d3b   :  { %v2385_v47 = vmul.f32 %v923_v8, %v904_v40 }
0x1d3d   :  { %v932_v48 = vrot.slane %v2385_v47, 4 }
0x1d3f   :  { %933 = vrot.lane.b32.xlu0 %v932_v48, %s2059_s23 }
0x1db1   :  { %v934_v49 = vpop.permute.xlu0 %933 }
0x1db2   :  { %1768 = vmatmul.msk.f32.vlgmr.msra.gmra.mxu3 %vm68_vm0, %v934_v49 }
0x1e35   :  { %v954_v50 = vpop.f32.mrf.mxu3 }
0x1e36   :  { %v958_v11 = vrot.slane %v954_v50, 3 }
0x1e38   :  { %v960_v52 = vadd.f32 %v958_v11, %v2340_v15  ;;  %v1773_v11 = vld [vmem:[%s2582_s1 + $0x50] sm:$0xff] }
0x1e3a   :  { %1878 = vtanh.f32 %v960_v52  ;;  %v961_v54 = vmul.f32 0.5, %v960_v52  ;;  %v1150_v52 = vld [vmem:[#allocation3 + $0x58] sm:$0xff] }
0x1e3b   :  { %1167 = vmatpush.msrb.mxu3 %v1150_v52  ;;  %1218 = vmatpush.msra.mxu0 %v1150_v52 }
0x1e3c   :  { %1880 = vtanh.f32 %v961_v54  ;;  %v1772_v54 = vld [vmem:[%s2582_s1 + $0x48] sm:$0xff]  ;;  %1276 = vmatpush.msrb.mxu1 %v1150_v52 }
0x1e40   :  { %v1879_v19 = vpop.eup %1878 }
0x1e41   :  { %971 = vrot.lane.b32.xlu1 %v1879_v19, %s2058_s22  ;;  %v1149_v19 = vld [vmem:[#allocation3 + $0x50] sm:$0xff] }
0x1e42   :  { %v1881_v55 = vpop.eup %1880  ;;  %1168 = vmatpush.msrb.mxu3 %v1149_v19  ;;  %1219 = vmatpush.msra.mxu0 %v1149_v19 }
0x1e43   :  { %v963_v34 = vmul.f32 0.5, %v1881_v55  ;;  %v1771_v55 = vld [vmem:[%s2582_s1 + $0x40] sm:$0xff]  ;;  %1277 = vmatpush.msrb.mxu1 %v1149_v19 }
0x1e45   :  { %v964_v56 = vadd.f32 0.5, %v963_v34  ;;  %v1148_v34 = vld [vmem:[#allocation3 + $0x48] sm:$0xff] }
0x1e46   :  { %1169 = vmatpush.msrb.mxu3 %v1148_v34  ;;  %1220 = vmatpush.msra.mxu0 %v1148_v34 }
0x1e47   :  { %v969_v61 = vmul.f32 %v967_v60, %v964_v56  ;;  %1278 = vmatpush.msrb.mxu1 %v1148_v34 }
0x1eb3   :  { %v972_v57 = vpop.permute.xlu1 %971 }
0x1eb4   :  { %v974_v58 = vmul.f32 %v972_v57, %v964_v56 }
0x1eb6   :  { %976 = vrot.lane.b32.xlu2 %v974_v58, %s2058_s22  ;;  %v1799_v58 = vld [vmem:[%s2584_s3 + $0x2] ss:$0 sm:$0xff]  ;;  %s2060_s3 = smov 96  }
0x1f10   :  { %v977_v62 = vpop.permute.xlu2 %976 }
0x1f11   :  { %v979_v63 = vadd.f32 %v977_v62, %v969_v61 }
0x1f13   :  { %1882 = vtanh.f32 %v979_v63  ;;  %v1027_v24 = vrot.slane %v979_v63, 7 }
0x1f19   :  { %v1883_v0 = vpop.eup %1882 }
0x1f1a   :  { %982 = vrot.lane.b32.xlu0 %v1883_v0, %s2058_s22 }
0x1f8c   :  { %v983_v15 = vpop.permute.xlu0 %982 }
0x1f8d   :  { %v985_v3 = vmul.f32 %v983_v15, %v964_v56  ;;  %v1147_v56 = vld [vmem:[#allocation3 + $0x40] sm:$0xff] }
0x1f8e   :  { %1170 = vmatpush.msrb.mxu3 %v1147_v56  ;;  %1221 = vmatpush.msra.mxu0 %v1147_v56 }
0x1f8f   :  { %v992_v4 = vrot.slane %v985_v3, 5  ;;  %1171 = vmatmul.f32.vlgmr.msrb.gmra.mxu3 %v2057_v9  ;;  %1279 = vmatpush.msrb.mxu1 %v1147_v56 }
0x1f90   :  { %1389 = vmatpush.msra.mxu3 %v1150_v52 }
0x1f91   :  { %993 = vrot.lane.b32.xlu1 %v992_v4, %s2059_s23 }
0x1f92   :  { %1390 = vmatpush.msra.mxu3 %v1149_v19 }
0x1f94   :  { %1391 = vmatpush.msra.mxu3 %v1148_v34 }
0x1f96   :  { %1392 = vmatpush.msra.mxu3 %v1147_v56 }
0x2003   :  { %v994_v6 = vpop.permute.xlu1 %993 }
0x2004   :  { %1769 = vmatmul.msk.f32.vlgmr.msrb.gmra.mxu0 %vm68_vm0, %v994_v6 }
0x2005   :  { %1444 = vmatpush.msrb.mxu0 %v1150_v52 }
0x2007   :  { %1445 = vmatpush.msrb.mxu0 %v1149_v19 }
0x2009   :  { %1446 = vmatpush.msrb.mxu0 %v1148_v34 }
0x200b   :  { %1447 = vmatpush.msrb.mxu0 %v1147_v56 }
0x2012   :  { %v1172_v63 = vpop.f32.mrf.mxu3 }
0x2081   :  { %v1014_v7 = vpop.f32.mrf.mxu0 }
0x2082   :  { %v1018_v38 = vrot.slane %v1014_v7, 2 }
0x2084   :  { %v1020_v12 = vadd.f32 %v1018_v38, %v2355_v51 }
0x2086   :  { %1884 = vtanh.f32 %v1020_v12  ;;  %v1021_v14 = vmul.f32 0.5, %v1020_v12 }
0x2088   :  { %1886 = vtanh.f32 %v1021_v14 }
0x208c   :  { %v1885_v13 = vpop.eup %1884 }
0x208d   :  { %1031 = vrot.lane.b32.xlu2 %v1885_v13, %s2058_s22 }
0x208e   :  { %v1887_v17 = vpop.eup %1886 }
0x208f   :  { %v1023_v18 = vmul.f32 0.5, %v1887_v17 }
0x2091   :  { %v1024_v21 = vadd.f32 0.5, %v1023_v18 }
0x2093   :  { %v1029_v25 = vmul.f32 %v1027_v24, %v1024_v21 }
0x20e7   :  { %v1032_v22 = vpop.permute.xlu2 %1031 }
0x20e8   :  { %v1034_v23 = vmul.f32 %v1032_v22, %v1024_v21 }
0x20ea   :  { %1036 = vrot.lane.b32.xlu0 %v1034_v23, %s2058_s22 }
0x215c   :  { %v1037_v26 = vpop.permute.xlu0 %1036 }
0x215d   :  { %v1039_v5 = vadd.f32 %v1037_v26, %v1029_v25 }
0x215f   :  { %1888 = vtanh.f32 %v1039_v5 }
0x2165   :  { %v1889_v27 = vpop.eup %1888 }
0x2166   :  { %1042 = vrot.lane.b32.xlu1 %v1889_v27, %s2058_s22 }
0x21d8   :  { %v1043_v51 = vpop.permute.xlu1 %1042 }
0x21d9   :  { %v1045_v28 = vmul.f32 %v1043_v51, %v1024_v21 }
0x21db   :  { %v1052_v30 = vrot.slane %v1045_v28, 6 }
0x21dd   :  { %1053 = vrot.lane.b32.xlu2 %v1052_v30, %s2059_s23 }
0x2237   :  { %v1054_v31 = vpop.permute.xlu2 %1053 }
0x2238   :  { %1770 = vmatmul.msk.f32.vlgmr.msra.gmra.mxu1 %vm68_vm0, %v1054_v31 }
0x2239   :  { %1499 = vmatpush.msra.mxu1 %v1150_v52 }
0x223b   :  { %1500 = vmatpush.msra.mxu1 %v1149_v19 }
0x223d   :  { %1501 = vmatpush.msra.mxu1 %v1148_v34 }
0x223f   :  { %1502 = vmatpush.msra.mxu1 %v1147_v56 }
0x22b5   :  { %v1074_v59 = vpop.f32.mrf.mxu1 }
0x22b6   :  { %v1078_v32 = vrot.slane %v1074_v59, 1 }
0x22b8   :  { %v1080_v33 = vadd.f32 %v1078_v32, %v2370_v10 }
0x22ba   :  { %1890 = vtanh.f32 %v1080_v33  ;;  %v1081_v36 = vmul.f32 0.5, %v1080_v33 }
0x22bc   :  { %1892 = vtanh.f32 %v1081_v36 }
0x22c0   :  { %v1891_v35 = vpop.eup %1890 }
0x22c1   :  { %1091 = vrot.lane.b32.xlu0 %v1891_v35, %s2058_s22 }
0x22c2   :  { %v1893_v37 = vpop.eup %1892 }
0x22c3   :  { %v1083_v39 = vmul.f32 0.5, %v1893_v37 }
0x22c5   :  { %v1084_v40 = vadd.f32 0.5, %v1083_v39 }
0x22c9   :  { %741 = vrot.lane.b32.xlu0 %v2346_v20, %s2059_s23  ;;  %v1087_v20 = vrot.slane %v1039_v5, 7 }
0x22cb   :  { %v1089_v43 = vmul.f32 %v1087_v20, %v1084_v40 }
0x22d1   :  { %927 = vrot.lane.b32.xlu0 %v2385_v47, %s2059_s23 }
0x2333   :  { %v1092_v41 = vpop.permute.xlu0 %1091 }
0x2334   :  { %v1094_v42 = vmul.f32 %v1092_v41, %v1084_v40 }
0x2336   :  { %1096 = vrot.lane.b32.xlu1 %v1094_v42, %s2058_s22 }
0x233b   :  { %v742_v10 = vpop.permute.xlu0 %741 }
0x233c   :  { %744 = vst.msk [vmem:[#allocation2] sm:$0x2] %vm212_vm4, %v742_v10  ;;  %vm1612_vm4 = vcmask 785408  }
0x233d   :  { %745 = vst.msk [vmem:[#allocation2 + $0x5] sm:$0x2] %vm214_vm5, %v742_v10  ;;  %vm1667_vm5 = vcmask 188568  }
0x233e   :  { %804 = vrot.lane.b32.xlu1 %v2361_v2, %s2059_s23 }
0x2343   :  { %v928_v49 = vpop.permute.xlu0 %927 }
0x2346   :  { %987 = vrot.lane.b32.xlu1 %v985_v3, %s2059_s23 }
0x23a8   :  { %v1097_v44 = vpop.permute.xlu1 %1096 }
0x23a9   :  { %v1099_v45 = vadd.f32 %v1097_v44, %v1089_v43 }
0x23ab   :  { %1894 = vtanh.f32 %v1099_v45 }
0x23b0   :  { %v805_v46 = vpop.permute.xlu1 %804 }
0x23b1   :  { %v1895_v53 = vpop.eup %1894  ;;  %807 = vst.msk [vmem:[#allocation2] sm:$0x4] %vm277_vm6, %v805_v46  ;;  %vm1635_vm6 = vcmask 139264  }
0x23b2   :  { %808 = vst.msk [vmem:[#allocation2 + $0x3] sm:$0x4] %vm279_vm7, %v805_v46  ;;  %1102 = vrot.lane.b32.xlu2 %v1895_v53, %s2058_s22  ;;  %vm1678_vm7 = vcmask 32768  }
0x23b8   :  { %v988_v8 = vpop.permute.xlu1 %987 }
0x23b9   :  { %990 = vst.msk [vmem:[#allocation2] sm:$0x20] %vm466_vm8, %v988_v8 }
0x23ba   :  { %991 = vst.msk [vmem:[#allocation2 - $0x3] sm:$0x20] %vm468_vm9, %v988_v8  ;;  %867 = vrot.lane.b32.xlu2 %v2376_v29, %s2059_s23  ;;  %v1774_v29 = vld [vmem:[%s2582_s1 + $0x58] sm:$0xff] }
0x23bb   :  { %1138 = vmatpush.msra.mxu2 %v1774_v29 }
0x23bd   :  { %1139 = vmatpush.msra.mxu2 %v1773_v11 }
0x23bf   :  { %1140 = vmatpush.msra.mxu2 %v1772_v54 }
0x23c1   :  { %1141 = vmatpush.msra.mxu2 %v1771_v55 }
0x23c2   :  { %1047 = vrot.lane.b32.xlu2 %v1045_v28, %s2059_s23 }
0x23c3   :  { %1334 = vmatpush.msrb.mxu2 %v1150_v52 }
0x23c5   :  { %1335 = vmatpush.msrb.mxu2 %v1149_v19 }
0x23c7   :  { %1336 = vmatpush.msrb.mxu2 %v1148_v34 }
0x23c9   :  { %1337 = vmatpush.msrb.mxu2 %v1147_v56 }
0x240c   :  { %v1103_v2 = vpop.permute.xlu2 %1102 }
0x240d   :  { %v2422_v47 = vmul.f32 %v1103_v2, %v1084_v40 }
0x240f   :  { %1107 = vrot.lane.b32.xlu0 %v2422_v47, %s2059_s23 }
0x2414   :  { %v868_v48 = vpop.permute.xlu2 %867 }
0x2415   :  { %870 = vst.msk [vmem:[#allocation2] sm:$0x8] %vm342_vm10, %v868_v48 }
0x2416   :  { %871 = vst.msk [vmem:[#allocation2 + $0x1] sm:$0x8] %vm344_vm11, %v868_v48 }
0x2417   :  { %930 = vst.msk [vmem:[#allocation2] sm:$0x10] %vm404_vm12, %v928_v49 }
0x2418   :  { %931 = vst.msk [vmem:[#allocation2 - $0x1] sm:$0x10] %vm406_vm13, %v928_v49 }
0x241c   :  { %v1048_v50 = vpop.permute.xlu2 %1047 }
0x241d   :  { %1050 = vst.msk [vmem:[#allocation2] sm:$0x40] %vm2594_vm2, %v1048_v50 }
0x241e   :  { %1051 = vst.msk [vmem:[#allocation2 - $0x5] sm:$0x40] %vm2595_vm3, %v1048_v50 }
0x2481   :  { %v1108_v57 = vpop.permute.xlu0 %1107 }
0x2482   :  { %1110 = vst.msk [vmem:[#allocation2] sm:$0x80] %vm590_vm15, %v1108_v57 }
0x2483   :  { %1111 = vst.msk [vmem:[#allocation2 - $0x7] sm:$0x80] %vm592_vm14, %v1108_v57 }
0x248a   :  { %v1112_v9 = vld [vmem:[#allocation2] sm:$0xff] }
0x248b   :  { %1776 = vmatmul.msk.f32.vlgmr.msra.gmra.mxu2 %vm68_vm0, %v1112_v9 }
0x248c   :  { %1554 = vmatpush.msra.mxu2 %v1150_v52 }
0x248e   :  { %1555 = vmatpush.msra.mxu2 %v1149_v19 }
0x2490   :  { %1556 = vmatpush.msra.mxu2 %v1148_v34 }
0x2492   :  { %1557 = vmatpush.msra.mxu2 %v1147_v56 }
0x250e   :  { %v1143_v60 = vpop.f32.mrf.mxu2 }
0x250f   :  { %v2451_v61 = vadd.f32 %v1799_v58, %v1143_v60 }
0x2511   :  { %v1152_v62 = vrot.slane %v2451_v61, 7  ;;  %v1198_v25 = vrot.slane %v2451_v61, 5  ;;  %v1255_v44 = vrot.slane %v2451_v61, 3 }
0x2513   :  { %v2457_v0 = vsel %vm2172_vm1, %v2451_v61, %v1152_v62  ;;  %v2469_v27 = vsel %vm2172_vm1, %v2451_v61, %v1198_v25  ;;  %v2481_v53 = vsel %vm2172_vm1, %v2451_v61, %v1255_v44  ;;  %v1313_v62 = vrot.slane %v2451_v61, 1 }
0x2514   :  { %v1175_v15 = vadd.f32 %v1172_v63, %v2457_v0 }
0x2516   :  { %1896 = vtanh.f32 %v1175_v15  ;;  %v1176_v4 = vmul.f32 0.5, %v1175_v15 }
0x2518   :  { %1898 = vtanh.f32 %v1176_v4 }
0x251c   :  { %v1897_v3 = vpop.eup %1896 }
0x251d   :  { %1183 = vrot.lane.b32.xlu1 %v1897_v3, %s2058_s22  ;;  %v2493_v3 = vsel %vm2172_vm1, %v2451_v61, %v1313_v62  ;;  %vm1595_vm1 = vcmask 523264  }
0x251e   :  { %v1899_v6 = vpop.eup %1898 }
0x251f   :  { %v1178_v7 = vmul.f32 0.5, %v1899_v6 }
0x2521   :  { %v1179_v38 = vadd.f32 0.5, %v1178_v7 }
0x2523   :  { %v1181_v14 = vmul.f32 0.0, %v1179_v38 }
0x258f   :  { %v1184_v12 = vpop.permute.xlu1 %1183 }
0x2590   :  { %v1186_v13 = vmul.f32 %v1184_v12, %v1179_v38 }
0x2592   :  { %1188 = vrot.lane.b32.xlu2 %v1186_v13, %s2058_s22 }
0x25ec   :  { %v1189_v17 = vpop.permute.xlu2 %1188 }
0x25ed   :  { %v1191_v18 = vadd.f32 %v1189_v17, %v1181_v14 }
0x25ef   :  { %1900 = vtanh.f32 %v1191_v18  ;;  %v1236_v36 = vrot.slane %v1191_v18, 7 }
0x25f5   :  { %v1901_v21 = vpop.eup %1900 }
0x25f6   :  { %1194 = vrot.lane.b32.xlu0 %v1901_v21, %s2058_s22 }
0x2668   :  { %v1195_v22 = vpop.permute.xlu0 %1194 }
0x2669   :  { %v1197_v23 = vmul.f32 %v1195_v22, %v1179_v38 }
0x266b   :  { %1202 = vrot.lane.b32.xlu1 %v1197_v23, %s2059_s23 }
0x26dd   :  { %v1203_v24 = vpop.permute.xlu1 %1202 }
0x26de   :  { %1777 = vmatmul.msk.f32.vlgmr.msra.gmra.mxu0 %vm68_vm0, %v1203_v24 }
0x275b   :  { %v1223_v26 = vpop.f32.mrf.mxu0 }
0x275c   :  { %v1227_v5 = vrot.slane %v1223_v26, 7 }
0x275e   :  { %v1229_v51 = vadd.f32 %v1227_v5, %v2469_v27 }
0x2760   :  { %1902 = vtanh.f32 %v1229_v51  ;;  %v1230_v30 = vmul.f32 0.5, %v1229_v51 }
0x2762   :  { %1904 = vtanh.f32 %v1230_v30 }
0x2766   :  { %v1903_v28 = vpop.eup %1902 }
0x2767   :  { %1240 = vrot.lane.b32.xlu2 %v1903_v28, %s2058_s22 }
0x2768   :  { %v1905_v31 = vpop.eup %1904 }
0x2769   :  { %v1232_v59 = vmul.f32 0.5, %v1905_v31 }
0x276b   :  { %v1233_v32 = vadd.f32 0.5, %v1232_v59 }
0x276d   :  { %v1238_v37 = vmul.f32 %v1236_v36, %v1233_v32 }
0x27c1   :  { %v1241_v33 = vpop.permute.xlu2 %1240 }
0x27c2   :  { %v1243_v35 = vmul.f32 %v1241_v33, %v1233_v32 }
0x27c4   :  { %1245 = vrot.lane.b32.xlu0 %v1243_v35, %s2058_s22 }
0x2836   :  { %v1246_v39 = vpop.permute.xlu0 %1245 }
0x2837   :  { %v1248_v40 = vadd.f32 %v1246_v39, %v1238_v37 }
0x2839   :  { %1906 = vtanh.f32 %v1248_v40  ;;  %v1294_v19 = vrot.slane %v1248_v40, 7 }
0x283f   :  { %v1907_v41 = vpop.eup %1906 }
0x2840   :  { %1251 = vrot.lane.b32.xlu1 %v1907_v41, %s2058_s22 }
0x28b2   :  { %v1252_v42 = vpop.permute.xlu1 %1251 }
0x28b3   :  { %v1254_v10 = vmul.f32 %v1252_v42, %v1233_v32 }
0x28b5   :  { %v1259_v20 = vrot.slane %v1254_v10, 1 }
0x28b7   :  { %1260 = vrot.lane.b32.xlu2 %v1259_v20, %s2059_s23 }
0x2911   :  { %v1261_v43 = vpop.permute.xlu2 %1260 }
0x2912   :  { %1778 = vmatmul.msk.f32.vlgmr.msrb.gmra.mxu1 %vm68_vm0, %v1261_v43 }
0x298f   :  { %v1281_v45 = vpop.f32.mrf.mxu1 }
0x2990   :  { %v1285_v46 = vrot.slane %v1281_v45, 6 }
0x2992   :  { %v1287_v8 = vadd.f32 %v1285_v46, %v2481_v53 }
0x2994   :  { %1908 = vtanh.f32 %v1287_v8  ;;  %v1288_v48 = vmul.f32 0.5, %v1287_v8 }
0x2996   :  { %1910 = vtanh.f32 %v1288_v48 }
0x299a   :  { %v1909_v2 = vpop.eup %1908 }
0x299b   :  { %1298 = vrot.lane.b32.xlu0 %v1909_v2, %s2058_s22 }
0x299c   :  { %v1911_v49 = vpop.eup %1910 }
0x299d   :  { %v1290_v50 = vmul.f32 0.5, %v1911_v49 }
0x299f   :  { %v1291_v29 = vadd.f32 0.5, %v1290_v50 }
0x29a1   :  { %v1296_v54 = vmul.f32 %v1294_v19, %v1291_v29 }
0x2a0d   :  { %v1299_v11 = vpop.permute.xlu0 %1298 }
0x2a0e   :  { %v1301_v52 = vmul.f32 %v1299_v11, %v1291_v29 }
0x2a10   :  { %1303 = vrot.lane.b32.xlu1 %v1301_v52, %s2058_s22 }
0x2a82   :  { %v1304_v55 = vpop.permute.xlu1 %1303 }
0x2a83   :  { %v1306_v34 = vadd.f32 %v1304_v55, %v1296_v54 }
0x2a85   :  { %1912 = vtanh.f32 %v1306_v34  ;;  %v1352_v18 = vrot.slane %v1306_v34, 7 }
0x2a8b   :  { %v1913_v56 = vpop.eup %1912 }
0x2a8c   :  { %1309 = vrot.lane.b32.xlu2 %v1913_v56, %s2058_s22 }
0x2ae6   :  { %v1310_v57 = vpop.permute.xlu2 %1309 }
0x2ae7   :  { %v1312_v9 = vmul.f32 %v1310_v57, %v1291_v29 }
0x2ae9   :  { %v1317_v58 = vrot.slane %v1312_v9, 2 }
0x2aeb   :  { %1318 = vrot.lane.b32.xlu0 %v1317_v58, %s2059_s23 }
0x2b5d   :  { %v1319_v60 = vpop.permute.xlu0 %1318 }
0x2b5e   :  { %1779 = vmatmul.msk.f32.vlgmr.msrb.gmra.mxu2 %vm68_vm0, %v1319_v60 }
0x2be1   :  { %v1339_v63 = vpop.f32.mrf.mxu2 }
0x2be2   :  { %v1343_v15 = vrot.slane %v1339_v63, 5 }
0x2be4   :  { %v1345_v4 = vadd.f32 %v1343_v15, %v2493_v3 }
0x2be6   :  { %1914 = vtanh.f32 %v1345_v4  ;;  %v1346_v7 = vmul.f32 0.5, %v1345_v4 }
0x2be8   :  { %1916 = vtanh.f32 %v1346_v7 }
0x2bec   :  { %v1915_v6 = vpop.eup %1914 }
0x2bed   :  { %1356 = vrot.lane.b32.xlu1 %v1915_v6, %s2058_s22 }
0x2bee   :  { %v1917_v38 = vpop.eup %1916 }
0x2bef   :  { %v1348_v12 = vmul.f32 0.5, %v1917_v38 }
0x2bf1   :  { %v1349_v13 = vadd.f32 0.5, %v1348_v12 }
0x2bf3   :  { %v1354_v21 = vmul.f32 %v1352_v18, %v1349_v13 }
0x2c5f   :  { %v1357_v14 = vpop.permute.xlu1 %1356 }
0x2c60   :  { %v1359_v17 = vmul.f32 %v1357_v14, %v1349_v13 }
0x2c62   :  { %1361 = vrot.lane.b32.xlu2 %v1359_v17, %s2058_s22 }
0x2cbc   :  { %v1362_v16 = vpop.permute.xlu2 %1361 }
0x2cbd   :  { %v1364_v61 = vadd.f32 %v1362_v16, %v1354_v21 }
0x2cbf   :  { %1918 = vtanh.f32 %v1364_v61  ;;  %v1407_v37 = vrot.slane %v1364_v61, 7 }
0x2cc5   :  { %v1919_v22 = vpop.eup %1918 }
0x2cc6   :  { %1367 = vrot.lane.b32.xlu0 %v1919_v22, %s2058_s22 }
0x2d38   :  { %v1368_v23 = vpop.permute.xlu0 %1367 }
0x2d39   :  { %v1370_v24 = vmul.f32 %v1368_v23, %v1349_v13 }
0x2d3b   :  { %v1372_v25 = vrot.slane %v1370_v24, 3 }
0x2d3d   :  { %1373 = vrot.lane.b32.xlu1 %v1372_v25, %s2059_s23 }
0x2daf   :  { %v1374_v26 = vpop.permute.xlu1 %1373 }
0x2db0   :  { %1780 = vmatmul.msk.f32.vlgmr.msra.gmra.mxu3 %vm68_vm0, %v1374_v26 }
0x2e33   :  { %v1394_v5 = vpop.f32.mrf.mxu3 }
0x2e34   :  { %v1398_v51 = vrot.slane %v1394_v5, 4 }
0x2e36   :  { %v1400_v28 = vadd.f32 %v1398_v51, %v2457_v0 }
0x2e38   :  { %1920 = vtanh.f32 %v1400_v28  ;;  %v1401_v31 = vmul.f32 0.5, %v1400_v28 }
0x2e3a   :  { %1922 = vtanh.f32 %v1401_v31 }
0x2e3e   :  { %v1921_v30 = vpop.eup %1920 }
0x2e3f   :  { %1411 = vrot.lane.b32.xlu2 %v1921_v30, %s2058_s22 }
0x2e40   :  { %v1923_v59 = vpop.eup %1922 }
0x2e41   :  { %v1403_v32 = vmul.f32 0.5, %v1923_v59 }
0x2e43   :  { %v1404_v33 = vadd.f32 0.5, %v1403_v32  ;;  %v1607_v32 = vld [vmem:[%s2585_s4 + $0x50] sm:$0xff] }
0x2e45   :  { %v1409_v39 = vmul.f32 %v1407_v37, %v1404_v33  ;;  %v1602_v37 = vld [vmem:[%s2585_s4 + $0x28] sm:$0xff] }
0x2e99   :  { %v1412_v35 = vpop.permute.xlu2 %1411 }
0x2e9a   :  { %v1414_v36 = vmul.f32 %v1412_v35, %v1404_v33  ;;  %v1604_v35 = vld [vmem:[%s2585_s4 + $0x38] sm:$0xff] }
0x2e9c   :  { %1416 = vrot.lane.b32.xlu0 %v1414_v36, %s2058_s22  ;;  %v1603_v36 = vld [vmem:[%s2585_s4 + $0x30] sm:$0xff] }
0x2f0e   :  { %v1417_v40 = vpop.permute.xlu0 %1416 }
0x2f0f   :  { %v1419_v41 = vadd.f32 %v1417_v40, %v1409_v39  ;;  %v1601_v39 = vld [vmem:[%s2585_s4 + $0x20] sm:$0xff]  ;;  %v1600_v40 = vld [vmem:[%s2585_s4 + $0x18] sm:$0xff] }
0x2f11   :  { %1924 = vtanh.f32 %v1419_v41  ;;  %v1462_v52 = vrot.slane %v1419_v41, 7 }
0x2f17   :  { %v1925_v42 = vpop.eup %1924 }
0x2f18   :  { %1422 = vrot.lane.b32.xlu1 %v1925_v42, %s2058_s22 }
0x2f8a   :  { %v1423_v0 = vpop.permute.xlu1 %1422 }
0x2f8b   :  { %v1425_v10 = vmul.f32 %v1423_v0, %v1404_v33  ;;  %v1605_v33 = vld [vmem:[%s2585_s4 + $0x40] sm:$0xff] }
0x2f8d   :  { %v1427_v20 = vrot.slane %v1425_v10, 4 }
0x2f8f   :  { %1428 = vrot.lane.b32.xlu2 %v1427_v20, %s2059_s23 }
0x2fe9   :  { %v1429_v43 = vpop.permute.xlu2 %1428 }
0x2fea   :  { %1781 = vmatmul.msk.f32.vlgmr.msrb.gmra.mxu0 %vm68_vm0, %v1429_v43  ;;  %v1599_v43 = vld [vmem:[%s2585_s4 + $0x10] sm:$0xff] }
0x3067   :  { %v1449_v44 = vpop.f32.mrf.mxu0 }
0x3068   :  { %v1453_v45 = vrot.slane %v1449_v44, 3  ;;  %v1598_v44 = vld [vmem:[%s2585_s4 + $0x8] sm:$0xff] }
0x306a   :  { %v1455_v46 = vadd.f32 %v1453_v45, %v2469_v27  ;;  %v1597_v45 = vld [vmem:[%s2585_s4] sm:$0xff] }
0x306c   :  { %1926 = vtanh.f32 %v1455_v46  ;;  %v1456_v2 = vmul.f32 0.5, %v1455_v46 }
0x306e   :  { %1928 = vtanh.f32 %v1456_v2 }
0x3072   :  { %v1927_v8 = vpop.eup %1926 }
0x3073   :  { %1466 = vrot.lane.b32.xlu0 %v1927_v8, %s2058_s22 }
0x3074   :  { %v1929_v48 = vpop.eup %1928 }
0x3075   :  { %v1458_v49 = vmul.f32 0.5, %v1929_v48 }
0x3077   :  { %v1459_v50 = vadd.f32 0.5, %v1458_v49 }
0x3079   :  { %v1464_v19 = vmul.f32 %v1462_v52, %v1459_v50 }
0x30e5   :  { %v1467_v29 = vpop.permute.xlu0 %1466 }
0x30e6   :  { %v1469_v11 = vmul.f32 %v1467_v29, %v1459_v50  ;;  %v1609_v29 = vld [vmem:[%s2586_s5] sm:$0x1]  ;;  %s2062_s5 = smov 109  }
0x30e8   :  { %1471 = vrot.lane.b32.xlu1 %v1469_v11, %s2058_s22 }
0x315a   :  { %v1472_v54 = vpop.permute.xlu1 %1471 }
0x315b   :  { %v1474_v55 = vadd.f32 %v1472_v54, %v1464_v19 }
0x315d   :  { %1930 = vtanh.f32 %v1474_v55  ;;  %v1517_v13 = vrot.slane %v1474_v55, 7 }
0x3163   :  { %v1931_v34 = vpop.eup %1930 }
0x3164   :  { %1477 = vrot.lane.b32.xlu2 %v1931_v34, %s2058_s22 }
0x31be   :  { %v1478_v27 = vpop.permute.xlu2 %1477 }
0x31bf   :  { %v1480_v56 = vmul.f32 %v1478_v27, %v1459_v50 }
0x31c1   :  { %v1482_v57 = vrot.slane %v1480_v56, 5 }
0x31c3   :  { %1483 = vrot.lane.b32.xlu0 %v1482_v57, %s2059_s23 }
0x3235   :  { %v1484_v9 = vpop.permute.xlu0 %1483 }
0x3236   :  { %1782 = vmatmul.msk.f32.vlgmr.msra.gmra.mxu1 %vm68_vm0, %v1484_v9 }
0x32b3   :  { %v1504_v58 = vpop.f32.mrf.mxu1 }
0x32b4   :  { %v1508_v60 = vrot.slane %v1504_v58, 2 }
0x32b6   :  { %v1510_v62 = vadd.f32 %v1508_v60, %v2481_v53 }
0x32b8   :  { %1932 = vtanh.f32 %v1510_v62  ;;  %v1511_v15 = vmul.f32 0.5, %v1510_v62 }
0x32ba   :  { %1934 = vtanh.f32 %v1511_v15 }
0x32be   :  { %v1933_v63 = vpop.eup %1932 }
0x32bf   :  { %1521 = vrot.lane.b32.xlu1 %v1933_v63, %s2058_s22 }
0x32c0   :  { %v1935_v4 = vpop.eup %1934 }
0x32c1   :  { %v1513_v6 = vmul.f32 0.5, %v1935_v4 }
0x32c3   :  { %v1514_v7 = vadd.f32 0.5, %v1513_v6 }
0x32c5   :  { %v1519_v14 = vmul.f32 %v1517_v13, %v1514_v7 }
0x3331   :  { %v1522_v38 = vpop.permute.xlu1 %1521 }
0x3332   :  { %v1524_v12 = vmul.f32 %v1522_v38, %v1514_v7 }
0x3334   :  { %1526 = vrot.lane.b32.xlu2 %v1524_v12, %s2058_s22 }
0x338e   :  { %v1527_v17 = vpop.permute.xlu2 %1526 }
0x338f   :  { %v1529_v18 = vadd.f32 %v1527_v17, %v1519_v14 }
0x3391   :  { %1936 = vtanh.f32 %v1529_v18  ;;  %v1572_v41 = vrot.slane %v1529_v18, 7 }
0x3397   :  { %v1937_v21 = vpop.eup %1936 }
0x3398   :  { %1532 = vrot.lane.b32.xlu0 %v1937_v21, %s2058_s22 }
0x340a   :  { %v1533_v53 = vpop.permute.xlu0 %1532 }
0x340b   :  { %v1535_v16 = vmul.f32 %v1533_v53, %v1514_v7 }
0x340d   :  { %v1537_v61 = vrot.slane %v1535_v16, 6 }
0x340f   :  { %1538 = vrot.lane.b32.xlu1 %v1537_v61, %s2059_s23 }
0x3481   :  { %v1539_v22 = vpop.permute.xlu1 %1538 }
0x3482   :  { %1783 = vmatmul.msk.f32.vlgmr.msra.gmra.mxu2 %vm68_vm0, %v1539_v22 }
0x3505   :  { %v1559_v23 = vpop.f32.mrf.mxu2 }
0x3506   :  { %v1563_v24 = vrot.slane %v1559_v23, 1 }
0x3508   :  { %v1565_v25 = vadd.f32 %v1563_v24, %v2493_v3  ;;  %v1608_v3 = vld [vmem:[%s2585_s4 + $0x58] sm:$0xff] }
0x3509   :  { %1619 = vmatpush.msrb.mxu3 %v1608_v3 }
0x350a   :  { %1938 = vtanh.f32 %v1565_v25  ;;  %v1566_v5 = vmul.f32 0.5, %v1565_v25 }
0x350b   :  { %1620 = vmatpush.msrb.mxu3 %v1607_v32 }
0x350c   :  { %1940 = vtanh.f32 %v1566_v5 }
0x3510   :  { %v1939_v26 = vpop.eup %1938 }
0x3511   :  { %1576 = vrot.lane.b32.xlu2 %v1939_v26, %s2058_s22 }
0x3512   :  { %v1941_v51 = vpop.eup %1940 }
0x3513   :  { %v1568_v28 = vmul.f32 0.5, %v1941_v51 }
0x3515   :  { %v1569_v30 = vadd.f32 0.5, %v1568_v28 }
0x3517   :  { %v1574_v42 = vmul.f32 %v1572_v41, %v1569_v30 }
0x3519   :  { %1591 = vrot.lane.b32.xlu2 %v2422_v47, %s2060_s3  ;;  %v1606_v47 = vld [vmem:[%s2585_s4 + $0x48] sm:$0xff]  ;;  %s2061_s4 = smov 110  }
0x351a   :  { %1621 = vmatpush.msrb.mxu3 %v1606_v47 }
0x351c   :  { %1622 = vmatpush.msrb.mxu3 %v1605_v33 }
0x351e   :  { %1623 = vmatpush.msrb.mxu3 %v1604_v35 }
0x3520   :  { %1624 = vmatpush.msrb.mxu3 %v1603_v36 }
0x3522   :  { %1625 = vmatpush.msrb.mxu3 %v1602_v37 }
0x3524   :  { %1626 = vmatpush.msrb.mxu3 %v1601_v39 }
0x3526   :  { %1627 = vmatpush.msrb.mxu3 %v1600_v40 }
0x3528   :  { %1628 = vmatpush.msrb.mxu3 %v1599_v43 }
0x352a   :  { %1629 = vmatpush.msrb.mxu3 %v1598_v44 }
0x352c   :  { %1630 = vmatpush.msrb.mxu3 %v1597_v45 }
0x356b   :  { %v1577_v31 = vpop.permute.xlu2 %1576 }
0x356c   :  { %v1579_v59 = vmul.f32 %v1577_v31, %v1569_v30 }
0x356e   :  { %1581 = vrot.lane.b32.xlu0 %v1579_v59, %s2058_s22 }
0x3573   :  { %v1592_v46 = vpop.permute.xlu2 %1591 }
0x3574   :  { %v1594_v48 = vsel %vm68_vm0, %v2309_v1, %v1592_v46  ;;  %vm1665_vm0 = vcmask 0  }
0x35e0   :  { %v1582_v0 = vpop.permute.xlu0 %1581 }
0x35e1   :  { %v1584_v10 = vadd.f32 %v1582_v0, %v1574_v42 }
0x35e3   :  { %1942 = vtanh.f32 %v1584_v10 }
0x35e9   :  { %v1943_v20 = vpop.eup %1942 }
0x35ea   :  { %1587 = vrot.lane.b32.xlu1 %v1943_v20, %s2058_s22 }
0x365c   :  { %v1588_v8 = vpop.permute.xlu1 %1587 }
0x365d   :  { %v1590_v2 = vmul.f32 %v1588_v8, %v1569_v30 }
0x365f   :  { %v1596_v49 = vsel %vm1595_vm1, %v1594_v48, %v1590_v2 }
0x3660   :  { %v1611_v50 = vrot.slane %v1596_v49, 7 }
0x3662   :  { %1784 = vmatmul.msk.f32.vlgmr.msrb.gmra.mxu3 %vm1612_vm4, %v1611_v50 }
0x36e5   :  { %v1632_v11 = vpop.f32.mrf.mxu3 }
0x36e6   :  { %v1633_v52 = vadd.f32 %v1632_v11, %v1609_v29 }
0x36e8   :  { %v1668_v19 = vsel %vm1667_vm5, %v1633_v52, -inf  ;;  %v1636_v54 = vsel %vm1635_vm6, %v1633_v52, -inf }
0x36e9   :  { %1669 = vmax.xlane.f32.xlu0 %v1668_v19  ;;  %1637 = vmax.xlane.f32.xlu2 %v1636_v54 }
0x36fd   :  { %1662 = vrot.lane.b32.xlu0 %v1633_v52, %s2061_s4 }
0x375c   :  { %v1670_v1 = vpop.xlane.xlu0 %1669  ;;  %v1638_v55 = vpop.xlane.xlu2 %1637 }
0x375d   :  { %v1671_v34 = vsub.f32 %v1633_v52, %v1670_v1  ;;  %v1639_v27 = vsub.f32 %v1633_v52, %v1638_v55 }
0x375f   :  { %v1672_v56 = vmul.f32 1.442695, %v1671_v34  ;;  %v1640_v57 = vmul.f32 1.442695, %v1639_v27 }
0x3761   :  { %1944 = vpow2.f32 %v1672_v56 }
0x3762   :  { %1946 = vpow2.f32 %v1640_v57 }
0x3767   :  { %v1945_v9 = vpop.eup %1944 }
0x3768   :  { %v1947_v58 = vpop.eup %1946  ;;  %1675 = vrot.lane.b32.xlu1 %v1945_v9, %s2062_s5 }
0x3769   :  { %v1642_v60 = vsel %vm1635_vm6, %v1947_v58, 0.0 }
0x376a   :  { %1643 = vadd.xlane.f32.xlu2 %v1642_v60 }
0x376f   :  { %v1663_v62 = vpop.permute.xlu0 %1662 }
0x3770   :  { %1666 = vst.msk [vmem:[#allocation7] sm:$0x1] %vm1665_vm0, %v1663_v62 }
0x3771   :  { %1723 = dma.vmem_to_hbm [thread:$0]  %s1719_s0, 16, %s1721_s24, [#allocation8]  }
0x37da   :  { %v1676_v63 = vpop.permute.xlu1 %1675 }
0x37db   :  { %v1679_v15 = vsel %vm1678_vm7, %v1676_v63, 0.0 }
0x37dc   :  { %1680 = vadd.xlane.f32.xlu1 %v1679_v15 }
0x37dd   :  { %v1644_v4 = vpop.xlane.xlu2 %1643 }
0x37de   :  { %1948 = vrcp.f32 %v1644_v4  ;;  %v1656_v12 = vand.u32 2147483648, %v1644_v4  ;;  %v1654_v14 = vand.u32 2147483647, %v1644_v4  ;;  %vm1650_vm9 = vweird.f32 %v1644_v4 }
0x37e0   :  { %v1657_v18 = vor.u32 1.1754944e-38, %v1656_v12  ;;  %vm1655_vm11 = vcmp.eq.f32.partialorder %v1654_v14, 8.507059e+37 }
0x37e4   :  { %v1949_v6 = vpop.eup %1948 }
0x37e5   :  { %v1646_v7 = vmul.f32 %v1949_v6, %v1644_v4  ;;  %vm1651_vm8 = vweird.f32 %v1949_v6 }
0x37e6   :  { %vm1652_vm10 = vmor %vm1650_vm9, %vm1651_vm8 }
0x37e7   :  { %v1647_v38 = vsub.f32 1.0, %v1646_v7 }
0x37e9   :  { %v1648_v13 = vmul.f32 %v1949_v6, %v1647_v38 }
0x37eb   :  { %v1649_v17 = vadd.f32 %v1949_v6, %v1648_v13 }
0x37ed   :  { %v1653_v21 = vsel %vm1652_vm10, %v1949_v6, %v1649_v17 }
0x37ee   :  { %v1658_v53 = vsel %vm1655_vm11, %v1657_v18, %v1653_v21 }
0x37ef   :  { %v1659_v16 = vmul.f32 %v1947_v58, %v1658_v53 }
0x37f1   :  { %1660 = vst.msk [vmem:[#allocation6] sm:$0x1] %vm1635_vm6, %v1659_v16 }
0x37f2   :  { %1712 = dma.vmem_to_hbm [thread:$0]  %s1708_s29, 16, %s1710_s27, [#allocation5]  }
0x384f   :  { %v1681_v61 = vpop.xlane.xlu1 %1680 }
0x3850   :  { %1950 = vrcp.f32 %v1681_v61  ;;  %v1693_v25 = vand.u32 2147483648, %v1681_v61  ;;  %v1691_v5 = vand.u32 2147483647, %v1681_v61  ;;  %vm1687_vm13 = vweird.f32 %v1681_v61 }
0x3852   :  { %v1694_v28 = vor.u32 1.1754944e-38, %v1693_v25  ;;  %vm1692_vm15 = vcmp.eq.f32.partialorder %v1691_v5, 8.507059e+37 }
0x3856   :  { %v1951_v22 = vpop.eup %1950 }
0x3857   :  { %v1683_v23 = vmul.f32 %v1951_v22, %v1681_v61  ;;  %vm1688_vm12 = vweird.f32 %v1951_v22 }
0x3858   :  { %vm1689_vm14 = vmor %vm1687_vm13, %vm1688_vm12 }
0x3859   :  { %v1684_v24 = vsub.f32 1.0, %v1683_v23 }
0x385b   :  { %v1685_v26 = vmul.f32 %v1951_v22, %v1684_v24 }
0x385d   :  { %v1686_v51 = vadd.f32 %v1951_v22, %v1685_v26 }
0x385f   :  { %v1690_v30 = vsel %vm1689_vm14, %v1951_v22, %v1686_v51 }
0x3860   :  { %v1695_v31 = vsel %vm1692_vm15, %v1694_v28, %v1690_v30 }
0x3861   :  { %v1696_v59 = vmul.f32 %v1945_v9, %v1695_v31 }
0x3863   :  { %1698 = vrot.lane.b32.xlu2 %v1696_v59, %s2062_s5 }
0x38bd   :  { %v1699_v3 = vpop.permute.xlu2 %1698 }
0x38be   :  { %1701 = vst.msk [vmem:[#allocation9] sm:$0x1] %vm1678_vm7, %v1699_v3 }
0x38bf   :  { %1734 = dma.vmem_to_hbm [thread:$0]  %s1730_s7, 16, %s1732_s10, [#allocation8]  }
0x38c0   :  { %2050 = dma.done.wait [#allocation5], 16  }
0x38c1   :  { %2051 = vsyncadd [#allocation5], 4294967280 }
0x38c2   :  { %2052 = dma.done.wait [#allocation8], 32  }
0x38c3   :  { %2053 = vsyncadd [#allocation8], 4294967264 }
0x38c4   :  { %1747 = vsyncpa [#allocation4], 1 }
0x38c5   :  { %1748 = vsyncpa [#allocation5], 1 }
0x38c6   :  { %1749 = vsyncpa [#allocation8], 1 }

</bundles_post_ra>
